<compile_context>
chip_gen: v6e
topology: v6e:2x2x1
jax: 0.10.0
libtpu: 0.0.40
codegen_flags: <defaults>
</compile_context>

<pallas_src>
import jax
import jax.numpy as jnp
from jax import lax
from jax.experimental import pallas as pl
from jax.experimental.pallas import tpu as pltpu


_BT = 8        # batch tile = sublane count; recurrence advances 8 sequences at once
_TCHUNK = 8    # timesteps per statically-unrolled inner chunk (LLO visibility)


def _round_up(n, m):
    return ((n + m - 1) // m) * m


def _epilogue_rows(rows):
    # Largest power-of-two row chunk (<=512) dividing `rows` (rows is a multiple of 64).
    for c in (512, 256, 128, 64, 32, 16, 8):
        if rows % c == 0:
            return c
    return rows


def _pick_vmem_limit():
    # v5e/v6e: 128 MiB physical VMEM (scoped defaults only 16/32 MiB) -> raise to 96 MiB.
    # v7x: 64 MiB physical -> cap at 48 MiB to leave headroom for double-buffered outputs.
    try:
        phys = pltpu.get_tpu_info().vmem_capacity_bytes
        return int(min(96 * 1024 * 1024, max(32 * 1024 * 1024, (phys * 3) // 4)))
    except Exception:
        return 48 * 1024 * 1024


# ----------------------------------------------------------------------------
# Fused net kernel: conv_pre -> GRU stack -> conv_post (+exp)
# One grid step handles a tile of _BT batch elements (grid axis "parallel").
# Row layout everywhere: row = t * _BT + b   (time-major, batch fastest)
# ----------------------------------------------------------------------------

def _ddsp_net_kernel(x_ref, w_pre_ref, b_pre_ref,
                     wih_ref, whh_ref, bih_ref, bhh_ref,
                     w_post_ref, b_post_ref,
                     out_ref,
                     h_buf, gi_buf):
    # x_ref:    (rows, Cin) bf16,  rows = Tp * _BT
    # w_pre:    (Cin, H) bf16,  b_pre (1, H) f32
    # wih/whh:  (L, H, 3H) bf16, gate columns [ r | z | n ];  bih/bhh (L, 1, 3H) f32
    # w_post:   (H, 2*Fpad) bf16 (se | ap halves),  b_post (1, 2*Fpad) f32
    # out_ref:  (rows, 2*Fpad) f32
    # h_buf:    (rows, H)  bf16  layer activations, VMEM-resident across layers
    # gi_buf:   (rows, 3H) bf16  hoisted input projections of the current layer
    rows, H = h_buf.shape
    L = wih_ref.shape[0]
    n_chunks = rows // (_TCHUNK * _BT)

    # ---- conv_pre: 1x1 Conv1d == one (rows, Cin) x (Cin, H) matmul ----------
    h_buf[...] = (jnp.dot(x_ref[...], w_pre_ref[...],
                          preferred_element_type=jnp.float32)
                  + b_pre_ref[...]).astype(jnp.bfloat16)

    # ---- GRU stack ----------------------------------------------------------
    for l in range(L):
        # Hoisted input projection: ONE fused (rows, H) x (H, 3H) MXU matmul per layer.
        gi_buf[...] = (jnp.dot(h_buf[...], wih_ref[l],
                               preferred_element_type=jnp.float32)
                       + bih_ref[l]).astype(jnp.bfloat16)

        whh_l = whh_ref[l]          # (H, 3H) bf16, loop-invariant across time
        bhh_l = bhh_ref[l]          # (1, 3H) f32
        # TODO(synk): if a bundle dump shows Mosaic re-pushing whh_l into the MXU every
        # timestep, hold it stationary across the chunk via pltpu.matmul_push_rhs/_acc_lhs/_pop.

        def chunk_body(c, h):
            base = pl.multiple_of(c * (_TCHUNK * _BT), _TCHUNK * _BT)
            gi_c = gi_buf[pl.ds(base, _TCHUNK * _BT), :]          # (_TCHUNK*_BT, 3H) bf16
            for s in range(_TCHUNK):                              # static unroll
                gi_t = gi_c[s * _BT:(s + 1) * _BT, :]             # (_BT, 3H) bf16
                # ONE fused recurrent matmul per timestep: (BT, H) x (H, 3H)
                gh = jnp.dot(h.astype(jnp.bfloat16), whh_l,
                             preferred_element_type=jnp.float32) + bhh_l
                rz = jax.nn.sigmoid(gi_t[:, :2 * H] + gh[:, :2 * H])
                r = rz[:, :H]
                z = rz[:, H:]
                n = jnp.tanh(gi_t[:, 2 * H:] + r * gh[:, 2 * H:])
                h = (1.0 - z) * n + z * h                          # carried state stays f32
                row = pl.multiple_of(base + s * _BT, _BT)
                # dense sublane-aligned (BT, H) store; no masked single-row stores
                h_buf[pl.ds(row, _BT), :] = h.astype(jnp.bfloat16)
            return h

        h0 = jnp.zeros((_BT, H), jnp.float32)
        lax.fori_loop(0, n_chunks, chunk_body, h0)

    # ---- conv_post + exp, chunked over rows: EUP exp of chunk i overlaps the
    #      MXU matmul of chunk i+1 -----------------------------------------------
    w_post = w_post_ref[...]
    b_post = b_post_ref[...]
    ep = _epilogue_rows(rows)
    n_ep = rows // ep

    def ep_body(c, carry):
        r0 = pl.multiple_of(c * ep, 8)
        hb = h_buf[pl.ds(r0, ep), :]
        y = jnp.exp(jnp.dot(hb, w_post, preferred_element_type=jnp.float32) + b_post)
        out_ref[pl.ds(r0, ep), :] = y
        return carry

    lax.fori_loop(0, n_ep, ep_body, 0)


def ddsp_net(params, fft_bin, x_nct):
    """conv_pre -> Grux(GRU stack) -> conv_post -> exp/split, fused in one kernel.

    x_nct: (B, in_channels, T).  Returns se, ap each (B, T, fft_bin) f32.
    """
    B, Cin, T = x_nct.shape
    Tp = _round_up(T, _TCHUNK)
    Bp = _round_up(B, _BT)
    Gb = Bp // _BT
    rows = Tp * _BT

    D = params["conv_pre_w"].shape[1]
    L = params["gru_wih"].shape[0]
    H3 = params["gru_wih"].shape[2]
    H = D
    F2 = params["conv_post_w"].shape[1]
    Fpad = F2 // 2
    assert H3 == 3 * H

    # (B, Cin, T) -> time-major batch tiles (Gb * rows, Cin), row = t*_BT + b_local.
    # Only the tiny input tensor is rearranged in XLA; activations stay in VMEM.
    x = jnp.transpose(x_nct, (2, 0, 1)).astype(jnp.bfloat16)          # (T, B, Cin)
    x = jnp.pad(x, ((0, Tp - T), (0, Bp - B), (0, 0)))                # (Tp, Bp, Cin)
    x = x.reshape(Tp, Gb, _BT, Cin).transpose(1, 0, 2, 3).reshape(Gb * rows, Cin)

    # NOTE: weight inputs are grid-invariant; single-buffering them
    # (pipeline_mode=pl.Buffered(1)) would halve their VMEM footprint on v7x.
    out = pl.pallas_call(
        _ddsp_net_kernel,
        out_shape=jax.ShapeDtypeStruct((Gb * rows, F2), jnp.float32),
        grid_spec=pltpu.PrefetchScalarGridSpec(
            num_scalar_prefetch=0,
            grid=(Gb,),
            in_specs=[
                pl.BlockSpec((rows, Cin), lambda g: (g, 0)),
                pl.BlockSpec((Cin, H), lambda g: (0, 0)),
                pl.BlockSpec((1, H), lambda g: (0, 0)),
                pl.BlockSpec((L, H, H3), lambda g: (0, 0, 0)),
                pl.BlockSpec((L, H, H3), lambda g: (0, 0, 0)),
                pl.BlockSpec((L, 1, H3), lambda g: (0, 0, 0)),
                pl.BlockSpec((L, 1, H3), lambda g: (0, 0, 0)),
                pl.BlockSpec((H, F2), lambda g: (0, 0)),
                pl.BlockSpec((1, F2), lambda g: (0, 0)),
            ],
            out_specs=pl.BlockSpec((rows, F2), lambda g: (g, 0)),
            scratch_shapes=[
                pltpu.VMEM((rows, H), jnp.bfloat16),    # h_buf (layer activations)
                pltpu.VMEM((rows, H3), jnp.bfloat16),   # gi_buf (fused input projections)
            ]),
        compiler_params=pltpu.CompilerParams(
            dimension_semantics=("parallel",),           # v7x: batch tiles over 2 TCs
            vmem_limit_bytes=_pick_vmem_limit(),
        ),
    )(x, params["conv_pre_w"], params["conv_pre_b"],
      params["gru_wih"], params["gru_whh"], params["gru_bih"], params["gru_bhh"],
      params["conv_post_w"], params["conv_post_b"])

    # (Gb*rows, 2*Fpad) -> (Bp, Tp, 2*Fpad); strip batch/time pads; split se/ap halves.
    out = out.reshape(Gb, Tp, _BT, F2).transpose(0, 2, 1, 3).reshape(Bp, Tp, F2)
    out = out[:B, :T]
    se = out[:, :, :fft_bin]
    ap = out[:, :, Fpad:Fpad + fft_bin]
    return se, ap


# ----------------------------------------------------------------------------
# build_reverb: a few KB of elementwise work -> plain XLA (per performance review:
# a separate pallas_call launch + HBM round trip would exceed the compute itself).
# ----------------------------------------------------------------------------

def build_reverb(reverb_noise, t_buf, reverb_params):
    wet = reverb_params[:, 0]
    decay = reverb_params[:, 1]
    ir = reverb_noise / jnp.maximum(
        jnp.sqrt(jnp.sum(reverb_noise * reverb_noise, axis=1, keepdims=True)), 1e-12)
    coeff = (jnp.exp(-jax.nn.softplus(-decay)[:, None] * t_buf * 500.0)
             * jax.nn.sigmoid(wet)[:, None])
    ir = ir * coeff
    ir = ir / jnp.maximum(
        jnp.sqrt(jnp.sum(ir * ir, axis=1, keepdims=True)), 1e-12)
    return ir


# ----------------------------------------------------------------------------
# SubtractiveVocoder.synthesize (plain JAX: FFT/STFT has no Pallas equivalent)
# ----------------------------------------------------------------------------
# TODO(synk): SubtractiveVocoder source not provided; this is a minimal DDSP-style
# subtractive synthesis (sinusoid + noise excitation, per-frame spectral filtering
# with se/ap, FFT reverb convolution) kept in plain JAX because of the FFTs.

def subtractive_vocoder_synthesize(f0, se, ap, reverb, noise, *, n_fft, hop, sample_rate):
    B, T, _ = se.shape
    L = T * hop
    pad = n_fft // 2

    f0_up = jnp.repeat(f0, hop, axis=1)                           # (B, L)
    phase = jnp.cumsum(2.0 * jnp.pi * f0_up / sample_rate, axis=1)
    periodic = jnp.sin(phase)

    win = jnp.hanning(n_fft).astype(jnp.float32)
    frame_idx = jnp.arange(T)[:, None] * hop + jnp.arange(n_fft)[None, :]
    # squared-window overlap sum (COLA normalization)
    wsum = jnp.zeros((L + 2 * pad,), jnp.float32).at[frame_idx].add(
        jnp.broadcast_to(win * win, (T, n_fft)))
    wsum = jnp.maximum(wsum[pad:pad + L], 1e-6)

    def stft_filter(sig, filt):
        sigp = jnp.pad(sig, ((0, 0), (pad, pad)))
        frames = sigp[:, frame_idx] * win                         # (B, T, n_fft)
        spec = jnp.fft.rfft(frames, axis=-1) * filt               # (B, T, fft_bin)
        out_frames = jnp.fft.irfft(spec, n=n_fft, axis=-1) * win
        out = jnp.zeros((B, L + 2 * pad), jnp.float32).at[:, frame_idx].add(out_frames)
        return out[:, pad:pad + L] / wsum

    sig = stft_filter(periodic, se) + stft_filter(noise, ap)

    if reverb is not None:
        R = reverb.shape[-1]
        nconv = L + R
        wet_sig = jnp.fft.irfft(
            jnp.fft.rfft(sig, n=nconv, axis=-1) * jnp.fft.rfft(reverb, n=nconv, axis=-1),
            n=nconv, axis=-1)[:, :L]
        sig = sig + wet_sig
    return sig


# ----------------------------------------------------------------------------
# DdspGenerator forward
# ----------------------------------------------------------------------------

def ddsp_generator_forward(params, cfg, x_nct, f0, noise):
    """x_nct: (B, in_channels, T) features, f0: (B, T). Returns (B, 1, L)."""
    rev = build_reverb(params["reverb_noise"], params["t"], params["reverb_params"])
    se, ap = ddsp_net(params, cfg["fft_bin"], x_nct)               # (B, T, fft_bin)
    audio = subtractive_vocoder_synthesize(
        f0, se, ap, rev, noise,
        n_fft=cfg["n_fft"], hop=cfg["hop"], sample_rate=cfg["sample_rate"])
    return audio[:, None, :]                                       # (B, 1, L)


# ----------------------------------------------------------------------------
# Deterministic parameter init (synthetic; no checkpoint loading)
# ----------------------------------------------------------------------------
# TODO(synk): Grux source unavailable; approximated as a stack of standard GRU
# layers (gin_channels == 0, so no conditioning path is needed).

def init_params(key, *, in_channels, d_model, num_layers, reverb_size, fft_bin, sample_rate):
    f_pad = _round_up(fft_bin, 128)
    ks = jax.random.split(key, 8)
    p = {}

    p["conv_pre_w"] = (0.1 * jax.random.normal(
        ks[0], (in_channels, d_model), jnp.float32)).astype(jnp.bfloat16)
    p["conv_pre_b"] = jnp.zeros((1, d_model), jnp.float32)

    k = 1.0 / float(d_model) ** 0.5
    w_shape = (num_layers, d_model, 3 * d_model)                   # gate columns r|z|n
    p["gru_wih"] = jax.random.uniform(ks[1], w_shape, jnp.float32, -k, k).astype(jnp.bfloat16)
    p["gru_whh"] = jax.random.uniform(ks[2], w_shape, jnp.float32, -k, k).astype(jnp.bfloat16)
    p["gru_bih"] = jax.random.uniform(ks[3], (num_layers, 1, 3 * d_model), jnp.float32, -k, k)
    p["gru_bhh"] = jax.random.uniform(ks[4], (num_layers, 1, 3 * d_model), jnp.float32, -k, k)

    # conv_post fused into one (D, 2*Fpad) weight: [ se | pad | ap | pad ]
    w_post = 0.05 * jax.random.normal(ks[5], (d_model, 2 * fft_bin), jnp.float32)
    w = jnp.zeros((d_model, 2 * f_pad), jnp.float32)
    w = w.at[:, :fft_bin].set(w_post[:, :fft_bin])
    w = w.at[:, f_pad:f_pad + fft_bin].set(w_post[:, fft_bin:])
    p["conv_post_w"] = w.astype(jnp.bfloat16)
    p["conv_post_b"] = jnp.zeros((1, 2 * f_pad), jnp.float32)

    # reverb_noise = F.normalize(randn(R), dim=0)[None, :]
    rn = jax.random.normal(ks[6], (reverb_size,), jnp.float32)
    rn = rn / jnp.maximum(jnp.sqrt(jnp.sum(rn * rn)), 1e-12)
    p["reverb_noise"] = rn[None, :]
    p["reverb_params"] = jnp.zeros((1, 2), jnp.float32)            # [wet, decay]
    p["t"] = (jnp.arange(reverb_size, dtype=jnp.float32) / sample_rate)[None, :]
    return p


if __name__ == "__main__":
    # Small shapes consistent with the module
    B, T = 2, 12
    in_channels, d_model, num_layers = 8, 32, 2
    n_fft, hop, sample_rate = 16, 4, 16000
    fft_bin = n_fft // 2 + 1
    reverb_size = 256
    cfg = {"fft_bin": fft_bin, "n_fft": n_fft, "hop": hop, "sample_rate": sample_rate}

    root = jax.random.PRNGKey(0)
    k_param, k_x, k_f0, k_noise = jax.random.split(root, 4)

    params = init_params(k_param, in_channels=in_channels, d_model=d_model,
                         num_layers=num_layers, reverb_size=reverb_size,
                         fft_bin=fft_bin, sample_rate=sample_rate)

    x = jax.random.normal(k_x, (B, in_channels, T), jnp.float32)   # NCT like PyTorch
    f0 = 100.0 + 200.0 * jax.random.uniform(k_f0, (B, T), jnp.float32)
    vnoise = jax.random.uniform(k_noise, (B, T * hop), jnp.float32, -1.0, 1.0)

    out = ddsp_generator_forward(params, cfg, x, f0, vnoise)
    out = jax.block_until_ready(out)

    assert out.shape == (B, 1, T * hop), out.shape
    assert bool(jnp.all(jnp.isfinite(out)))
    print("KERNEL_OK")
</pallas_src>

<mosaic_0001>
module attributes {stable_mosaic.version = 11 : i64} {
  func.func @_ddsp_net_kernel(%arg0: i32, %arg1: memref<128x8xbf16, #tpu.memory_space<vmem>>, %arg2: memref<8x32xbf16, #tpu.memory_space<vmem>>, %arg3: memref<1x32xf32, #tpu.memory_space<vmem>>, %arg4: memref<2x32x96xbf16, #tpu.memory_space<vmem>>, %arg5: memref<2x32x96xbf16, #tpu.memory_space<vmem>>, %arg6: memref<2x1x96xf32, #tpu.memory_space<vmem>>, %arg7: memref<2x1x96xf32, #tpu.memory_space<vmem>>, %arg8: memref<32x256xbf16, #tpu.memory_space<vmem>>, %arg9: memref<1x256xf32, #tpu.memory_space<vmem>>, %arg10: memref<128x256xf32, #tpu.memory_space<vmem>>, %arg11: memref<128x32xbf16, #tpu.memory_space<vmem>>, %arg12: memref<128x96xbf16, #tpu.memory_space<vmem>>) attributes {dimension_semantics = [#tpu.dimension_semantics<parallel>], iteration_bounds = array<i64: 1>, scalar_prefetch = 0 : i64, scratch_operands = 2 : i64, tpu.core_type = #tpu.core_type<tc>, window_params = [{transform_indices = @transform_0, window_bounds = array<i64: 128, 8>}, {pipeline_mode = #tpu.pipeline_mode<synchronous>, transform_indices = @transform_1, window_bounds = array<i64: 8, 32>}, {pipeline_mode = #tpu.pipeline_mode<synchronous>, transform_indices = @transform_2, window_bounds = array<i64: 1, 32>}, {pipeline_mode = #tpu.pipeline_mode<synchronous>, transform_indices = @transform_3, window_bounds = array<i64: 2, 32, 96>}, {pipeline_mode = #tpu.pipeline_mode<synchronous>, transform_indices = @transform_4, window_bounds = array<i64: 2, 32, 96>}, {pipeline_mode = #tpu.pipeline_mode<synchronous>, transform_indices = @transform_5, window_bounds = array<i64: 2, 1, 96>}, {pipeline_mode = #tpu.pipeline_mode<synchronous>, transform_indices = @transform_6, window_bounds = array<i64: 2, 1, 96>}, {pipeline_mode = #tpu.pipeline_mode<synchronous>, transform_indices = @transform_7, window_bounds = array<i64: 32, 256>}, {pipeline_mode = #tpu.pipeline_mode<synchronous>, transform_indices = @transform_8, window_bounds = array<i64: 1, 256>}, {transform_indices = @transform_9, window_bounds = array<i64: 128, 256>}]} {
    %c0 = arith.constant 0 : index
    %c0_0 = arith.constant 0 : index
    %0 = vector.load %arg1[%c0, %c0_0] : memref<128x8xbf16, #tpu.memory_space<vmem>>, vector<128x8xbf16>
    %c0_1 = arith.constant 0 : index
    %c0_2 = arith.constant 0 : index
    %1 = vector.load %arg2[%c0_1, %c0_2] : memref<8x32xbf16, #tpu.memory_space<vmem>>, vector<8x32xbf16>
    %cst = arith.constant dense<0.000000e+00> : vector<128x32xf32>
    %2 = tpu.matmul %0, %1, %cst {dimension_numbers = #tpu.dot_dimension_numbers<[1], [0], [0], [1], [0, 0, 1, 1], [], []>} : vector<128x8xbf16>, vector<8x32xbf16>, vector<128x32xf32> -> vector<128x32xf32>
    %c0_3 = arith.constant 0 : index
    %c0_4 = arith.constant 0 : index
    %3 = vector.load %arg3[%c0_3, %c0_4] : memref<1x32xf32, #tpu.memory_space<vmem>>, vector<1x32xf32>
    %4 = vector.broadcast %3 : vector<1x32xf32> to vector<128x32xf32>
    %5 = arith.addf %2, %4 : vector<128x32xf32>
    %6 = arith.truncf %5 : vector<128x32xf32> to vector<128x32xbf16>
    %c0_5 = arith.constant 0 : index
    %c0_6 = arith.constant 0 : index
    %7 = vector.load %arg11[%c0_5, %c0_6] : memref<128x32xbf16, #tpu.memory_space<vmem>>, vector<128x32xbf16>
    tpu.vector_store %arg11[%c0_5, %c0_6], %6 {strides = array<i32>} : memref<128x32xbf16, #tpu.memory_space<vmem>>, vector<128x32xbf16>,
    %c0_7 = arith.constant 0 : index
    %c0_8 = arith.constant 0 : index
    %8 = vector.load %arg11[%c0_7, %c0_8] : memref<128x32xbf16, #tpu.memory_space<vmem>>, vector<128x32xbf16>
    %c0_9 = arith.constant 0 : index
    %c0_10 = arith.constant 0 : index
    %c0_11 = arith.constant 0 : index
    %9 = vector.load %arg4[%c0_9, %c0_10, %c0_11] : memref<2x32x96xbf16, #tpu.memory_space<vmem>>, vector<1x32x96xbf16>
    %10 = vector.shape_cast %9 : vector<1x32x96xbf16> to vector<32x96xbf16>
    %cst_12 = arith.constant dense<0.000000e+00> : vector<128x96xf32>
    %11 = tpu.matmul %8, %10, %cst_12 {dimension_numbers = #tpu.dot_dimension_numbers<[1], [0], [0], [1], [0, 0, 1, 1], [], []>} : vector<128x32xbf16>, vector<32x96xbf16>, vector<128x96xf32> -> vector<128x96xf32>
    %c0_13 = arith.constant 0 : index
    %c0_14 = arith.constant 0 : index
    %c0_15 = arith.constant 0 : index
    %12 = vector.load %arg6[%c0_13, %c0_14, %c0_15] : memref<2x1x96xf32, #tpu.memory_space<vmem>>, vector<1x1x96xf32>
    %13 = vector.shape_cast %12 : vector<1x1x96xf32> to vector<1x96xf32>
    %14 = vector.broadcast %13 : vector<1x96xf32> to vector<128x96xf32>
    %15 = arith.addf %11, %14 : vector<128x96xf32>
    %16 = arith.truncf %15 : vector<128x96xf32> to vector<128x96xbf16>
    %c0_16 = arith.constant 0 : index
    %c0_17 = arith.constant 0 : index
    %17 = vector.load %arg12[%c0_16, %c0_17] : memref<128x96xbf16, #tpu.memory_space<vmem>>, vector<128x96xbf16>
    tpu.vector_store %arg12[%c0_16, %c0_17], %16 {strides = array<i32>} : memref<128x96xbf16, #tpu.memory_space<vmem>>, vector<128x96xbf16>,
    %c0_18 = arith.constant 0 : index
    %c0_19 = arith.constant 0 : index
    %c0_20 = arith.constant 0 : index
    %18 = vector.load %arg5[%c0_18, %c0_19, %c0_20] : memref<2x32x96xbf16, #tpu.memory_space<vmem>>, vector<1x32x96xbf16>
    %19 = vector.shape_cast %18 : vector<1x32x96xbf16> to vector<32x96xbf16>
    %c0_21 = arith.constant 0 : index
    %c0_22 = arith.constant 0 : index
    %c0_23 = arith.constant 0 : index
    %20 = vector.load %arg7[%c0_21, %c0_22, %c0_23] : memref<2x1x96xf32, #tpu.memory_space<vmem>>, vector<1x1x96xf32>
    %21 = vector.shape_cast %20 : vector<1x1x96xf32> to vector<1x96xf32>
    %cst_24 = arith.constant 0.000000e+00 : f32
    %22 = vector.broadcast %cst_24 : f32 to vector<8x32xf32>
    %c0_i32 = arith.constant 0 : i32
    %c2_i32 = arith.constant 2 : i32
    %23 = arith.addi %c0_i32, %c2_i32 : i32
    %c1_i32 = arith.constant 1 : i32
    %24 = scf.for %arg13 = %c0_i32 to %23 step %c1_i32 iter_args(%arg14 = %22) -> (vector<8x32xf32>)  : i32 {
      %c64_i32 = arith.constant 64 : i32
      %54 = arith.muli %arg13, %c64_i32 : i32
      %55 = tpu.assume_multiple %54, 64 : i32
      %56 = arith.index_cast %55 : i32 to index
      %c0_56 = arith.constant 0 : index
      %57 = vector.load %arg12[%56, %c0_56] : memref<128x96xbf16, #tpu.memory_space<vmem>>, vector<64x96xbf16>
      %58 = vector.extract_strided_slice %57 {offsets = [0, 0], sizes = [8, 96], strides = [1, 1]} : vector<64x96xbf16> to vector<8x96xbf16>
      %59 = arith.truncf %arg14 : vector<8x32xf32> to vector<8x32xbf16>
      %cst_57 = arith.constant dense<0.000000e+00> : vector<8x96xf32>
      %60 = tpu.matmul %59, %19, %cst_57 {dimension_numbers = #tpu.dot_dimension_numbers<[1], [0], [0], [1], [0, 0, 1, 1], [], []>} : vector<8x32xbf16>, vector<32x96xbf16>, vector<8x96xf32> -> vector<8x96xf32>
      %61 = vector.broadcast %21 : vector<1x96xf32> to vector<8x96xf32>
      %62 = arith.addf %60, %61 : vector<8x96xf32>
      %63 = vector.extract_strided_slice %58 {offsets = [0, 0], sizes = [8, 64], strides = [1, 1]} : vector<8x96xbf16> to vector<8x64xbf16>
      %64 = vector.extract_strided_slice %62 {offsets = [0, 0], sizes = [8, 64], strides = [1, 1]} : vector<8x96xf32> to vector<8x64xf32>
      %65 = arith.extf %63 : vector<8x64xbf16> to vector<8x64xf32>
      %66 = arith.addf %65, %64 : vector<8x64xf32>
      %67 = arith.negf %66 : vector<8x64xf32>
      %68 = math.exp %67 : vector<8x64xf32>
      %cst_58 = arith.constant 1.000000e+00 : f32
      %69 = vector.broadcast %cst_58 : f32 to vector<8x64xf32>
      %70 = arith.addf %69, %68 : vector<8x64xf32>
      %71 = arith.divf %69, %70 : vector<8x64xf32>
      %72 = vector.extract_strided_slice %71 {offsets = [0, 0], sizes = [8, 32], strides = [1, 1]} : vector<8x64xf32> to vector<8x32xf32>
      %73 = vector.extract_strided_slice %71 {offsets = [0, 32], sizes = [8, 32], strides = [1, 1]} : vector<8x64xf32> to vector<8x32xf32>
      %74 = vector.extract_strided_slice %58 {offsets = [0, 64], sizes = [8, 32], strides = [1, 1]} : vector<8x96xbf16> to vector<8x32xbf16>
      %75 = vector.extract_strided_slice %62 {offsets = [0, 64], sizes = [8, 32], strides = [1, 1]} : vector<8x96xf32> to vector<8x32xf32>
      %76 = arith.mulf %72, %75 : vector<8x32xf32>
      %77 = arith.extf %74 : vector<8x32xbf16> to vector<8x32xf32>
      %78 = arith.addf %77, %76 : vector<8x32xf32>
      %79 = math.tanh %78 : vector<8x32xf32>
      %cst_59 = arith.constant 1.000000e+00 : f32
      %80 = vector.broadcast %cst_59 : f32 to vector<8x32xf32>
      %81 = arith.subf %80, %73 : vector<8x32xf32>
      %82 = arith.mulf %81, %79 : vector<8x32xf32>
      %83 = arith.mulf %73, %arg14 : vector<8x32xf32>
      %84 = arith.addf %82, %83 : vector<8x32xf32>
      %c0_i32_60 = arith.constant 0 : i32
      %85 = arith.addi %55, %c0_i32_60 : i32
      %86 = tpu.assume_multiple %85, 8 : i32
      %87 = arith.truncf %84 : vector<8x32xf32> to vector<8x32xbf16>
      %88 = arith.index_cast %86 : i32 to index
      %c0_61 = arith.constant 0 : index
      %89 = vector.load %arg11[%88, %c0_61] : memref<128x32xbf16, #tpu.memory_space<vmem>>, vector<8x32xbf16>
      tpu.vector_store %arg11[%88, %c0_61], %87 {strides = array<i32>} : memref<128x32xbf16, #tpu.memory_space<vmem>>, vector<8x32xbf16>,
      %90 = vector.extract_strided_slice %57 {offsets = [8, 0], sizes = [8, 96], strides = [1, 1]} : vector<64x96xbf16> to vector<8x96xbf16>
      %91 = arith.truncf %84 : vector<8x32xf32> to vector<8x32xbf16>
      %cst_62 = arith.constant dense<0.000000e+00> : vector<8x96xf32>
      %92 = tpu.matmul %91, %19, %cst_62 {dimension_numbers = #tpu.dot_dimension_numbers<[1], [0], [0], [1], [0, 0, 1, 1], [], []>} : vector<8x32xbf16>, vector<32x96xbf16>, vector<8x96xf32> -> vector<8x96xf32>
      %93 = vector.broadcast %21 : vector<1x96xf32> to vector<8x96xf32>
      %94 = arith.addf %92, %93 : vector<8x96xf32>
      %95 = vector.extract_strided_slice %90 {offsets = [0, 0], sizes = [8, 64], strides = [1, 1]} : vector<8x96xbf16> to vector<8x64xbf16>
      %96 = vector.extract_strided_slice %94 {offsets = [0, 0], sizes = [8, 64], strides = [1, 1]} : vector<8x96xf32> to vector<8x64xf32>
      %97 = arith.extf %95 : vector<8x64xbf16> to vector<8x64xf32>
      %98 = arith.addf %97, %96 : vector<8x64xf32>
      %99 = arith.negf %98 : vector<8x64xf32>
      %100 = math.exp %99 : vector<8x64xf32>
      %cst_63 = arith.constant 1.000000e+00 : f32
      %101 = vector.broadcast %cst_63 : f32 to vector<8x64xf32>
      %102 = arith.addf %101, %100 : vector<8x64xf32>
      %103 = arith.divf %101, %102 : vector<8x64xf32>
      %104 = vector.extract_strided_slice %103 {offsets = [0, 0], sizes = [8, 32], strides = [1, 1]} : vector<8x64xf32> to vector<8x32xf32>
      %105 = vector.extract_strided_slice %103 {offsets = [0, 32], sizes = [8, 32], strides = [1, 1]} : vector<8x64xf32> to vector<8x32xf32>
      %106 = vector.extract_strided_slice %90 {offsets = [0, 64], sizes = [8, 32], strides = [1, 1]} : vector<8x96xbf16> to vector<8x32xbf16>
      %107 = vector.extract_strided_slice %94 {offsets = [0, 64], sizes = [8, 32], strides = [1, 1]} : vector<8x96xf32> to vector<8x32xf32>
      %108 = arith.mulf %104, %107 : vector<8x32xf32>
      %109 = arith.extf %106 : vector<8x32xbf16> to vector<8x32xf32>
      %110 = arith.addf %109, %108 : vector<8x32xf32>
      %111 = math.tanh %110 : vector<8x32xf32>
      %cst_64 = arith.constant 1.000000e+00 : f32
      %112 = vector.broadcast %cst_64 : f32 to vector<8x32xf32>
      %113 = arith.subf %112, %105 : vector<8x32xf32>
      %114 = arith.mulf %113, %111 : vector<8x32xf32>
      %115 = arith.mulf %105, %84 : vector<8x32xf32>
      %116 = arith.addf %114, %115 : vector<8x32xf32>
      %c8_i32 = arith.constant 8 : i32
      %117 = arith.addi %55, %c8_i32 : i32
      %118 = tpu.assume_multiple %117, 8 : i32
      %119 = arith.truncf %116 : vector<8x32xf32> to vector<8x32xbf16>
      %120 = arith.index_cast %118 : i32 to index
      %c0_65 = arith.constant 0 : index
      %121 = vector.load %arg11[%120, %c0_65] : memref<128x32xbf16, #tpu.memory_space<vmem>>, vector<8x32xbf16>
      tpu.vector_store %arg11[%120, %c0_65], %119 {strides = array<i32>} : memref<128x32xbf16, #tpu.memory_space<vmem>>, vector<8x32xbf16>,
      %122 = vector.extract_strided_slice %57 {offsets = [16, 0], sizes = [8, 96], strides = [1, 1]} : vector<64x96xbf16> to vector<8x96xbf16>
      %123 = arith.truncf %116 : vector<8x32xf32> to vector<8x32xbf16>
      %cst_66 = arith.constant dense<0.000000e+00> : vector<8x96xf32>
      %124 = tpu.matmul %123, %19, %cst_66 {dimension_numbers = #tpu.dot_dimension_numbers<[1], [0], [0], [1], [0, 0, 1, 1], [], []>} : vector<8x32xbf16>, vector<32x96xbf16>, vector<8x96xf32> -> vector<8x96xf32>
      %125 = vector.broadcast %21 : vector<1x96xf32> to vector<8x96xf32>
      %126 = arith.addf %124, %125 : vector<8x96xf32>
      %127 = vector.extract_strided_slice %122 {offsets = [0, 0], sizes = [8, 64], strides = [1, 1]} : vector<8x96xbf16> to vector<8x64xbf16>
      %128 = vector.extract_strided_slice %126 {offsets = [0, 0], sizes = [8, 64], strides = [1, 1]} : vector<8x96xf32> to vector<8x64xf32>
      %129 = arith.extf %127 : vector<8x64xbf16> to vector<8x64xf32>
      %130 = arith.addf %129, %128 : vector<8x64xf32>
      %131 = arith.negf %130 : vector<8x64xf32>
      %132 = math.exp %131 : vector<8x64xf32>
      %cst_67 = arith.constant 1.000000e+00 : f32
      %133 = vector.broadcast %cst_67 : f32 to vector<8x64xf32>
      %134 = arith.addf %133, %132 : vector<8x64xf32>
      %135 = arith.divf %133, %134 : vector<8x64xf32>
      %136 = vector.extract_strided_slice %135 {offsets = [0, 0], sizes = [8, 32], strides = [1, 1]} : vector<8x64xf32> to vector<8x32xf32>
      %137 = vector.extract_strided_slice %135 {offsets = [0, 32], sizes = [8, 32], strides = [1, 1]} : vector<8x64xf32> to vector<8x32xf32>
      %138 = vector.extract_strided_slice %122 {offsets = [0, 64], sizes = [8, 32], strides = [1, 1]} : vector<8x96xbf16> to vector<8x32xbf16>
      %139 = vector.extract_strided_slice %126 {offsets = [0, 64], sizes = [8, 32], strides = [1, 1]} : vector<8x96xf32> to vector<8x32xf32>
      %140 = arith.mulf %136, %139 : vector<8x32xf32>
      %141 = arith.extf %138 : vector<8x32xbf16> to vector<8x32xf32>
      %142 = arith.addf %141, %140 : vector<8x32xf32>
      %143 = math.tanh %142 : vector<8x32xf32>
      %cst_68 = arith.constant 1.000000e+00 : f32
      %144 = vector.broadcast %cst_68 : f32 to vector<8x32xf32>
      %145 = arith.subf %144, %137 : vector<8x32xf32>
      %146 = arith.mulf %145, %143 : vector<8x32xf32>
      %147 = arith.mulf %137, %116 : vector<8x32xf32>
      %148 = arith.addf %146, %147 : vector<8x32xf32>
      %c16_i32 = arith.constant 16 : i32
      %149 = arith.addi %55, %c16_i32 : i32
      %150 = tpu.assume_multiple %149, 8 : i32
      %151 = arith.truncf %148 : vector<8x32xf32> to vector<8x32xbf16>
      %152 = arith.index_cast %150 : i32 to index
      %c0_69 = arith.constant 0 : index
      %153 = vector.load %arg11[%152, %c0_69] : memref<128x32xbf16, #tpu.memory_space<vmem>>, vector<8x32xbf16>
      tpu.vector_store %arg11[%152, %c0_69], %151 {strides = array<i32>} : memref<128x32xbf16, #tpu.memory_space<vmem>>, vector<8x32xbf16>,
      %154 = vector.extract_strided_slice %57 {offsets = [24, 0], sizes = [8, 96], strides = [1, 1]} : vector<64x96xbf16> to vector<8x96xbf16>
      %155 = arith.truncf %148 : vector<8x32xf32> to vector<8x32xbf16>
      %cst_70 = arith.constant dense<0.000000e+00> : vector<8x96xf32>
      %156 = tpu.matmul %155, %19, %cst_70 {dimension_numbers = #tpu.dot_dimension_numbers<[1], [0], [0], [1], [0, 0, 1, 1], [], []>} : vector<8x32xbf16>, vector<32x96xbf16>, vector<8x96xf32> -> vector<8x96xf32>
      %157 = vector.broadcast %21 : vector<1x96xf32> to vector<8x96xf32>
      %158 = arith.addf %156, %157 : vector<8x96xf32>
      %159 = vector.extract_strided_slice %154 {offsets = [0, 0], sizes = [8, 64], strides = [1, 1]} : vector<8x96xbf16> to vector<8x64xbf16>
      %160 = vector.extract_strided_slice %158 {offsets = [0, 0], sizes = [8, 64], strides = [1, 1]} : vector<8x96xf32> to vector<8x64xf32>
      %161 = arith.extf %159 : vector<8x64xbf16> to vector<8x64xf32>
      %162 = arith.addf %161, %160 : vector<8x64xf32>
      %163 = arith.negf %162 : vector<8x64xf32>
      %164 = math.exp %163 : vector<8x64xf32>
      %cst_71 = arith.constant 1.000000e+00 : f32
      %165 = vector.broadcast %cst_71 : f32 to vector<8x64xf32>
      %166 = arith.addf %165, %164 : vector<8x64xf32>
      %167 = arith.divf %165, %166 : vector<8x64xf32>
      %168 = vector.extract_strided_slice %167 {offsets = [0, 0], sizes = [8, 32], strides = [1, 1]} : vector<8x64xf32> to vector<8x32xf32>
      %169 = vector.extract_strided_slice %167 {offsets = [0, 32], sizes = [8, 32], strides = [1, 1]} : vector<8x64xf32> to vector<8x32xf32>
      %170 = vector.extract_strided_slice %154 {offsets = [0, 64], sizes = [8, 32], strides = [1, 1]} : vector<8x96xbf16> to vector<8x32xbf16>
      %171 = vector.extract_strided_slice %158 {offsets = [0, 64], sizes = [8, 32], strides = [1, 1]} : vector<8x96xf32> to vector<8x32xf32>
      %172 = arith.mulf %168, %171 : vector<8x32xf32>
      %173 = arith.extf %170 : vector<8x32xbf16> to vector<8x32xf32>
      %174 = arith.addf %173, %172 : vector<8x32xf32>
      %175 = math.tanh %174 : vector<8x32xf32>
      %cst_72 = arith.constant 1.000000e+00 : f32
      %176 = vector.broadcast %cst_72 : f32 to vector<8x32xf32>
      %177 = arith.subf %176, %169 : vector<8x32xf32>
      %178 = arith.mulf %177, %175 : vector<8x32xf32>
      %179 = arith.mulf %169, %148 : vector<8x32xf32>
      %180 = arith.addf %178, %179 : vector<8x32xf32>
      %c24_i32 = arith.constant 24 : i32
      %181 = arith.addi %55, %c24_i32 : i32
      %182 = tpu.assume_multiple %181, 8 : i32
      %183 = arith.truncf %180 : vector<8x32xf32> to vector<8x32xbf16>
      %184 = arith.index_cast %182 : i32 to index
      %c0_73 = arith.constant 0 : index
      %185 = vector.load %arg11[%184, %c0_73] : memref<128x32xbf16, #tpu.memory_space<vmem>>, vector<8x32xbf16>
      tpu.vector_store %arg11[%184, %c0_73], %183 {strides = array<i32>} : memref<128x32xbf16, #tpu.memory_space<vmem>>, vector<8x32xbf16>,
      %186 = vector.extract_strided_slice %57 {offsets = [32, 0], sizes = [8, 96], strides = [1, 1]} : vector<64x96xbf16> to vector<8x96xbf16>
      %187 = arith.truncf %180 : vector<8x32xf32> to vector<8x32xbf16>
      %cst_74 = arith.constant dense<0.000000e+00> : vector<8x96xf32>
      %188 = tpu.matmul %187, %19, %cst_74 {dimension_numbers = #tpu.dot_dimension_numbers<[1], [0], [0], [1], [0, 0, 1, 1], [], []>} : vector<8x32xbf16>, vector<32x96xbf16>, vector<8x96xf32> -> vector<8x96xf32>
      %189 = vector.broadcast %21 : vector<1x96xf32> to vector<8x96xf32>
      %190 = arith.addf %188, %189 : vector<8x96xf32>
      %191 = vector.extract_strided_slice %186 {offsets = [0, 0], sizes = [8, 64], strides = [1, 1]} : vector<8x96xbf16> to vector<8x64xbf16>
      %192 = vector.extract_strided_slice %190 {offsets = [0, 0], sizes = [8, 64], strides = [1, 1]} : vector<8x96xf32> to vector<8x64xf32>
      %193 = arith.extf %191 : vector<8x64xbf16> to vector<8x64xf32>
      %194 = arith.addf %193, %192 : vector<8x64xf32>
      %195 = arith.negf %194 : vector<8x64xf32>
      %196 = math.exp %195 : vector<8x64xf32>
      %cst_75 = arith.constant 1.000000e+00 : f32
      %197 = vector.broadcast %cst_75 : f32 to vector<8x64xf32>
      %198 = arith.addf %197, %196 : vector<8x64xf32>
      %199 = arith.divf %197, %198 : vector<8x64xf32>
      %200 = vector.extract_strided_slice %199 {offsets = [0, 0], sizes = [8, 32], strides = [1, 1]} : vector<8x64xf32> to vector<8x32xf32>
      %201 = vector.extract_strided_slice %199 {offsets = [0, 32], sizes = [8, 32], strides = [1, 1]} : vector<8x64xf32> to vector<8x32xf32>
      %202 = vector.extract_strided_slice %186 {offsets = [0, 64], sizes = [8, 32], strides = [1, 1]} : vector<8x96xbf16> to vector<8x32xbf16>
      %203 = vector.extract_strided_slice %190 {offsets = [0, 64], sizes = [8, 32], strides = [1, 1]} : vector<8x96xf32> to vector<8x32xf32>
      %204 = arith.mulf %200, %203 : vector<8x32xf32>
      %205 = arith.extf %202 : vector<8x32xbf16> to vector<8x32xf32>
      %206 = arith.addf %205, %204 : vector<8x32xf32>
      %207 = math.tanh %206 : vector<8x32xf32>
      %cst_76 = arith.constant 1.000000e+00 : f32
      %208 = vector.broadcast %cst_76 : f32 to vector<8x32xf32>
      %209 = arith.subf %208, %201 : vector<8x32xf32>
      %210 = arith.mulf %209, %207 : vector<8x32xf32>
      %211 = arith.mulf %201, %180 : vector<8x32xf32>
      %212 = arith.addf %210, %211 : vector<8x32xf32>
      %c32_i32 = arith.constant 32 : i32
      %213 = arith.addi %55, %c32_i32 : i32
      %214 = tpu.assume_multiple %213, 8 : i32
      %215 = arith.truncf %212 : vector<8x32xf32> to vector<8x32xbf16>
      %216 = arith.index_cast %214 : i32 to index
      %c0_77 = arith.constant 0 : index
      %217 = vector.load %arg11[%216, %c0_77] : memref<128x32xbf16, #tpu.memory_space<vmem>>, vector<8x32xbf16>
      tpu.vector_store %arg11[%216, %c0_77], %215 {strides = array<i32>} : memref<128x32xbf16, #tpu.memory_space<vmem>>, vector<8x32xbf16>,
      %218 = vector.extract_strided_slice %57 {offsets = [40, 0], sizes = [8, 96], strides = [1, 1]} : vector<64x96xbf16> to vector<8x96xbf16>
      %219 = arith.truncf %212 : vector<8x32xf32> to vector<8x32xbf16>
      %cst_78 = arith.constant dense<0.000000e+00> : vector<8x96xf32>
      %220 = tpu.matmul %219, %19, %cst_78 {dimension_numbers = #tpu.dot_dimension_numbers<[1], [0], [0], [1], [0, 0, 1, 1], [], []>} : vector<8x32xbf16>, vector<32x96xbf16>, vector<8x96xf32> -> vector<8x96xf32>
      %221 = vector.broadcast %21 : vector<1x96xf32> to vector<8x96xf32>
      %222 = arith.addf %220, %221 : vector<8x96xf32>
      %223 = vector.extract_strided_slice %218 {offsets = [0, 0], sizes = [8, 64], strides = [1, 1]} : vector<8x96xbf16> to vector<8x64xbf16>
      %224 = vector.extract_strided_slice %222 {offsets = [0, 0], sizes = [8, 64], strides = [1, 1]} : vector<8x96xf32> to vector<8x64xf32>
      %225 = arith.extf %223 : vector<8x64xbf16> to vector<8x64xf32>
      %226 = arith.addf %225, %224 : vector<8x64xf32>
      %227 = arith.negf %226 : vector<8x64xf32>
      %228 = math.exp %227 : vector<8x64xf32>
      %cst_79 = arith.constant 1.000000e+00 : f32
      %229 = vector.broadcast %cst_79 : f32 to vector<8x64xf32>
      %230 = arith.addf %229, %228 : vector<8x64xf32>
      %231 = arith.divf %229, %230 : vector<8x64xf32>
      %232 = vector.extract_strided_slice %231 {offsets = [0, 0], sizes = [8, 32], strides = [1, 1]} : vector<8x64xf32> to vector<8x32xf32>
      %233 = vector.extract_strided_slice %231 {offsets = [0, 32], sizes = [8, 32], strides = [1, 1]} : vector<8x64xf32> to vector<8x32xf32>
      %234 = vector.extract_strided_slice %218 {offsets = [0, 64], sizes = [8, 32], strides = [1, 1]} : vector<8x96xbf16> to vector<8x32xbf16>
      %235 = vector.extract_strided_slice %222 {offsets = [0, 64], sizes = [8, 32], strides = [1, 1]} : vector<8x96xf32> to vector<8x32xf32>
      %236 = arith.mulf %232, %235 : vector<8x32xf32>
      %237 = arith.extf %234 : vector<8x32xbf16> to vector<8x32xf32>
      %238 = arith.addf %237, %236 : vector<8x32xf32>
      %239 = math.tanh %238 : vector<8x32xf32>
      %cst_80 = arith.constant 1.000000e+00 : f32
      %240 = vector.broadcast %cst_80 : f32 to vector<8x32xf32>
      %241 = arith.subf %240, %233 : vector<8x32xf32>
      %242 = arith.mulf %241, %239 : vector<8x32xf32>
      %243 = arith.mulf %233, %212 : vector<8x32xf32>
      %244 = arith.addf %242, %243 : vector<8x32xf32>
      %c40_i32 = arith.constant 40 : i32
      %245 = arith.addi %55, %c40_i32 : i32
      %246 = tpu.assume_multiple %245, 8 : i32
      %247 = arith.truncf %244 : vector<8x32xf32> to vector<8x32xbf16>
      %248 = arith.index_cast %246 : i32 to index
      %c0_81 = arith.constant 0 : index
      %249 = vector.load %arg11[%248, %c0_81] : memref<128x32xbf16, #tpu.memory_space<vmem>>, vector<8x32xbf16>
      tpu.vector_store %arg11[%248, %c0_81], %247 {strides = array<i32>} : memref<128x32xbf16, #tpu.memory_space<vmem>>, vector<8x32xbf16>,
      %250 = vector.extract_strided_slice %57 {offsets = [48, 0], sizes = [8, 96], strides = [1, 1]} : vector<64x96xbf16> to vector<8x96xbf16>
      %251 = arith.truncf %244 : vector<8x32xf32> to vector<8x32xbf16>
      %cst_82 = arith.constant dense<0.000000e+00> : vector<8x96xf32>
      %252 = tpu.matmul %251, %19, %cst_82 {dimension_numbers = #tpu.dot_dimension_numbers<[1], [0], [0], [1], [0, 0, 1, 1], [], []>} : vector<8x32xbf16>, vector<32x96xbf16>, vector<8x96xf32> -> vector<8x96xf32>
      %253 = vector.broadcast %21 : vector<1x96xf32> to vector<8x96xf32>
      %254 = arith.addf %252, %253 : vector<8x96xf32>
      %255 = vector.extract_strided_slice %250 {offsets = [0, 0], sizes = [8, 64], strides = [1, 1]} : vector<8x96xbf16> to vector<8x64xbf16>
      %256 = vector.extract_strided_slice %254 {offsets = [0, 0], sizes = [8, 64], strides = [1, 1]} : vector<8x96xf32> to vector<8x64xf32>
      %257 = arith.extf %255 : vector<8x64xbf16> to vector<8x64xf32>
      %258 = arith.addf %257, %256 : vector<8x64xf32>
      %259 = arith.negf %258 : vector<8x64xf32>
      %260 = math.exp %259 : vector<8x64xf32>
      %cst_83 = arith.constant 1.000000e+00 : f32
      %261 = vector.broadcast %cst_83 : f32 to vector<8x64xf32>
      %262 = arith.addf %261, %260 : vector<8x64xf32>
      %263 = arith.divf %261, %262 : vector<8x64xf32>
      %264 = vector.extract_strided_slice %263 {offsets = [0, 0], sizes = [8, 32], strides = [1, 1]} : vector<8x64xf32> to vector<8x32xf32>
      %265 = vector.extract_strided_slice %263 {offsets = [0, 32], sizes = [8, 32], strides = [1, 1]} : vector<8x64xf32> to vector<8x32xf32>
      %266 = vector.extract_strided_slice %250 {offsets = [0, 64], sizes = [8, 32], strides = [1, 1]} : vector<8x96xbf16> to vector<8x32xbf16>
      %267 = vector.extract_strided_slice %254 {offsets = [0, 64], sizes = [8, 32], strides = [1, 1]} : vector<8x96xf32> to vector<8x32xf32>
      %268 = arith.mulf %264, %267 : vector<8x32xf32>
      %269 = arith.extf %266 : vector<8x32xbf16> to vector<8x32xf32>
      %270 = arith.addf %269, %268 : vector<8x32xf32>
      %271 = math.tanh %270 : vector<8x32xf32>
      %cst_84 = arith.constant 1.000000e+00 : f32
      %272 = vector.broadcast %cst_84 : f32 to vector<8x32xf32>
      %273 = arith.subf %272, %265 : vector<8x32xf32>
      %274 = arith.mulf %273, %271 : vector<8x32xf32>
      %275 = arith.mulf %265, %244 : vector<8x32xf32>
      %276 = arith.addf %274, %275 : vector<8x32xf32>
      %c48_i32 = arith.constant 48 : i32
      %277 = arith.addi %55, %c48_i32 : i32
      %278 = tpu.assume_multiple %277, 8 : i32
      %279 = arith.truncf %276 : vector<8x32xf32> to vector<8x32xbf16>
      %280 = arith.index_cast %278 : i32 to index
      %c0_85 = arith.constant 0 : index
      %281 = vector.load %arg11[%280, %c0_85] : memref<128x32xbf16, #tpu.memory_space<vmem>>, vector<8x32xbf16>
      tpu.vector_store %arg11[%280, %c0_85], %279 {strides = array<i32>} : memref<128x32xbf16, #tpu.memory_space<vmem>>, vector<8x32xbf16>,
      %282 = vector.extract_strided_slice %57 {offsets = [56, 0], sizes = [8, 96], strides = [1, 1]} : vector<64x96xbf16> to vector<8x96xbf16>
      %283 = arith.truncf %276 : vector<8x32xf32> to vector<8x32xbf16>
      %cst_86 = arith.constant dense<0.000000e+00> : vector<8x96xf32>
      %284 = tpu.matmul %283, %19, %cst_86 {dimension_numbers = #tpu.dot_dimension_numbers<[1], [0], [0], [1], [0, 0, 1, 1], [], []>} : vector<8x32xbf16>, vector<32x96xbf16>, vector<8x96xf32> -> vector<8x96xf32>
      %285 = vector.broadcast %21 : vector<1x96xf32> to vector<8x96xf32>
      %286 = arith.addf %284, %285 : vector<8x96xf32>
      %287 = vector.extract_strided_slice %282 {offsets = [0, 0], sizes = [8, 64], strides = [1, 1]} : vector<8x96xbf16> to vector<8x64xbf16>
      %288 = vector.extract_strided_slice %286 {offsets = [0, 0], sizes = [8, 64], strides = [1, 1]} : vector<8x96xf32> to vector<8x64xf32>
      %289 = arith.extf %287 : vector<8x64xbf16> to vector<8x64xf32>
      %290 = arith.addf %289, %288 : vector<8x64xf32>
      %291 = arith.negf %290 : vector<8x64xf32>
      %292 = math.exp %291 : vector<8x64xf32>
      %cst_87 = arith.constant 1.000000e+00 : f32
      %293 = vector.broadcast %cst_87 : f32 to vector<8x64xf32>
      %294 = arith.addf %293, %292 : vector<8x64xf32>
      %295 = arith.divf %293, %294 : vector<8x64xf32>
      %296 = vector.extract_strided_slice %295 {offsets = [0, 0], sizes = [8, 32], strides = [1, 1]} : vector<8x64xf32> to vector<8x32xf32>
      %297 = vector.extract_strided_slice %295 {offsets = [0, 32], sizes = [8, 32], strides = [1, 1]} : vector<8x64xf32> to vector<8x32xf32>
      %298 = vector.extract_strided_slice %282 {offsets = [0, 64], sizes = [8, 32], strides = [1, 1]} : vector<8x96xbf16> to vector<8x32xbf16>
      %299 = vector.extract_strided_slice %286 {offsets = [0, 64], sizes = [8, 32], strides = [1, 1]} : vector<8x96xf32> to vector<8x32xf32>
      %300 = arith.mulf %296, %299 : vector<8x32xf32>
      %301 = arith.extf %298 : vector<8x32xbf16> to vector<8x32xf32>
      %302 = arith.addf %301, %300 : vector<8x32xf32>
      %303 = math.tanh %302 : vector<8x32xf32>
      %cst_88 = arith.constant 1.000000e+00 : f32
      %304 = vector.broadcast %cst_88 : f32 to vector<8x32xf32>
      %305 = arith.subf %304, %297 : vector<8x32xf32>
      %306 = arith.mulf %305, %303 : vector<8x32xf32>
      %307 = arith.mulf %297, %276 : vector<8x32xf32>
      %308 = arith.addf %306, %307 : vector<8x32xf32>
      %c56_i32 = arith.constant 56 : i32
      %309 = arith.addi %55, %c56_i32 : i32
      %310 = tpu.assume_multiple %309, 8 : i32
      %311 = arith.truncf %308 : vector<8x32xf32> to vector<8x32xbf16>
      %312 = arith.index_cast %310 : i32 to index
      %c0_89 = arith.constant 0 : index
      %313 = vector.load %arg11[%312, %c0_89] : memref<128x32xbf16, #tpu.memory_space<vmem>>, vector<8x32xbf16>
      tpu.vector_store %arg11[%312, %c0_89], %311 {strides = array<i32>} : memref<128x32xbf16, #tpu.memory_space<vmem>>, vector<8x32xbf16>,
      scf.yield %308 : vector<8x32xf32>
    }
    %c2_i32_25 = arith.constant 2 : i32
    %c0_26 = arith.constant 0 : index
    %c0_27 = arith.constant 0 : index
    %25 = vector.load %arg11[%c0_26, %c0_27] : memref<128x32xbf16, #tpu.memory_space<vmem>>, vector<128x32xbf16>
    %c1 = arith.constant 1 : index
    %c0_28 = arith.constant 0 : index
    %c0_29 = arith.constant 0 : index
    %26 = vector.load %arg4[%c1, %c0_28, %c0_29] : memref<2x32x96xbf16, #tpu.memory_space<vmem>>, vector<1x32x96xbf16>
    %27 = vector.shape_cast %26 : vector<1x32x96xbf16> to vector<32x96xbf16>
    %cst_30 = arith.constant dense<0.000000e+00> : vector<128x96xf32>
    %28 = tpu.matmul %25, %27, %cst_30 {dimension_numbers = #tpu.dot_dimension_numbers<[1], [0], [0], [1], [0, 0, 1, 1], [], []>} : vector<128x32xbf16>, vector<32x96xbf16>, vector<128x96xf32> -> vector<128x96xf32>
    %c1_31 = arith.constant 1 : index
    %c0_32 = arith.constant 0 : index
    %c0_33 = arith.constant 0 : index
    %29 = vector.load %arg6[%c1_31, %c0_32, %c0_33] : memref<2x1x96xf32, #tpu.memory_space<vmem>>, vector<1x1x96xf32>
    %30 = vector.shape_cast %29 : vector<1x1x96xf32> to vector<1x96xf32>
    %31 = vector.broadcast %30 : vector<1x96xf32> to vector<128x96xf32>
    %32 = arith.addf %28, %31 : vector<128x96xf32>
    %33 = arith.truncf %32 : vector<128x96xf32> to vector<128x96xbf16>
    %c0_34 = arith.constant 0 : index
    %c0_35 = arith.constant 0 : index
    %34 = vector.load %arg12[%c0_34, %c0_35] : memref<128x96xbf16, #tpu.memory_space<vmem>>, vector<128x96xbf16>
    tpu.vector_store %arg12[%c0_34, %c0_35], %33 {strides = array<i32>} : memref<128x96xbf16, #tpu.memory_space<vmem>>, vector<128x96xbf16>,
    %c1_36 = arith.constant 1 : index
    %c0_37 = arith.constant 0 : index
    %c0_38 = arith.constant 0 : index
    %35 = vector.load %arg5[%c1_36, %c0_37, %c0_38] : memref<2x32x96xbf16, #tpu.memory_space<vmem>>, vector<1x32x96xbf16>
    %36 = vector.shape_cast %35 : vector<1x32x96xbf16> to vector<32x96xbf16>
    %c1_39 = arith.constant 1 : index
    %c0_40 = arith.constant 0 : index
    %c0_41 = arith.constant 0 : index
    %37 = vector.load %arg7[%c1_39, %c0_40, %c0_41] : memref<2x1x96xf32, #tpu.memory_space<vmem>>, vector<1x1x96xf32>
    %38 = vector.shape_cast %37 : vector<1x1x96xf32> to vector<1x96xf32>
    %cst_42 = arith.constant 0.000000e+00 : f32
    %39 = vector.broadcast %cst_42 : f32 to vector<8x32xf32>
    %c0_i32_43 = arith.constant 0 : i32
    %c2_i32_44 = arith.constant 2 : i32
    %40 = arith.addi %c0_i32_43, %c2_i32_44 : i32
    %c1_i32_45 = arith.constant 1 : i32
    %41 = scf.for %arg13 = %c0_i32_43 to %40 step %c1_i32_45 iter_args(%arg14 = %39) -> (vector<8x32xf32>)  : i32 {
      %c64_i32 = arith.constant 64 : i32
      %54 = arith.muli %arg13, %c64_i32 : i32
      %55 = tpu.assume_multiple %54, 64 : i32
      %56 = arith.index_cast %55 : i32 to index
      %c0_56 = arith.constant 0 : index
      %57 = vector.load %arg12[%56, %c0_56] : memref<128x96xbf16, #tpu.memory_space<vmem>>, vector<64x96xbf16>
      %58 = vector.extract_strided_slice %57 {offsets = [0, 0], sizes = [8, 96], strides = [1, 1]} : vector<64x96xbf16> to vector<8x96xbf16>
      %59 = arith.truncf %arg14 : vector<8x32xf32> to vector<8x32xbf16>
      %cst_57 = arith.constant dense<0.000000e+00> : vector<8x96xf32>
      %60 = tpu.matmul %59, %36, %cst_57 {dimension_numbers = #tpu.dot_dimension_numbers<[1], [0], [0], [1], [0, 0, 1, 1], [], []>} : vector<8x32xbf16>, vector<32x96xbf16>, vector<8x96xf32> -> vector<8x96xf32>
      %61 = vector.broadcast %38 : vector<1x96xf32> to vector<8x96xf32>
      %62 = arith.addf %60, %61 : vector<8x96xf32>
      %63 = vector.extract_strided_slice %58 {offsets = [0, 0], sizes = [8, 64], strides = [1, 1]} : vector<8x96xbf16> to vector<8x64xbf16>
      %64 = vector.extract_strided_slice %62 {offsets = [0, 0], sizes = [8, 64], strides = [1, 1]} : vector<8x96xf32> to vector<8x64xf32>
      %65 = arith.extf %63 : vector<8x64xbf16> to vector<8x64xf32>
      %66 = arith.addf %65, %64 : vector<8x64xf32>
      %67 = arith.negf %66 : vector<8x64xf32>
      %68 = math.exp %67 : vector<8x64xf32>
      %cst_58 = arith.constant 1.000000e+00 : f32
      %69 = vector.broadcast %cst_58 : f32 to vector<8x64xf32>
      %70 = arith.addf %69, %68 : vector<8x64xf32>
      %71 = arith.divf %69, %70 : vector<8x64xf32>
      %72 = vector.extract_strided_slice %71 {offsets = [0, 0], sizes = [8, 32], strides = [1, 1]} : vector<8x64xf32> to vector<8x32xf32>
      %73 = vector.extract_strided_slice %71 {offsets = [0, 32], sizes = [8, 32], strides = [1, 1]} : vector<8x64xf32> to vector<8x32xf32>
      %74 = vector.extract_strided_slice %58 {offsets = [0, 64], sizes = [8, 32], strides = [1, 1]} : vector<8x96xbf16> to vector<8x32xbf16>
      %75 = vector.extract_strided_slice %62 {offsets = [0, 64], sizes = [8, 32], strides = [1, 1]} : vector<8x96xf32> to vector<8x32xf32>
      %76 = arith.mulf %72, %75 : vector<8x32xf32>
      %77 = arith.extf %74 : vector<8x32xbf16> to vector<8x32xf32>
      %78 = arith.addf %77, %76 : vector<8x32xf32>
      %79 = math.tanh %78 : vector<8x32xf32>
      %cst_59 = arith.constant 1.000000e+00 : f32
      %80 = vector.broadcast %cst_59 : f32 to vector<8x32xf32>
      %81 = arith.subf %80, %73 : vector<8x32xf32>
      %82 = arith.mulf %81, %79 : vector<8x32xf32>
      %83 = arith.mulf %73, %arg14 : vector<8x32xf32>
      %84 = arith.addf %82, %83 : vector<8x32xf32>
      %c0_i32_60 = arith.constant 0 : i32
      %85 = arith.addi %55, %c0_i32_60 : i32
      %86 = tpu.assume_multiple %85, 8 : i32
      %87 = arith.truncf %84 : vector<8x32xf32> to vector<8x32xbf16>
      %88 = arith.index_cast %86 : i32 to index
      %c0_61 = arith.constant 0 : index
      %89 = vector.load %arg11[%88, %c0_61] : memref<128x32xbf16, #tpu.memory_space<vmem>>, vector<8x32xbf16>
      tpu.vector_store %arg11[%88, %c0_61], %87 {strides = array<i32>} : memref<128x32xbf16, #tpu.memory_space<vmem>>, vector<8x32xbf16>,
      %90 = vector.extract_strided_slice %57 {offsets = [8, 0], sizes = [8, 96], strides = [1, 1]} : vector<64x96xbf16> to vector<8x96xbf16>
      %91 = arith.truncf %84 : vector<8x32xf32> to vector<8x32xbf16>
      %cst_62 = arith.constant dense<0.000000e+00> : vector<8x96xf32>
      %92 = tpu.matmul %91, %36, %cst_62 {dimension_numbers = #tpu.dot_dimension_numbers<[1], [0], [0], [1], [0, 0, 1, 1], [], []>} : vector<8x32xbf16>, vector<32x96xbf16>, vector<8x96xf32> -> vector<8x96xf32>
      %93 = vector.broadcast %38 : vector<1x96xf32> to vector<8x96xf32>
      %94 = arith.addf %92, %93 : vector<8x96xf32>
      %95 = vector.extract_strided_slice %90 {offsets = [0, 0], sizes = [8, 64], strides = [1, 1]} : vector<8x96xbf16> to vector<8x64xbf16>
      %96 = vector.extract_strided_slice %94 {offsets = [0, 0], sizes = [8, 64], strides = [1, 1]} : vector<8x96xf32> to vector<8x64xf32>
      %97 = arith.extf %95 : vector<8x64xbf16> to vector<8x64xf32>
      %98 = arith.addf %97, %96 : vector<8x64xf32>
      %99 = arith.negf %98 : vector<8x64xf32>
      %100 = math.exp %99 : vector<8x64xf32>
      %cst_63 = arith.constant 1.000000e+00 : f32
      %101 = vector.broadcast %cst_63 : f32 to vector<8x64xf32>
      %102 = arith.addf %101, %100 : vector<8x64xf32>
      %103 = arith.divf %101, %102 : vector<8x64xf32>
      %104 = vector.extract_strided_slice %103 {offsets = [0, 0], sizes = [8, 32], strides = [1, 1]} : vector<8x64xf32> to vector<8x32xf32>
      %105 = vector.extract_strided_slice %103 {offsets = [0, 32], sizes = [8, 32], strides = [1, 1]} : vector<8x64xf32> to vector<8x32xf32>
      %106 = vector.extract_strided_slice %90 {offsets = [0, 64], sizes = [8, 32], strides = [1, 1]} : vector<8x96xbf16> to vector<8x32xbf16>
      %107 = vector.extract_strided_slice %94 {offsets = [0, 64], sizes = [8, 32], strides = [1, 1]} : vector<8x96xf32> to vector<8x32xf32>
      %108 = arith.mulf %104, %107 : vector<8x32xf32>
      %109 = arith.extf %106 : vector<8x32xbf16> to vector<8x32xf32>
      %110 = arith.addf %109, %108 : vector<8x32xf32>
      %111 = math.tanh %110 : vector<8x32xf32>
      %cst_64 = arith.constant 1.000000e+00 : f32
      %112 = vector.broadcast %cst_64 : f32 to vector<8x32xf32>
      %113 = arith.subf %112, %105 : vector<8x32xf32>
      %114 = arith.mulf %113, %111 : vector<8x32xf32>
      %115 = arith.mulf %105, %84 : vector<8x32xf32>
      %116 = arith.addf %114, %115 : vector<8x32xf32>
      %c8_i32 = arith.constant 8 : i32
      %117 = arith.addi %55, %c8_i32 : i32
      %118 = tpu.assume_multiple %117, 8 : i32
      %119 = arith.truncf %116 : vector<8x32xf32> to vector<8x32xbf16>
      %120 = arith.index_cast %118 : i32 to index
      %c0_65 = arith.constant 0 : index
      %121 = vector.load %arg11[%120, %c0_65] : memref<128x32xbf16, #tpu.memory_space<vmem>>, vector<8x32xbf16>
      tpu.vector_store %arg11[%120, %c0_65], %119 {strides = array<i32>} : memref<128x32xbf16, #tpu.memory_space<vmem>>, vector<8x32xbf16>,
      %122 = vector.extract_strided_slice %57 {offsets = [16, 0], sizes = [8, 96], strides = [1, 1]} : vector<64x96xbf16> to vector<8x96xbf16>
      %123 = arith.truncf %116 : vector<8x32xf32> to vector<8x32xbf16>
      %cst_66 = arith.constant dense<0.000000e+00> : vector<8x96xf32>
      %124 = tpu.matmul %123, %36, %cst_66 {dimension_numbers = #tpu.dot_dimension_numbers<[1], [0], [0], [1], [0, 0, 1, 1], [], []>} : vector<8x32xbf16>, vector<32x96xbf16>, vector<8x96xf32> -> vector<8x96xf32>
      %125 = vector.broadcast %38 : vector<1x96xf32> to vector<8x96xf32>
      %126 = arith.addf %124, %125 : vector<8x96xf32>
      %127 = vector.extract_strided_slice %122 {offsets = [0, 0], sizes = [8, 64], strides = [1, 1]} : vector<8x96xbf16> to vector<8x64xbf16>
      %128 = vector.extract_strided_slice %126 {offsets = [0, 0], sizes = [8, 64], strides = [1, 1]} : vector<8x96xf32> to vector<8x64xf32>
      %129 = arith.extf %127 : vector<8x64xbf16> to vector<8x64xf32>
      %130 = arith.addf %129, %128 : vector<8x64xf32>
      %131 = arith.negf %130 : vector<8x64xf32>
      %132 = math.exp %131 : vector<8x64xf32>
      %cst_67 = arith.constant 1.000000e+00 : f32
      %133 = vector.broadcast %cst_67 : f32 to vector<8x64xf32>
      %134 = arith.addf %133, %132 : vector<8x64xf32>
      %135 = arith.divf %133, %134 : vector<8x64xf32>
      %136 = vector.extract_strided_slice %135 {offsets = [0, 0], sizes = [8, 32], strides = [1, 1]} : vector<8x64xf32> to vector<8x32xf32>
      %137 = vector.extract_strided_slice %135 {offsets = [0, 32], sizes = [8, 32], strides = [1, 1]} : vector<8x64xf32> to vector<8x32xf32>
      %138 = vector.extract_strided_slice %122 {offsets = [0, 64], sizes = [8, 32], strides = [1, 1]} : vector<8x96xbf16> to vector<8x32xbf16>
      %139 = vector.extract_strided_slice %126 {offsets = [0, 64], sizes = [8, 32], strides = [1, 1]} : vector<8x96xf32> to vector<8x32xf32>
      %140 = arith.mulf %136, %139 : vector<8x32xf32>
      %141 = arith.extf %138 : vector<8x32xbf16> to vector<8x32xf32>
      %142 = arith.addf %141, %140 : vector<8x32xf32>
      %143 = math.tanh %142 : vector<8x32xf32>
      %cst_68 = arith.constant 1.000000e+00 : f32
      %144 = vector.broadcast %cst_68 : f32 to vector<8x32xf32>
      %145 = arith.subf %144, %137 : vector<8x32xf32>
      %146 = arith.mulf %145, %143 : vector<8x32xf32>
      %147 = arith.mulf %137, %116 : vector<8x32xf32>
      %148 = arith.addf %146, %147 : vector<8x32xf32>
      %c16_i32 = arith.constant 16 : i32
      %149 = arith.addi %55, %c16_i32 : i32
      %150 = tpu.assume_multiple %149, 8 : i32
      %151 = arith.truncf %148 : vector<8x32xf32> to vector<8x32xbf16>
      %152 = arith.index_cast %150 : i32 to index
      %c0_69 = arith.constant 0 : index
      %153 = vector.load %arg11[%152, %c0_69] : memref<128x32xbf16, #tpu.memory_space<vmem>>, vector<8x32xbf16>
      tpu.vector_store %arg11[%152, %c0_69], %151 {strides = array<i32>} : memref<128x32xbf16, #tpu.memory_space<vmem>>, vector<8x32xbf16>,
      %154 = vector.extract_strided_slice %57 {offsets = [24, 0], sizes = [8, 96], strides = [1, 1]} : vector<64x96xbf16> to vector<8x96xbf16>
      %155 = arith.truncf %148 : vector<8x32xf32> to vector<8x32xbf16>
      %cst_70 = arith.constant dense<0.000000e+00> : vector<8x96xf32>
      %156 = tpu.matmul %155, %36, %cst_70 {dimension_numbers = #tpu.dot_dimension_numbers<[1], [0], [0], [1], [0, 0, 1, 1], [], []>} : vector<8x32xbf16>, vector<32x96xbf16>, vector<8x96xf32> -> vector<8x96xf32>
      %157 = vector.broadcast %38 : vector<1x96xf32> to vector<8x96xf32>
      %158 = arith.addf %156, %157 : vector<8x96xf32>
      %159 = vector.extract_strided_slice %154 {offsets = [0, 0], sizes = [8, 64], strides = [1, 1]} : vector<8x96xbf16> to vector<8x64xbf16>
      %160 = vector.extract_strided_slice %158 {offsets = [0, 0], sizes = [8, 64], strides = [1, 1]} : vector<8x96xf32> to vector<8x64xf32>
      %161 = arith.extf %159 : vector<8x64xbf16> to vector<8x64xf32>
      %162 = arith.addf %161, %160 : vector<8x64xf32>
      %163 = arith.negf %162 : vector<8x64xf32>
      %164 = math.exp %163 : vector<8x64xf32>
      %cst_71 = arith.constant 1.000000e+00 : f32
      %165 = vector.broadcast %cst_71 : f32 to vector<8x64xf32>
      %166 = arith.addf %165, %164 : vector<8x64xf32>
      %167 = arith.divf %165, %166 : vector<8x64xf32>
      %168 = vector.extract_strided_slice %167 {offsets = [0, 0], sizes = [8, 32], strides = [1, 1]} : vector<8x64xf32> to vector<8x32xf32>
      %169 = vector.extract_strided_slice %167 {offsets = [0, 32], sizes = [8, 32], strides = [1, 1]} : vector<8x64xf32> to vector<8x32xf32>
      %170 = vector.extract_strided_slice %154 {offsets = [0, 64], sizes = [8, 32], strides = [1, 1]} : vector<8x96xbf16> to vector<8x32xbf16>
      %171 = vector.extract_strided_slice %158 {offsets = [0, 64], sizes = [8, 32], strides = [1, 1]} : vector<8x96xf32> to vector<8x32xf32>
      %172 = arith.mulf %168, %171 : vector<8x32xf32>
      %173 = arith.extf %170 : vector<8x32xbf16> to vector<8x32xf32>
      %174 = arith.addf %173, %172 : vector<8x32xf32>
      %175 = math.tanh %174 : vector<8x32xf32>
      %cst_72 = arith.constant 1.000000e+00 : f32
      %176 = vector.broadcast %cst_72 : f32 to vector<8x32xf32>
      %177 = arith.subf %176, %169 : vector<8x32xf32>
      %178 = arith.mulf %177, %175 : vector<8x32xf32>
      %179 = arith.mulf %169, %148 : vector<8x32xf32>
      %180 = arith.addf %178, %179 : vector<8x32xf32>
      %c24_i32 = arith.constant 24 : i32
      %181 = arith.addi %55, %c24_i32 : i32
      %182 = tpu.assume_multiple %181, 8 : i32
      %183 = arith.truncf %180 : vector<8x32xf32> to vector<8x32xbf16>
      %184 = arith.index_cast %182 : i32 to index
      %c0_73 = arith.constant 0 : index
      %185 = vector.load %arg11[%184, %c0_73] : memref<128x32xbf16, #tpu.memory_space<vmem>>, vector<8x32xbf16>
      tpu.vector_store %arg11[%184, %c0_73], %183 {strides = array<i32>} : memref<128x32xbf16, #tpu.memory_space<vmem>>, vector<8x32xbf16>,
      %186 = vector.extract_strided_slice %57 {offsets = [32, 0], sizes = [8, 96], strides = [1, 1]} : vector<64x96xbf16> to vector<8x96xbf16>
      %187 = arith.truncf %180 : vector<8x32xf32> to vector<8x32xbf16>
      %cst_74 = arith.constant dense<0.000000e+00> : vector<8x96xf32>
      %188 = tpu.matmul %187, %36, %cst_74 {dimension_numbers = #tpu.dot_dimension_numbers<[1], [0], [0], [1], [0, 0, 1, 1], [], []>} : vector<8x32xbf16>, vector<32x96xbf16>, vector<8x96xf32> -> vector<8x96xf32>
      %189 = vector.broadcast %38 : vector<1x96xf32> to vector<8x96xf32>
      %190 = arith.addf %188, %189 : vector<8x96xf32>
      %191 = vector.extract_strided_slice %186 {offsets = [0, 0], sizes = [8, 64], strides = [1, 1]} : vector<8x96xbf16> to vector<8x64xbf16>
      %192 = vector.extract_strided_slice %190 {offsets = [0, 0], sizes = [8, 64], strides = [1, 1]} : vector<8x96xf32> to vector<8x64xf32>
      %193 = arith.extf %191 : vector<8x64xbf16> to vector<8x64xf32>
      %194 = arith.addf %193, %192 : vector<8x64xf32>
      %195 = arith.negf %194 : vector<8x64xf32>
      %196 = math.exp %195 : vector<8x64xf32>
      %cst_75 = arith.constant 1.000000e+00 : f32
      %197 = vector.broadcast %cst_75 : f32 to vector<8x64xf32>
      %198 = arith.addf %197, %196 : vector<8x64xf32>
      %199 = arith.divf %197, %198 : vector<8x64xf32>
      %200 = vector.extract_strided_slice %199 {offsets = [0, 0], sizes = [8, 32], strides = [1, 1]} : vector<8x64xf32> to vector<8x32xf32>
      %201 = vector.extract_strided_slice %199 {offsets = [0, 32], sizes = [8, 32], strides = [1, 1]} : vector<8x64xf32> to vector<8x32xf32>
      %202 = vector.extract_strided_slice %186 {offsets = [0, 64], sizes = [8, 32], strides = [1, 1]} : vector<8x96xbf16> to vector<8x32xbf16>
      %203 = vector.extract_strided_slice %190 {offsets = [0, 64], sizes = [8, 32], strides = [1, 1]} : vector<8x96xf32> to vector<8x32xf32>
      %204 = arith.mulf %200, %203 : vector<8x32xf32>
      %205 = arith.extf %202 : vector<8x32xbf16> to vector<8x32xf32>
      %206 = arith.addf %205, %204 : vector<8x32xf32>
      %207 = math.tanh %206 : vector<8x32xf32>
      %cst_76 = arith.constant 1.000000e+00 : f32
      %208 = vector.broadcast %cst_76 : f32 to vector<8x32xf32>
      %209 = arith.subf %208, %201 : vector<8x32xf32>
      %210 = arith.mulf %209, %207 : vector<8x32xf32>
      %211 = arith.mulf %201, %180 : vector<8x32xf32>
      %212 = arith.addf %210, %211 : vector<8x32xf32>
      %c32_i32 = arith.constant 32 : i32
      %213 = arith.addi %55, %c32_i32 : i32
      %214 = tpu.assume_multiple %213, 8 : i32
      %215 = arith.truncf %212 : vector<8x32xf32> to vector<8x32xbf16>
      %216 = arith.index_cast %214 : i32 to index
      %c0_77 = arith.constant 0 : index
      %217 = vector.load %arg11[%216, %c0_77] : memref<128x32xbf16, #tpu.memory_space<vmem>>, vector<8x32xbf16>
      tpu.vector_store %arg11[%216, %c0_77], %215 {strides = array<i32>} : memref<128x32xbf16, #tpu.memory_space<vmem>>, vector<8x32xbf16>,
      %218 = vector.extract_strided_slice %57 {offsets = [40, 0], sizes = [8, 96], strides = [1, 1]} : vector<64x96xbf16> to vector<8x96xbf16>
      %219 = arith.truncf %212 : vector<8x32xf32> to vector<8x32xbf16>
      %cst_78 = arith.constant dense<0.000000e+00> : vector<8x96xf32>
      %220 = tpu.matmul %219, %36, %cst_78 {dimension_numbers = #tpu.dot_dimension_numbers<[1], [0], [0], [1], [0, 0, 1, 1], [], []>} : vector<8x32xbf16>, vector<32x96xbf16>, vector<8x96xf32> -> vector<8x96xf32>
      %221 = vector.broadcast %38 : vector<1x96xf32> to vector<8x96xf32>
      %222 = arith.addf %220, %221 : vector<8x96xf32>
      %223 = vector.extract_strided_slice %218 {offsets = [0, 0], sizes = [8, 64], strides = [1, 1]} : vector<8x96xbf16> to vector<8x64xbf16>
      %224 = vector.extract_strided_slice %222 {offsets = [0, 0], sizes = [8, 64], strides = [1, 1]} : vector<8x96xf32> to vector<8x64xf32>
      %225 = arith.extf %223 : vector<8x64xbf16> to vector<8x64xf32>
      %226 = arith.addf %225, %224 : vector<8x64xf32>
      %227 = arith.negf %226 : vector<8x64xf32>
      %228 = math.exp %227 : vector<8x64xf32>
      %cst_79 = arith.constant 1.000000e+00 : f32
      %229 = vector.broadcast %cst_79 : f32 to vector<8x64xf32>
      %230 = arith.addf %229, %228 : vector<8x64xf32>
      %231 = arith.divf %229, %230 : vector<8x64xf32>
      %232 = vector.extract_strided_slice %231 {offsets = [0, 0], sizes = [8, 32], strides = [1, 1]} : vector<8x64xf32> to vector<8x32xf32>
      %233 = vector.extract_strided_slice %231 {offsets = [0, 32], sizes = [8, 32], strides = [1, 1]} : vector<8x64xf32> to vector<8x32xf32>
      %234 = vector.extract_strided_slice %218 {offsets = [0, 64], sizes = [8, 32], strides = [1, 1]} : vector<8x96xbf16> to vector<8x32xbf16>
      %235 = vector.extract_strided_slice %222 {offsets = [0, 64], sizes = [8, 32], strides = [1, 1]} : vector<8x96xf32> to vector<8x32xf32>
      %236 = arith.mulf %232, %235 : vector<8x32xf32>
      %237 = arith.extf %234 : vector<8x32xbf16> to vector<8x32xf32>
      %238 = arith.addf %237, %236 : vector<8x32xf32>
      %239 = math.tanh %238 : vector<8x32xf32>
      %cst_80 = arith.constant 1.000000e+00 : f32
      %240 = vector.broadcast %cst_80 : f32 to vector<8x32xf32>
      %241 = arith.subf %240, %233 : vector<8x32xf32>
      %242 = arith.mulf %241, %239 : vector<8x32xf32>
      %243 = arith.mulf %233, %212 : vector<8x32xf32>
      %244 = arith.addf %242, %243 : vector<8x32xf32>
      %c40_i32 = arith.constant 40 : i32
      %245 = arith.addi %55, %c40_i32 : i32
      %246 = tpu.assume_multiple %245, 8 : i32
      %247 = arith.truncf %244 : vector<8x32xf32> to vector<8x32xbf16>
      %248 = arith.index_cast %246 : i32 to index
      %c0_81 = arith.constant 0 : index
      %249 = vector.load %arg11[%248, %c0_81] : memref<128x32xbf16, #tpu.memory_space<vmem>>, vector<8x32xbf16>
      tpu.vector_store %arg11[%248, %c0_81], %247 {strides = array<i32>} : memref<128x32xbf16, #tpu.memory_space<vmem>>, vector<8x32xbf16>,
      %250 = vector.extract_strided_slice %57 {offsets = [48, 0], sizes = [8, 96], strides = [1, 1]} : vector<64x96xbf16> to vector<8x96xbf16>
      %251 = arith.truncf %244 : vector<8x32xf32> to vector<8x32xbf16>
      %cst_82 = arith.constant dense<0.000000e+00> : vector<8x96xf32>
      %252 = tpu.matmul %251, %36, %cst_82 {dimension_numbers = #tpu.dot_dimension_numbers<[1], [0], [0], [1], [0, 0, 1, 1], [], []>} : vector<8x32xbf16>, vector<32x96xbf16>, vector<8x96xf32> -> vector<8x96xf32>
      %253 = vector.broadcast %38 : vector<1x96xf32> to vector<8x96xf32>
      %254 = arith.addf %252, %253 : vector<8x96xf32>
      %255 = vector.extract_strided_slice %250 {offsets = [0, 0], sizes = [8, 64], strides = [1, 1]} : vector<8x96xbf16> to vector<8x64xbf16>
      %256 = vector.extract_strided_slice %254 {offsets = [0, 0], sizes = [8, 64], strides = [1, 1]} : vector<8x96xf32> to vector<8x64xf32>
      %257 = arith.extf %255 : vector<8x64xbf16> to vector<8x64xf32>
      %258 = arith.addf %257, %256 : vector<8x64xf32>
      %259 = arith.negf %258 : vector<8x64xf32>
      %260 = math.exp %259 : vector<8x64xf32>
      %cst_83 = arith.constant 1.000000e+00 : f32
      %261 = vector.broadcast %cst_83 : f32 to vector<8x64xf32>
      %262 = arith.addf %261, %260 : vector<8x64xf32>
      %263 = arith.divf %261, %262 : vector<8x64xf32>
      %264 = vector.extract_strided_slice %263 {offsets = [0, 0], sizes = [8, 32], strides = [1, 1]} : vector<8x64xf32> to vector<8x32xf32>
      %265 = vector.extract_strided_slice %263 {offsets = [0, 32], sizes = [8, 32], strides = [1, 1]} : vector<8x64xf32> to vector<8x32xf32>
      %266 = vector.extract_strided_slice %250 {offsets = [0, 64], sizes = [8, 32], strides = [1, 1]} : vector<8x96xbf16> to vector<8x32xbf16>
      %267 = vector.extract_strided_slice %254 {offsets = [0, 64], sizes = [8, 32], strides = [1, 1]} : vector<8x96xf32> to vector<8x32xf32>
      %268 = arith.mulf %264, %267 : vector<8x32xf32>
      %269 = arith.extf %266 : vector<8x32xbf16> to vector<8x32xf32>
      %270 = arith.addf %269, %268 : vector<8x32xf32>
      %271 = math.tanh %270 : vector<8x32xf32>
      %cst_84 = arith.constant 1.000000e+00 : f32
      %272 = vector.broadcast %cst_84 : f32 to vector<8x32xf32>
      %273 = arith.subf %272, %265 : vector<8x32xf32>
      %274 = arith.mulf %273, %271 : vector<8x32xf32>
      %275 = arith.mulf %265, %244 : vector<8x32xf32>
      %276 = arith.addf %274, %275 : vector<8x32xf32>
      %c48_i32 = arith.constant 48 : i32
      %277 = arith.addi %55, %c48_i32 : i32
      %278 = tpu.assume_multiple %277, 8 : i32
      %279 = arith.truncf %276 : vector<8x32xf32> to vector<8x32xbf16>
      %280 = arith.index_cast %278 : i32 to index
      %c0_85 = arith.constant 0 : index
      %281 = vector.load %arg11[%280, %c0_85] : memref<128x32xbf16, #tpu.memory_space<vmem>>, vector<8x32xbf16>
      tpu.vector_store %arg11[%280, %c0_85], %279 {strides = array<i32>} : memref<128x32xbf16, #tpu.memory_space<vmem>>, vector<8x32xbf16>,
      %282 = vector.extract_strided_slice %57 {offsets = [56, 0], sizes = [8, 96], strides = [1, 1]} : vector<64x96xbf16> to vector<8x96xbf16>
      %283 = arith.truncf %276 : vector<8x32xf32> to vector<8x32xbf16>
      %cst_86 = arith.constant dense<0.000000e+00> : vector<8x96xf32>
      %284 = tpu.matmul %283, %36, %cst_86 {dimension_numbers = #tpu.dot_dimension_numbers<[1], [0], [0], [1], [0, 0, 1, 1], [], []>} : vector<8x32xbf16>, vector<32x96xbf16>, vector<8x96xf32> -> vector<8x96xf32>
      %285 = vector.broadcast %38 : vector<1x96xf32> to vector<8x96xf32>
      %286 = arith.addf %284, %285 : vector<8x96xf32>
      %287 = vector.extract_strided_slice %282 {offsets = [0, 0], sizes = [8, 64], strides = [1, 1]} : vector<8x96xbf16> to vector<8x64xbf16>
      %288 = vector.extract_strided_slice %286 {offsets = [0, 0], sizes = [8, 64], strides = [1, 1]} : vector<8x96xf32> to vector<8x64xf32>
      %289 = arith.extf %287 : vector<8x64xbf16> to vector<8x64xf32>
      %290 = arith.addf %289, %288 : vector<8x64xf32>
      %291 = arith.negf %290 : vector<8x64xf32>
      %292 = math.exp %291 : vector<8x64xf32>
      %cst_87 = arith.constant 1.000000e+00 : f32
      %293 = vector.broadcast %cst_87 : f32 to vector<8x64xf32>
      %294 = arith.addf %293, %292 : vector<8x64xf32>
      %295 = arith.divf %293, %294 : vector<8x64xf32>
      %296 = vector.extract_strided_slice %295 {offsets = [0, 0], sizes = [8, 32], strides = [1, 1]} : vector<8x64xf32> to vector<8x32xf32>
      %297 = vector.extract_strided_slice %295 {offsets = [0, 32], sizes = [8, 32], strides = [1, 1]} : vector<8x64xf32> to vector<8x32xf32>
      %298 = vector.extract_strided_slice %282 {offsets = [0, 64], sizes = [8, 32], strides = [1, 1]} : vector<8x96xbf16> to vector<8x32xbf16>
      %299 = vector.extract_strided_slice %286 {offsets = [0, 64], sizes = [8, 32], strides = [1, 1]} : vector<8x96xf32> to vector<8x32xf32>
      %300 = arith.mulf %296, %299 : vector<8x32xf32>
      %301 = arith.extf %298 : vector<8x32xbf16> to vector<8x32xf32>
      %302 = arith.addf %301, %300 : vector<8x32xf32>
      %303 = math.tanh %302 : vector<8x32xf32>
      %cst_88 = arith.constant 1.000000e+00 : f32
      %304 = vector.broadcast %cst_88 : f32 to vector<8x32xf32>
      %305 = arith.subf %304, %297 : vector<8x32xf32>
      %306 = arith.mulf %305, %303 : vector<8x32xf32>
      %307 = arith.mulf %297, %276 : vector<8x32xf32>
      %308 = arith.addf %306, %307 : vector<8x32xf32>
      %c56_i32 = arith.constant 56 : i32
      %309 = arith.addi %55, %c56_i32 : i32
      %310 = tpu.assume_multiple %309, 8 : i32
      %311 = arith.truncf %308 : vector<8x32xf32> to vector<8x32xbf16>
      %312 = arith.index_cast %310 : i32 to index
      %c0_89 = arith.constant 0 : index
      %313 = vector.load %arg11[%312, %c0_89] : memref<128x32xbf16, #tpu.memory_space<vmem>>, vector<8x32xbf16>
      tpu.vector_store %arg11[%312, %c0_89], %311 {strides = array<i32>} : memref<128x32xbf16, #tpu.memory_space<vmem>>, vector<8x32xbf16>,
      scf.yield %308 : vector<8x32xf32>
    }
    %c2_i32_46 = arith.constant 2 : i32
    %c0_47 = arith.constant 0 : index
    %c0_48 = arith.constant 0 : index
    %42 = vector.load %arg8[%c0_47, %c0_48] : memref<32x256xbf16, #tpu.memory_space<vmem>>, vector<32x256xbf16>
    %c0_49 = arith.constant 0 : index
    %c0_50 = arith.constant 0 : index
    %43 = vector.load %arg9[%c0_49, %c0_50] : memref<1x256xf32, #tpu.memory_space<vmem>>, vector<1x256xf32>
    %c0_i32_51 = arith.constant 0 : i32
    %c128_i32 = arith.constant 128 : i32
    %44 = arith.muli %c0_i32_51, %c128_i32 : i32
    %45 = tpu.assume_multiple %44, 8 : i32
    %46 = arith.index_cast %45 : i32 to index
    %c0_52 = arith.constant 0 : index
    %47 = vector.load %arg11[%46, %c0_52] : memref<128x32xbf16, #tpu.memory_space<vmem>>, vector<128x32xbf16>
    %cst_53 = arith.constant dense<0.000000e+00> : vector<128x256xf32>
    %48 = tpu.matmul %47, %42, %cst_53 {dimension_numbers = #tpu.dot_dimension_numbers<[1], [0], [0], [1], [0, 0, 1, 1], [], []>} : vector<128x32xbf16>, vector<32x256xbf16>, vector<128x256xf32> -> vector<128x256xf32>
    %49 = vector.broadcast %43 : vector<1x256xf32> to vector<128x256xf32>
    %50 = arith.addf %48, %49 : vector<128x256xf32>
    %51 = math.exp %50 : vector<128x256xf32>
    %52 = arith.index_cast %45 : i32 to index
    %c0_54 = arith.constant 0 : index
    %53 = vector.load %arg10[%52, %c0_54] : memref<128x256xf32, #tpu.memory_space<vmem>>, vector<128x256xf32>
    tpu.vector_store %arg10[%52, %c0_54], %51 {strides = array<i32>} : memref<128x256xf32, #tpu.memory_space<vmem>>, vector<128x256xf32>,
    %c1_i32_55 = arith.constant 1 : i32
    return
  }
  func.func @transform_0(%arg0: i32) -> (i32, i32) {
    %c0_i32 = arith.constant 0 : i32
    %c0_i32_0 = arith.constant 0 : i32
    return %arg0, %c0_i32 : i32, i32
  }
  func.func @transform_1(%arg0: i32) -> (i32, i32) {
    %c0_i32 = arith.constant 0 : i32
    %c0_i32_0 = arith.constant 0 : i32
    %c0_i32_1 = arith.constant 0 : i32
    return %c0_i32, %c0_i32_0 : i32, i32
  }
  func.func @transform_2(%arg0: i32) -> (i32, i32) {
    %c0_i32 = arith.constant 0 : i32
    %c0_i32_0 = arith.constant 0 : i32
    %c0_i32_1 = arith.constant 0 : i32
    return %c0_i32, %c0_i32_0 : i32, i32
  }
  func.func @transform_3(%arg0: i32) -> (i32, i32, i32) {
    %c0_i32 = arith.constant 0 : i32
    %c0_i32_0 = arith.constant 0 : i32
    %c0_i32_1 = arith.constant 0 : i32
    %c0_i32_2 = arith.constant 0 : i32
    return %c0_i32, %c0_i32_0, %c0_i32_1 : i32, i32, i32
  }
  func.func @transform_4(%arg0: i32) -> (i32, i32, i32) {
    %c0_i32 = arith.constant 0 : i32
    %c0_i32_0 = arith.constant 0 : i32
    %c0_i32_1 = arith.constant 0 : i32
    %c0_i32_2 = arith.constant 0 : i32
    return %c0_i32, %c0_i32_0, %c0_i32_1 : i32, i32, i32
  }
  func.func @transform_5(%arg0: i32) -> (i32, i32, i32) {
    %c0_i32 = arith.constant 0 : i32
    %c0_i32_0 = arith.constant 0 : i32
    %c0_i32_1 = arith.constant 0 : i32
    %c0_i32_2 = arith.constant 0 : i32
    return %c0_i32, %c0_i32_0, %c0_i32_1 : i32, i32, i32
  }
  func.func @transform_6(%arg0: i32) -> (i32, i32, i32) {
    %c0_i32 = arith.constant 0 : i32
    %c0_i32_0 = arith.constant 0 : i32
    %c0_i32_1 = arith.constant 0 : i32
    %c0_i32_2 = arith.constant 0 : i32
    return %c0_i32, %c0_i32_0, %c0_i32_1 : i32, i32, i32
  }
  func.func @transform_7(%arg0: i32) -> (i32, i32) {
    %c0_i32 = arith.constant 0 : i32
    %c0_i32_0 = arith.constant 0 : i32
    %c0_i32_1 = arith.constant 0 : i32
    return %c0_i32, %c0_i32_0 : i32, i32
  }
  func.func @transform_8(%arg0: i32) -> (i32, i32) {
    %c0_i32 = arith.constant 0 : i32
    %c0_i32_0 = arith.constant 0 : i32
    %c0_i32_1 = arith.constant 0 : i32
    return %c0_i32, %c0_i32_0 : i32, i32
  }
  func.func @transform_9(%arg0: i32) -> (i32, i32) {
    %c0_i32 = arith.constant 0 : i32
    %c0_i32_0 = arith.constant 0 : i32
    return %arg0, %c0_i32 : i32, i32
  }
}

</mosaic_0001>

<bundles_post_ra>
// kernel: tpu_custom_call.1
= control target key start
LH: loop header
LB: loop body
LE: loop exit
PB: predicated region body
PF: predicated region fallthrough
CT: control target
= control target key end

     0   :  { %14 = vsyncpa [#allocation5], 0  ;;  %s4298_s0 = inlined_call_operand.vmem [shape: bf16[128,8], index: 0, kind: input, shape index: {}]   ;;  %s4299_s1 = inlined_call_operand.vmem [shape: bf16[8,32], index: 1, kind: input, shape index: {}]   ;;  %s4300_s2 = inlined_call_operand.vmem [shape: f32[1,32], index: 2, kind: input, shape index: {}]   ;;  %s4301_s3 = inlined_call_operand.vmem [shape: bf16[2,32,96], index: 3, kind: input, shape index: {}]   ;;  %s4302_s4 = inlined_call_operand.vmem [shape: bf16[2,32,96], index: 4, kind: input, shape index: {}]   ;;  %s4303_s5 = inlined_call_operand.vmem [shape: f32[2,1,96], index: 5, kind: input, shape index: {}]   ;;  %s4304_s6 = inlined_call_operand.vmem [shape: f32[2,1,96], index: 6, kind: input, shape index: {}]   ;;  %s4305_s7 = inlined_call_operand.hbm [shape: bf16[32,256], index: 7, kind: input, shape index: {}]   ;;  %s4306_s8 = inlined_call_operand.vmem [shape: f32[1,256], index: 8, kind: input, shape index: {}]   ;;  %s4307_s9 = inlined_call_operand.hbm [shape: f32[128,256], index: 9, kind: output, shape index: {}]  }
   0x1   :  { %15 = vsyncpa [#allocation6], 0  ;;  %s3636_s30 = smov [#allocation4]  }
   0x2   :  { %s35_s10 = sshll.u32 %s3636_s30, 4  ;;  %s36_s10 = int_to_ptr.vmem [resolvable:$true] %s35_s10 }
   0x3   :  { %s3568_s11 = scalar_lea.vmem %s36_s10, 512  ;;  %p3573_p1 = scmp.lt.s32.totalorder %s36_s10, %s36_s10 }
   0x4   :  { %p3569_p0 = scmp.ne.s32.totalorder %s36_s10, %s3568_s11  ;;  %p3574_p2 = scmp.lt.s32.totalorder %s3568_s11, %s3568_s11 }
   0x6   :  { %p3575_p3 = por %p3574_p2, %p3573_p1 }
   0x8   :  { %p3576_p4 = pnand %p3575_p3, %p3569_p0 }
   0xa   :  { %3579 = shalt.err (!%p3576_p4)
}
   0xb   :  { %s3637_s12 = smov 128   ;;  %s3638_s13 = smov 8  }
   0xc   :  { %41 = dma.hbm_to_vmem [thread:$0]  %s4305_s7, 512, %s36_s10, [#allocation5], %s3637_s12, %s3637_s12, %s3638_s13  }
   0xd   :  { %3616 = dma.done.wait [#allocation5], 512  }
   0xe   :  { %3617 = vsyncadd [#allocation5], 4294966784  ;;  %vm137_vm0 = vcmask 1043456   ;;  %vm112_vm1 = vcmask 64512   ;;  %v3707_v0 = vld [vmem:[%s4302_s4] sm:$0xf] }
   0xf   :  { %v3712_v1 = vld [vmem:[%s4302_s4 + $0x4] sm:$0xf]  ;;  %v3717_v2 = vld [vmem:[%s4302_s4 + $0x8] sm:$0xf]  ;;  %v3722_v3 = vld [vmem:[%s4302_s4 + $0xc] sm:$0xf] }
  0x10   :  { %v3727_v4 = vld [vmem:[%s4304_s6] ss:$0 sm:$0xff]  ;;  %v3359_v8 = vld [vmem:[%s4298_s0 + $0x8] sm:$0xff]   ;;  %v3360_v9 = vld [vmem:[%s4298_s0 + $0x10] sm:$0xff]   ;;  %vm302_vm2 = vcmask 257024   ;;  %vm398_vm3 = vcmask 261120  }
  0x11   :  { %v64_v5 = vld [vmem:[%s4299_s1] sm:$0xf]  ;;  %v3361_v10 = vld [vmem:[%s4298_s0 + $0x18] sm:$0xff]   ;;  %v3363_v12 = vld [vmem:[%s4298_s0 + $0x28] sm:$0xff]   ;;  %vm584_vm4 = vcmask 781312   ;;  %s3836_s26 = smov 0  }
  0x12   :  { %3310 = vmatprep.subr.msk.bf16.mxu0 %vm137_vm0, %v64_v5  ;;  %v139_v6 = vsel %vm137_vm0, %v64_v5, 0  ;;  %v3358_v7 = vld [vmem:[%s4298_s0] sm:$0xff]   ;;  %v3364_v13 = vld [vmem:[%s4298_s0 + $0x30] sm:$0xff]   ;;  %v3365_v14 = vld [vmem:[%s4298_s0 + $0x38] sm:$0xff]  }
  0x13   :  { %3117 = vmatpush3.bf16.msra.mxu0 %v139_v6  ;;  %3118 = vmatprep.mubr.msk.bf16.mxu0 %vm112_vm1, %v3358_v7  ;;  %v3362_v11 = vld [vmem:[%s4298_s0 + $0x20] sm:$0xff]   ;;  %v3366_v15 = vld [vmem:[%s4301_s3 + $0x8] sm:$0xff]  }
  0x14   :  { %3134 = vmatprep.subr.bf16.mxu1 %v3366_v15  ;;  %v3367_v16 = vld [vmem:[%s4301_s3] sm:$0xff]  }
  0x15   :  { %3135 = vmatpush3.bf16.msra.mxu1 %v3366_v15  ;;  %v3773_v17 = vld [vmem:[%s4300_s2] ss:$0 sm:$0xff] }
  0x16   :  { %3119 = vmatmul.mubr.msk.bf16.vlgmr.msra.gmra.mxu0 %vm112_vm1, %v3359_v8  ;;  %3136 = vmatprep.subr.bf16.mxu1 %v3367_v16  ;;  %v2763_v15 = vld [vmem:[%s4303_s5] ss:$0 sm:$0xff] }
  0x17   :  { %3122 = vmatprep.mubr.msk.bf16.mxu0 %vm112_vm1, %v3360_v9 }
  0x19   :  { %3137 = vmatpush3.bf16.msra.mxu1 %v3367_v16 }
  0x1e   :  { %3123 = vmatmul.mubr.msk.bf16.gmra.mxu0 %vm112_vm1, %v3361_v10 }
  0x1f   :  { %3126 = vmatprep.mubr.msk.bf16.mxu0 %vm112_vm1, %v3362_v11 }
  0x26   :  { %3127 = vmatmul.mubr.msk.bf16.gmra.mxu0 %vm112_vm1, %v3363_v12 }
  0x27   :  { %3130 = vmatprep.mubr.msk.bf16.mxu0 %vm112_vm1, %v3364_v13 }
  0x2e   :  { %3131 = vmatmul.mubr.msk.bf16.gmra.mxu0 %vm112_vm1, %v3365_v14 }
  0xd6   :  { %v3120_v18 = vpop.f32.mrf.mxu0 }
  0xd7   :  { %v184_v19 = vadd.f32 %v3120_v18, %v3773_v17 }
  0xd8   :  { %v175_v20 = vpop.f32.mrf.mxu0 }
  0xd9   :  { %v2939_v21 = vpack.c.bf16 %v184_v19, %v184_v19  ;;  %v176_v22 = vadd.f32 %v3773_v17, %v175_v20 }
  0xda   :  { %v3121_v23 = vpop.f32.mrf.mxu0 }
  0xdb   :  { %305 = vst.msk [vmem:[#allocation2 + $0x8] sm:$0xf] %vm302_vm2, %v2939_v21  ;;  %v2937_v24 = vpack.c.bf16 %v176_v22, %v176_v22  ;;  %v187_v25 = vadd.f32 %v3121_v23, %v3773_v17 }
  0xdc   :  { %v178_v26 = vpop.f32.mrf.mxu0 }
  0xdd   :  { %303 = vst.msk [vmem:[#allocation2] sm:$0xf] %vm302_vm2, %v2937_v24  ;;  %v2940_v27 = vpack.c.bf16 %v187_v25, %v187_v25  ;;  %v179_v28 = vadd.f32 %v3773_v17, %v178_v26 }
  0xde   :  { %v3124_v29 = vpop.f32.mrf.mxu0 }
  0xdf   :  { %306 = vst.msk [vmem:[#allocation2 + $0xc] sm:$0xf] %vm302_vm2, %v2940_v27  ;;  %v2938_v30 = vpack.c.bf16 %v179_v28, %v179_v28  ;;  %v200_v31 = vadd.f32 %v3124_v29, %v3773_v17 }
  0xe0   :  { %v191_v32 = vpop.f32.mrf.mxu0 }
  0xe1   :  { %304 = vst.msk [vmem:[#allocation2 + $0x4] sm:$0xf] %vm302_vm2, %v2938_v30  ;;  %v2943_v33 = vpack.c.bf16 %v200_v31, %v200_v31  ;;  %v192_v34 = vadd.f32 %v3773_v17, %v191_v32 }
  0xe2   :  { %v3125_v35 = vpop.f32.mrf.mxu0 }
  0xe3   :  { %309 = vst.msk [vmem:[#allocation2 + $0x18] sm:$0xf] %vm302_vm2, %v2943_v33  ;;  %v2941_v36 = vpack.c.bf16 %v192_v34, %v192_v34  ;;  %v203_v37 = vadd.f32 %v3125_v35, %v3773_v17 }
  0xe4   :  { %v194_v38 = vpop.f32.mrf.mxu0 }
  0xe5   :  { %307 = vst.msk [vmem:[#allocation2 + $0x10] sm:$0xf] %vm302_vm2, %v2941_v36  ;;  %v2944_v39 = vpack.c.bf16 %v203_v37, %v203_v37  ;;  %v195_v40 = vadd.f32 %v3773_v17, %v194_v38 }
  0xe6   :  { %v3128_v41 = vpop.f32.mrf.mxu0  ;;  %v3369_v48 = vld [vmem:[#allocation2 + $0x8] sm:$0xff]  }
  0xe7   :  { %310 = vst.msk [vmem:[#allocation2 + $0x1c] sm:$0xf] %vm302_vm2, %v2944_v39  ;;  %v2942_v42 = vpack.c.bf16 %v195_v40, %v195_v40  ;;  %v216_v43 = vadd.f32 %v3128_v41, %v3773_v17 }
  0xe8   :  { %v207_v44 = vpop.f32.mrf.mxu0  ;;  %v3368_v45 = vld [vmem:[#allocation2] sm:$0xff]  }
  0xe9   :  { %308 = vst.msk [vmem:[#allocation2 + $0x14] sm:$0xf] %vm302_vm2, %v2942_v42  ;;  %v2947_v46 = vpack.c.bf16 %v216_v43, %v216_v43  ;;  %v208_v47 = vadd.f32 %v3773_v17, %v207_v44  ;;  %3138 = vmatprep.mubr.msk.bf16.mxu1 %vm398_vm3, %v3368_v45 }
  0xea   :  { %v3129_v49 = vpop.f32.mrf.mxu0  ;;  %3139 = vmatmul.mubr.msk.bf16.vlgmr.msra.gmra.mxu1 %vm398_vm3, %v3369_v48 }
  0xeb   :  { %313 = vst.msk [vmem:[#allocation2 + $0x28] sm:$0xf] %vm302_vm2, %v2947_v46  ;;  %v2945_v50 = vpack.c.bf16 %v208_v47, %v208_v47  ;;  %v219_v51 = vadd.f32 %v3129_v49, %v3773_v17 }
  0xec   :  { %v210_v52 = vpop.f32.mrf.mxu0 }
  0xed   :  { %311 = vst.msk [vmem:[#allocation2 + $0x20] sm:$0xf] %vm302_vm2, %v2945_v50  ;;  %v2948_v53 = vpack.c.bf16 %v219_v51, %v219_v51  ;;  %v211_v54 = vadd.f32 %v3773_v17, %v210_v52 }
  0xee   :  { %v3132_v55 = vpop.f32.mrf.mxu0  ;;  %v3371_v62 = vld [vmem:[#allocation2 + $0x18] sm:$0xff]  }
  0xef   :  { %314 = vst.msk [vmem:[#allocation2 + $0x2c] sm:$0xf] %vm302_vm2, %v2948_v53  ;;  %v2946_v56 = vpack.c.bf16 %v211_v54, %v211_v54  ;;  %v232_v57 = vadd.f32 %v3132_v55, %v3773_v17 }
  0xf0   :  { %v223_v58 = vpop.f32.mrf.mxu0  ;;  %v3370_v59 = vld [vmem:[#allocation2 + $0x10] sm:$0xff]  }
  0xf1   :  { %312 = vst.msk [vmem:[#allocation2 + $0x24] sm:$0xf] %vm302_vm2, %v2946_v56  ;;  %v2951_v60 = vpack.c.bf16 %v232_v57, %v232_v57  ;;  %v224_v61 = vadd.f32 %v3773_v17, %v223_v58  ;;  %3142 = vmatprep.mubr.msk.bf16.mxu1 %vm398_vm3, %v3370_v59 }
  0xf2   :  { %v3133_v63 = vpop.f32.mrf.mxu0  ;;  %3143 = vmatmul.mubr.msk.bf16.gmra.mxu1 %vm398_vm3, %v3371_v62 }
  0xf3   :  { %317 = vst.msk [vmem:[#allocation2 + $0x38] sm:$0xf] %vm302_vm2, %v2951_v60  ;;  %v2949_v5 = vpack.c.bf16 %v224_v61, %v224_v61  ;;  %v235_v6 = vadd.f32 %v3133_v63, %v3773_v17 }
  0xf4   :  { %v226_v7 = vpop.f32.mrf.mxu0 }
  0xf5   :  { %315 = vst.msk [vmem:[#allocation2 + $0x30] sm:$0xf] %vm302_vm2, %v2949_v5  ;;  %v2952_v8 = vpack.c.bf16 %v235_v6, %v235_v6  ;;  %v227_v9 = vadd.f32 %v3773_v17, %v226_v7  ;;  %v3834_v5 = vmov 0.0  }
  0xf6   :  { %v3373_v12 = vld [vmem:[#allocation2 + $0x28] sm:$0xff]  }
  0xf7   :  { %318 = vst.msk [vmem:[#allocation2 + $0x3c] sm:$0xf] %vm302_vm2, %v2952_v8  ;;  %v2950_v10 = vpack.c.bf16 %v227_v9, %v227_v9 }
  0xf8   :  { %v3372_v11 = vld [vmem:[#allocation2 + $0x20] sm:$0xff]  }
  0xf9   :  { %316 = vst.msk [vmem:[#allocation2 + $0x34] sm:$0xf] %vm302_vm2, %v2950_v10  ;;  %3146 = vmatprep.mubr.msk.bf16.mxu1 %vm398_vm3, %v3372_v11 }
  0xfa   :  { %3147 = vmatmul.mubr.msk.bf16.gmra.mxu1 %vm398_vm3, %v3373_v12 }
  0xfe   :  { %v3375_v14 = vld [vmem:[#allocation2 + $0x38] sm:$0xff]  }
 0x100   :  { %v3374_v13 = vld [vmem:[#allocation2 + $0x30] sm:$0xff]  }
 0x101   :  { %3150 = vmatprep.mubr.msk.bf16.mxu1 %vm398_vm3, %v3374_v13 }
 0x102   :  { %3151 = vmatmul.mubr.msk.bf16.gmra.mxu1 %vm398_vm3, %v3375_v14 }
 0x1aa   :  { %v3140_v16 = vpop.f32.mrf.mxu1 }
 0x1ab   :  { %v466_v17 = vadd.f32 %v3140_v16, %v2763_v15 }
 0x1ac   :  { %v457_v18 = vpop.f32.mrf.mxu1 }
 0x1ad   :  { %v2955_v19 = vpack.c.bf16 %v466_v17, %v466_v17  ;;  %v458_v20 = vadd.f32 %v2763_v15, %v457_v18 }
 0x1ae   :  { %v3141_v21 = vpop.f32.mrf.mxu1 }
 0x1af   :  { %587 = vst.msk [vmem:[#allocation3 + $0x8] sm:$0xf] %vm584_vm4, %v2955_v19  ;;  %v2953_v22 = vpack.c.bf16 %v458_v20, %v458_v20  ;;  %v469_v23 = vadd.f32 %v3141_v21, %v2763_v15 }
 0x1b0   :  { %v460_v24 = vpop.f32.mrf.mxu1 }
 0x1b1   :  { %585 = vst.msk [vmem:[#allocation3] sm:$0xf] %vm584_vm4, %v2953_v22  ;;  %v2956_v25 = vpack.c.bf16 %v469_v23, %v469_v23  ;;  %v461_v26 = vadd.f32 %v2763_v15, %v460_v24 }
 0x1b2   :  { %v3144_v27 = vpop.f32.mrf.mxu1 }
 0x1b3   :  { %588 = vst.msk [vmem:[#allocation3 + $0xc] sm:$0xf] %vm584_vm4, %v2956_v25  ;;  %v2954_v28 = vpack.c.bf16 %v461_v26, %v461_v26  ;;  %v482_v29 = vadd.f32 %v3144_v27, %v2763_v15 }
 0x1b4   :  { %v473_v30 = vpop.f32.mrf.mxu1 }
 0x1b5   :  { %586 = vst.msk [vmem:[#allocation3 + $0x4] sm:$0xf] %vm584_vm4, %v2954_v28  ;;  %v2959_v31 = vpack.c.bf16 %v482_v29, %v482_v29  ;;  %v474_v32 = vadd.f32 %v2763_v15, %v473_v30 }
 0x1b6   :  { %v3145_v33 = vpop.f32.mrf.mxu1 }
 0x1b7   :  { %591 = vst.msk [vmem:[#allocation3 + $0x18] sm:$0xf] %vm584_vm4, %v2959_v31  ;;  %v2957_v34 = vpack.c.bf16 %v474_v32, %v474_v32  ;;  %v485_v35 = vadd.f32 %v3145_v33, %v2763_v15 }
 0x1b8   :  { %v476_v36 = vpop.f32.mrf.mxu1 }
 0x1b9   :  { %589 = vst.msk [vmem:[#allocation3 + $0x10] sm:$0xf] %vm584_vm4, %v2957_v34  ;;  %v2960_v37 = vpack.c.bf16 %v485_v35, %v485_v35  ;;  %v477_v38 = vadd.f32 %v2763_v15, %v476_v36 }
 0x1ba   :  { %v3148_v39 = vpop.f32.mrf.mxu1 }
 0x1bb   :  { %592 = vst.msk [vmem:[#allocation3 + $0x1c] sm:$0xf] %vm584_vm4, %v2960_v37  ;;  %v2958_v40 = vpack.c.bf16 %v477_v38, %v477_v38  ;;  %v498_v41 = vadd.f32 %v3148_v39, %v2763_v15 }
 0x1bc   :  { %v489_v42 = vpop.f32.mrf.mxu1 }
 0x1bd   :  { %590 = vst.msk [vmem:[#allocation3 + $0x14] sm:$0xf] %vm584_vm4, %v2958_v40  ;;  %v2963_v43 = vpack.c.bf16 %v498_v41, %v498_v41  ;;  %v490_v44 = vadd.f32 %v2763_v15, %v489_v42 }
 0x1be   :  { %v3149_v45 = vpop.f32.mrf.mxu1 }
 0x1bf   :  { %595 = vst.msk [vmem:[#allocation3 + $0x28] sm:$0xf] %vm584_vm4, %v2963_v43  ;;  %v2961_v46 = vpack.c.bf16 %v490_v44, %v490_v44  ;;  %v501_v47 = vadd.f32 %v3149_v45, %v2763_v15 }
 0x1c0   :  { %v492_v48 = vpop.f32.mrf.mxu1 }
 0x1c1   :  { %593 = vst.msk [vmem:[#allocation3 + $0x20] sm:$0xf] %vm584_vm4, %v2961_v46  ;;  %v2964_v49 = vpack.c.bf16 %v501_v47, %v501_v47  ;;  %v493_v50 = vadd.f32 %v2763_v15, %v492_v48 }
 0x1c2   :  { %v3152_v51 = vpop.f32.mrf.mxu1 }
 0x1c3   :  { %596 = vst.msk [vmem:[#allocation3 + $0x2c] sm:$0xf] %vm584_vm4, %v2964_v49  ;;  %v2962_v52 = vpack.c.bf16 %v493_v50, %v493_v50  ;;  %v514_v53 = vadd.f32 %v3152_v51, %v2763_v15 }
 0x1c4   :  { %v505_v54 = vpop.f32.mrf.mxu1 }
 0x1c5   :  { %594 = vst.msk [vmem:[#allocation3 + $0x24] sm:$0xf] %vm584_vm4, %v2962_v52  ;;  %v2967_v55 = vpack.c.bf16 %v514_v53, %v514_v53  ;;  %v506_v56 = vadd.f32 %v2763_v15, %v505_v54 }
 0x1c6   :  { %v3153_v57 = vpop.f32.mrf.mxu1 }
 0x1c7   :  { %599 = vst.msk [vmem:[#allocation3 + $0x38] sm:$0xf] %vm584_vm4, %v2967_v55  ;;  %v2965_v58 = vpack.c.bf16 %v506_v56, %v506_v56  ;;  %v517_v59 = vadd.f32 %v3153_v57, %v2763_v15 }
 0x1c8   :  { %v508_v60 = vpop.f32.mrf.mxu1 }
 0x1c9   :  { %597 = vst.msk [vmem:[#allocation3 + $0x30] sm:$0xf] %vm584_vm4, %v2965_v58  ;;  %v2968_v61 = vpack.c.bf16 %v517_v59, %v517_v59  ;;  %v509_v62 = vadd.f32 %v2763_v15, %v508_v60 }
 0x1cb   :  { %600 = vst.msk [vmem:[#allocation3 + $0x3c] sm:$0xf] %vm584_vm4, %v2968_v61  ;;  %v2966_v63 = vpack.c.bf16 %v509_v62, %v509_v62 }
 0x1cd   :  { %598 = vst.msk [vmem:[#allocation3 + $0x34] sm:$0xf] %vm584_vm4, %v2966_v63 }
 0x1ce LB: > { %v3844_v6 = vcombine.low %v3717_v2, %v3722_v3  ;;  %v3639_v7 = vmov 0.0   ;;  %v626_v8 = vpack.c.bf16 %v3622_v5, %v3622_v5  ;;  %v3851_v9 = vcombine.low %v3707_v0, %v3712_v1  ;;  %s3641_s27 = smov 96   ;;  %s3642_s28 = smov 64   ;;  %s3626_s26 = sphi %s3836_s26, %s611_s26   ;;  %v3622_v5 = vphi %v3834_v5, %v1311_v5  }
 0x1cf   : > { %3154 = vmatprep.subr.bf16.mxu0 %v3639_v7  ;;  %3162 = vmatprep.subr.bf16.mxu1 %v3639_v7  ;;  %vm3640_vm5 = vmmov 0   ;;  %s3875_s29 = sshll.u32 %s3626_s26, 6  ;;  %s611_s26 = sadd.s32 1, %s3626_s26  }
 0x1d0   : > { %3155 = vmatpush3.bf16.msra.mxu0 %v3844_v6  ;;  %3158 = vmatprep.mubr.msk.bf16.mxu0 %vm3640_vm5, %v3639_v7  ;;  %s614_s30 = sshra.s32 %s3875_s29, 3  ;;  %s802_s12 = sadd.s32 8, %s3875_s29 }
 0x1d1   : > { %3156 = vmatprep.subr.bf16.mxu0 %v3639_v7  ;;  %3163 = vmatpush3.bf16.msra.mxu1 %v3844_v6  ;;  %s3878_s10 = sshll.u32 %s614_s30, 2  ;;  %s887_s13 = sadd.s32 16, %s3875_s29 }
 0x1d2   : > { %634 = vrot.lane.b32.xlu0 %v626_v8, %s3641_s27  ;;  %3164 = vmatprep.subr.bf16.mxu1 %v3639_v7  ;;  %s3881_s11 = scalar_lea.vmem [#allocation3], %s3878_s10  ;;  %s728_s1 = scalar_lea.vmem [#allocation2], %s3878_s10 }
 0x1d3   : > { %3166 = vmatprep.mubr.msk.bf16.mxu1 %vm3640_vm5, %v3639_v7  ;;  %s810_s14 = sshra.s32 %s802_s12, 3  ;;  %s895_s15 = sshra.s32 %s887_s13, 3 }
 0x1d4   : > { %3157 = vmatpush3.bf16.msra.mxu0 %v3851_v9  ;;  %v3002_v16 = vld [vmem:[%s3881_s11] sm:$0xff]   ;;  %v3033_v63 = vld [vmem:[%s3881_s11 + $0x8] sm:$0xff]   ;;  %s972_s16 = sadd.s32 24, %s3875_s29  ;;  %s1057_s17 = sadd.s32 32, %s3875_s29 }
 0x1d5   : > { %3165 = vmatpush3.bf16.msra.mxu1 %v3851_v9  ;;  %3170 = vmatprep.subr.bf16.mxu0 %v3639_v7  ;;  %v3003_v17 = vunpack.c.l.bf16 %v3002_v16  ;;  %v3004_v40 = vunpack.c.h.bf16 %v3002_v16  ;;  %s2810_s18 = sshll.u32 %s810_s14, 2  ;;  %s2814_s19 = sshll.u32 %s895_s15, 2 }
 0x1d6   : > { %3178 = vmatprep.subr.bf16.mxu1 %v3639_v7  ;;  %s980_s20 = sshra.s32 %s972_s16, 3  ;;  %s1065_s21 = sshra.s32 %s1057_s17, 3 }
 0x1d7   : > { %s1142_s7 = sadd.s32 40, %s3875_s29  ;;  %s1227_s22 = sadd.s32 48, %s3875_s29 }
 0x1d8   : > { %s2818_s23 = sshll.u32 %s980_s20, 2  ;;  %s2822_s24 = sshll.u32 %s1065_s21, 2 }
 0x1d9   : > { %s1150_s25 = sshra.s32 %s1142_s7, 3  ;;  %s1235_s0 = sshra.s32 %s1227_s22, 3 }
 0x1da   : > { %s813_s2 = scalar_lea.vmem [#allocation2], %s2810_s18  ;;  %s2826_s30 = sshll.u32 %s1150_s25, 2 }
 0x1db   : > { %s2830_s10 = sshll.u32 %s1235_s0, 2  ;;  %s1153_s12 = scalar_lea.vmem [#allocation2], %s2826_s30 }
 0x1dc   : > { %s1238_s13 = scalar_lea.vmem [#allocation2], %s2830_s10  ;;  %s1312_s14 = sadd.s32 56, %s3875_s29 }
 0x1dd   : > { %s1320_s15 = sshra.s32 %s1312_s14, 3  ;;  %p608_p5 = scmp.ge.s32.totalorder %s611_s26, 2  }
 0x244   : > { %v635_v10 = vpop.permute.xlu0 %634 }
 0x245   : > { %3159 = vmatmul.mubr.msk.bf16.vlgmr.msra.gmra.mxu0 %vm398_vm3, %v635_v10 }
 0x246   : > { %3171 = vmatpush3.bf16.msra.mxu0 %v3844_v6  ;;  %3174 = vmatprep.mubr.msk.bf16.mxu0 %vm3640_vm5, %v3639_v7 }
 0x247   : > { %3172 = vmatprep.subr.bf16.mxu0 %v3639_v7 }
 0x24a   : > { %3173 = vmatpush3.bf16.msra.mxu0 %v3851_v9 }
 0x24b   : > { %3186 = vmatprep.subr.bf16.mxu0 %v3639_v7 }
 0x305   : > { %v685_v11 = vpop.f32.mrf.mxu0 }
 0x306   : > { %v686_v12 = vadd.f32 %v3727_v4, %v685_v11 }
 0x307   : > { %v3160_v13 = vpop.f32.mrf.mxu0 }
 0x308   : > { %700 = vrot.lane.b32.xlu0 %v686_v12, %s3642_s28  ;;  %v692_v18 = vadd.f32 %v3003_v17, %v686_v12 }
 0x309   : > { %v688_v14 = vpop.f32.mrf.mxu0 }
 0x30a   : > { %v2804_v19 = vmul.f32 -1.442695, %v692_v18 }
 0x30b   : > { %v3161_v15 = vpop.f32.mrf.mxu0 }
 0x30c   : > { %3376 = vpow2.f32 %v2804_v19 }
 0x319   : > { %v3377_v20 = vpop.eup %3376 }
 0x31a   : > { %v696_v21 = vadd.f32 1.0, %v3377_v20 }
 0x31c   : > { %3378 = vrcp.f32 %v696_v21 }
 0x329   : > { %v3379_v22 = vpop.eup %3378 }
 0x32a   : > { %v710_v28 = vsub.f32 1.0, %v3379_v22  ;;  %v716_v30 = vmul.f32 %v3622_v5, %v3379_v22  ;;  %v3007_v5 = vunpack.c.l.bf16 %v3033_v63 }
 0x37a   : > { %v701_v23 = vpop.permute.xlu0 %700 }
 0x37b   : > { %v703_v24 = vmul.f32 %v3379_v22, %v701_v23 }
 0x37d   : > { %705 = vrot.lane.b32.xlu1 %v703_v24, %s3642_s28 }
 0x3ef   : > { %v706_v25 = vpop.permute.xlu1 %705 }
 0x3f0   : > { %v708_v26 = vadd.f32 %v3003_v17, %v706_v25 }
 0x3f2   : > { %3380 = vtanh.f32 %v708_v26 }
 0x3ff   : > { %v3381_v27 = vpop.eup %3380 }
 0x400   : > { %712 = vrot.lane.b32.xlu1 %v3381_v27, %s3641_s27 }
 0x472   : > { %v713_v29 = vpop.permute.xlu1 %712 }
 0x473   : > { %v715_v31 = vmul.f32 %v713_v29, %v710_v28 }
 0x475   : > { %v717_v32 = vadd.f32 %v716_v30, %v715_v31  ;;  %v3008_v31 = vunpack.c.h.bf16 %v3033_v63 }
 0x477   : > { %v3886_v33 = vpack.c.bf16 %v717_v32, %v717_v32 }
 0x479   : > { %730 = vrot.lane.b32.xlu0 %v3886_v33, %s3641_s27 }
 0x4eb   : > { %v731_v34 = vpop.permute.xlu0 %730 }
 0x4ec   : > { %3167 = vmatmul.mubr.msk.bf16.vlgmr.msra.gmra.mxu1 %vm398_vm3, %v731_v34 }
 0x4ed   : > { %3179 = vmatpush3.bf16.msra.mxu1 %v3844_v6  ;;  %3182 = vmatprep.mubr.msk.bf16.mxu1 %vm3640_vm5, %v3639_v7 }
 0x4ee   : > { %3180 = vmatprep.subr.bf16.mxu1 %v3639_v7 }
 0x4f1   : > { %3181 = vmatpush3.bf16.msra.mxu1 %v3851_v9 }
 0x4f2   : > { %3194 = vmatprep.subr.bf16.mxu1 %v3639_v7 }
 0x5ac   : > { %v769_v35 = vpop.f32.mrf.mxu1 }
 0x5ad   : > { %v770_v36 = vadd.f32 %v3727_v4, %v769_v35 }
 0x5ae   : > { %v3168_v37 = vpop.f32.mrf.mxu1 }
 0x5af   : > { %784 = vrot.lane.b32.xlu1 %v770_v36, %s3642_s28  ;;  %v776_v41 = vadd.f32 %v3004_v40, %v770_v36 }
 0x5b0   : > { %v772_v38 = vpop.f32.mrf.mxu1 }
 0x5b1   : > { %v2808_v42 = vmul.f32 -1.442695, %v776_v41 }
 0x5b2   : > { %v3169_v39 = vpop.f32.mrf.mxu1 }
 0x5b3   : > { %3382 = vpow2.f32 %v2808_v42 }
 0x5c0   : > { %v3383_v43 = vpop.eup %3382 }
 0x5c1   : > { %v780_v44 = vadd.f32 1.0, %v3383_v43 }
 0x5c3   : > { %3384 = vrcp.f32 %v780_v44 }
 0x5d0   : > { %v3385_v45 = vpop.eup %3384 }
 0x5d1   : > { %v794_v51 = vsub.f32 1.0, %v3385_v45  ;;  %v800_v53 = vmul.f32 %v3385_v45, %v717_v32 }
 0x621   : > { %v785_v46 = vpop.permute.xlu1 %784 }
 0x622   : > { %v787_v47 = vmul.f32 %v3385_v45, %v785_v46 }
 0x624   : > { %789 = vrot.lane.b32.xlu0 %v787_v47, %s3642_s28 }
 0x696   : > { %v790_v48 = vpop.permute.xlu0 %789 }
 0x697   : > { %v792_v49 = vadd.f32 %v3004_v40, %v790_v48 }
 0x699   : > { %3386 = vtanh.f32 %v792_v49 }
 0x6a6   : > { %v3387_v50 = vpop.eup %3386 }
 0x6a7   : > { %796 = vrot.lane.b32.xlu1 %v3387_v50, %s3641_s27 }
 0x719   : > { %v797_v52 = vpop.permute.xlu1 %796 }
 0x71a   : > { %v799_v54 = vmul.f32 %v797_v52, %v794_v51 }
 0x71c   : > { %v801_v55 = vadd.f32 %v800_v53, %v799_v54 }
 0x71e   : > { %v3901_v56 = vpack.c.bf16 %v801_v55, %v801_v55 }
 0x720   : > { %815 = vrot.lane.b32.xlu0 %v3901_v56, %s3641_s27 }
 0x792   : > { %v816_v57 = vpop.permute.xlu0 %815 }
 0x793   : > { %3175 = vmatmul.mubr.msk.bf16.vlgmr.msra.gmra.mxu0 %vm398_vm3, %v816_v57 }
 0x794   : > { %3187 = vmatpush3.bf16.msra.mxu0 %v3844_v6  ;;  %3190 = vmatprep.mubr.msk.bf16.mxu0 %vm3640_vm5, %v3639_v7 }
 0x795   : > { %3188 = vmatprep.subr.bf16.mxu0 %v3639_v7 }
 0x798   : > { %3189 = vmatpush3.bf16.msra.mxu0 %v3851_v9 }
 0x799   : > { %3202 = vmatprep.subr.bf16.mxu0 %v3639_v7 }
 0x853   : > { %v854_v58 = vpop.f32.mrf.mxu0 }
 0x854   : > { %v855_v59 = vadd.f32 %v3727_v4, %v854_v58 }
 0x855   : > { %v3176_v60 = vpop.f32.mrf.mxu0 }
 0x856   : > { %869 = vrot.lane.b32.xlu1 %v855_v59, %s3642_s28  ;;  %v861_v8 = vadd.f32 %v3007_v5, %v855_v59 }
 0x857   : > { %v857_v61 = vpop.f32.mrf.mxu0 }
 0x858   : > { %v2812_v10 = vmul.f32 -1.442695, %v861_v8 }
 0x859   : > { %v3177_v62 = vpop.f32.mrf.mxu0 }
 0x85a   : > { %3388 = vpow2.f32 %v2812_v10 }
 0x867   : > { %v3389_v11 = vpop.eup %3388 }
 0x868   : > { %v865_v12 = vadd.f32 1.0, %v3389_v11 }
 0x86a   : > { %3390 = vrcp.f32 %v865_v12 }
 0x877   : > { %v3391_v13 = vpop.eup %3390 }
 0x878   : > { %v879_v19 = vsub.f32 1.0, %v3391_v13  ;;  %v885_v21 = vmul.f32 %v3391_v13, %v801_v55  ;;  %v3034_v55 = vld [vmem:[%s3881_s11 + $0x10] sm:$0xff]  }
 0x879   : > { %v3011_v57 = vunpack.c.l.bf16 %v3034_v55 }
 0x8c8   : > { %v870_v14 = vpop.permute.xlu1 %869 }
 0x8c9   : > { %v872_v15 = vmul.f32 %v3391_v13, %v870_v14 }
 0x8cb   : > { %874 = vrot.lane.b32.xlu0 %v872_v15, %s3642_s28 }
 0x93d   : > { %v875_v16 = vpop.permute.xlu0 %874 }
 0x93e   : > { %v877_v17 = vadd.f32 %v3007_v5, %v875_v16 }
 0x940   : > { %3392 = vtanh.f32 %v877_v17 }
 0x94d   : > { %v3393_v18 = vpop.eup %3392 }
 0x94e   : > { %881 = vrot.lane.b32.xlu1 %v3393_v18, %s3641_s27 }
 0x9c0   : > { %v882_v20 = vpop.permute.xlu1 %881 }
 0x9c1   : > { %v884_v22 = vmul.f32 %v882_v20, %v879_v19 }
 0x9c3   : > { %v886_v23 = vadd.f32 %v885_v21, %v884_v22 }
 0x9c5   : > { %v3917_v24 = vpack.c.bf16 %v886_v23, %v886_v23 }
 0x9c7   : > { %900 = vrot.lane.b32.xlu0 %v3917_v24, %s3641_s27 }
 0xa39   : > { %v901_v25 = vpop.permute.xlu0 %900 }
 0xa3a   : > { %3183 = vmatmul.mubr.msk.bf16.vlgmr.msra.gmra.mxu1 %vm398_vm3, %v901_v25  ;;  %v3012_v25 = vunpack.c.h.bf16 %v3034_v55 }
 0xa3b   : > { %3195 = vmatpush3.bf16.msra.mxu1 %v3844_v6  ;;  %3198 = vmatprep.mubr.msk.bf16.mxu1 %vm3640_vm5, %v3639_v7 }
 0xa3c   : > { %3196 = vmatprep.subr.bf16.mxu1 %v3639_v7 }
 0xa3f   : > { %3197 = vmatpush3.bf16.msra.mxu1 %v3851_v9 }
 0xa40   : > { %3210 = vmatprep.subr.bf16.mxu1 %v3639_v7 }
 0xafa   : > { %v939_v26 = vpop.f32.mrf.mxu1 }
 0xafb   : > { %v940_v27 = vadd.f32 %v3727_v4, %v939_v26 }
 0xafc   : > { %v3184_v28 = vpop.f32.mrf.mxu1 }
 0xafd   : > { %954 = vrot.lane.b32.xlu1 %v940_v27, %s3642_s28  ;;  %v946_v32 = vadd.f32 %v3008_v31, %v940_v27 }
 0xafe   : > { %v942_v29 = vpop.f32.mrf.mxu1 }
 0xaff   : > { %v2816_v34 = vmul.f32 -1.442695, %v946_v32 }
 0xb00   : > { %v3185_v30 = vpop.f32.mrf.mxu1 }
 0xb01   : > { %3394 = vpow2.f32 %v2816_v34 }
 0xb0e   : > { %v3395_v35 = vpop.eup %3394 }
 0xb0f   : > { %v950_v36 = vadd.f32 1.0, %v3395_v35 }
 0xb11   : > { %3396 = vrcp.f32 %v950_v36 }
 0xb1e   : > { %v3397_v37 = vpop.eup %3396 }
 0xb1f   : > { %v964_v43 = vsub.f32 1.0, %v3397_v37  ;;  %v970_v45 = vmul.f32 %v3397_v37, %v886_v23 }
 0xb6f   : > { %v955_v38 = vpop.permute.xlu1 %954 }
 0xb70   : > { %v957_v39 = vmul.f32 %v3397_v37, %v955_v38 }
 0xb72   : > { %959 = vrot.lane.b32.xlu0 %v957_v39, %s3642_s28 }
 0xbe4   : > { %v960_v40 = vpop.permute.xlu0 %959 }
 0xbe5   : > { %v962_v41 = vadd.f32 %v3008_v31, %v960_v40 }
 0xbe7   : > { %3398 = vtanh.f32 %v962_v41 }
 0xbf4   : > { %v3399_v42 = vpop.eup %3398 }
 0xbf5   : > { %966 = vrot.lane.b32.xlu1 %v3399_v42, %s3641_s27 }
 0xc67   : > { %v967_v44 = vpop.permute.xlu1 %966 }
 0xc68   : > { %v969_v46 = vmul.f32 %v967_v44, %v964_v43 }
 0xc6a   : > { %v971_v47 = vadd.f32 %v970_v45, %v969_v46  ;;  %v3035_v46 = vld [vmem:[%s3881_s11 + $0x18] sm:$0xff]   ;;  %s983_s11 = scalar_lea.vmem [#allocation2], %s2818_s23 }
 0xc6c   : > { %v3932_v48 = vpack.c.bf16 %v971_v47, %v971_v47 }
 0xc6e   : > { %985 = vrot.lane.b32.xlu0 %v3932_v48, %s3641_s27 }
 0xce0   : > { %v986_v49 = vpop.permute.xlu0 %985 }
 0xce1   : > { %3191 = vmatmul.mubr.msk.bf16.vlgmr.msra.gmra.mxu0 %vm398_vm3, %v986_v49 }
 0xce2   : > { %3203 = vmatpush3.bf16.msra.mxu0 %v3844_v6  ;;  %3206 = vmatprep.mubr.msk.bf16.mxu0 %vm3640_vm5, %v3639_v7 }
 0xce3   : > { %3204 = vmatprep.subr.bf16.mxu0 %v3639_v7 }
 0xce6   : > { %3205 = vmatpush3.bf16.msra.mxu0 %v3851_v9 }
 0xda1   : > { %v1024_v50 = vpop.f32.mrf.mxu0 }
 0xda2   : > { %v1025_v51 = vadd.f32 %v3727_v4, %v1024_v50 }
 0xda3   : > { %v3192_v52 = vpop.f32.mrf.mxu0 }
 0xda4   : > { %1039 = vrot.lane.b32.xlu1 %v1025_v51, %s3642_s28  ;;  %v1031_v58 = vadd.f32 %v3011_v57, %v1025_v51 }
 0xda5   : > { %v1027_v53 = vpop.f32.mrf.mxu0 }
 0xda6   : > { %v2820_v59 = vmul.f32 -1.442695, %v1031_v58 }
 0xda7   : > { %v3193_v54 = vpop.f32.mrf.mxu0 }
 0xda8   : > { %3400 = vpow2.f32 %v2820_v59 }
 0xdb5   : > { %v3401_v60 = vpop.eup %3400 }
 0xdb6   : > { %v1035_v61 = vadd.f32 1.0, %v3401_v60 }
 0xdb8   : > { %3402 = vrcp.f32 %v1035_v61 }
 0xdc5   : > { %v3403_v62 = vpop.eup %3402 }
 0xdc6   : > { %v1049_v12 = vsub.f32 1.0, %v3403_v62  ;;  %v1055_v14 = vmul.f32 %v3403_v62, %v971_v47  ;;  %v3015_v47 = vunpack.c.l.bf16 %v3035_v46 }
 0xe16   : > { %v1040_v63 = vpop.permute.xlu1 %1039 }
 0xe17   : > { %v1042_v5 = vmul.f32 %v3403_v62, %v1040_v63 }
 0xe19   : > { %1044 = vrot.lane.b32.xlu0 %v1042_v5, %s3642_s28 }
 0xe8b   : > { %v1045_v8 = vpop.permute.xlu0 %1044 }
 0xe8c   : > { %v1047_v10 = vadd.f32 %v3011_v57, %v1045_v8 }
 0xe8e   : > { %3404 = vtanh.f32 %v1047_v10 }
 0xe9b   : > { %v3405_v11 = vpop.eup %3404 }
 0xe9c   : > { %1051 = vrot.lane.b32.xlu1 %v3405_v11, %s3641_s27 }
 0xf0e   : > { %v1052_v13 = vpop.permute.xlu1 %1051 }
 0xf0f   : > { %v1054_v15 = vmul.f32 %v1052_v13, %v1049_v12 }
 0xf11   : > { %v1056_v16 = vadd.f32 %v1055_v14, %v1054_v15 }
 0xf13   : > { %v3947_v17 = vpack.c.bf16 %v1056_v16, %v1056_v16 }
 0xf15   : > { %1070 = vrot.lane.b32.xlu0 %v3947_v17, %s3641_s27 }
 0xf87   : > { %v1071_v18 = vpop.permute.xlu0 %1070 }
 0xf88   : > { %3199 = vmatmul.mubr.msk.bf16.vlgmr.msra.gmra.mxu1 %vm398_vm3, %v1071_v18 }
 0xf89   : > { %3211 = vmatpush3.bf16.msra.mxu1 %v3844_v6  ;;  %3214 = vmatprep.mubr.msk.bf16.mxu1 %vm3640_vm5, %v3639_v7 }
 0xf8a   : > { %3212 = vmatprep.subr.bf16.mxu1 %v3639_v7 }
 0xf8d   : > { %3213 = vmatpush3.bf16.msra.mxu1 %v3851_v9 }
0x1048   : > { %v1109_v19 = vpop.f32.mrf.mxu1 }
0x1049   : > { %v1110_v20 = vadd.f32 %v3727_v4, %v1109_v19 }
0x104a   : > { %v3200_v21 = vpop.f32.mrf.mxu1 }
0x104b   : > { %1124 = vrot.lane.b32.xlu1 %v1110_v20, %s3642_s28  ;;  %v1116_v26 = vadd.f32 %v3012_v25, %v1110_v20 }
0x104c   : > { %v1112_v22 = vpop.f32.mrf.mxu1 }
0x104d   : > { %v2824_v27 = vmul.f32 -1.442695, %v1116_v26 }
0x104e   : > { %v3201_v23 = vpop.f32.mrf.mxu1 }
0x104f   : > { %3406 = vpow2.f32 %v2824_v27 }
0x105c   : > { %v3407_v6 = vpop.eup %3406 }
0x105d   : > { %v1120_v28 = vadd.f32 1.0, %v3407_v6 }
0x105f   : > { %3408 = vrcp.f32 %v1120_v28 }
0x106c   : > { %v3409_v29 = vpop.eup %3408 }
0x106d   : > { %v1134_v34 = vsub.f32 1.0, %v3409_v29  ;;  %v1140_v36 = vmul.f32 %v3409_v29, %v1056_v16  ;;  %v3016_v16 = vunpack.c.h.bf16 %v3035_v46 }
0x10bd   : > { %v1125_v30 = vpop.permute.xlu1 %1124 }
0x10be   : > { %v1127_v7 = vmul.f32 %v3409_v29, %v1125_v30 }
0x10c0   : > { %1129 = vrot.lane.b32.xlu0 %v1127_v7, %s3642_s28 }
0x1132   : > { %v1130_v9 = vpop.permute.xlu0 %1129 }
0x1133   : > { %v1132_v31 = vadd.f32 %v3012_v25, %v1130_v9 }
0x1135   : > { %3410 = vtanh.f32 %v1132_v31 }
0x1142   : > { %v3411_v32 = vpop.eup %3410 }
0x1143   : > { %1136 = vrot.lane.b32.xlu1 %v3411_v32, %s3641_s27 }
0x11b5   : > { %v1137_v35 = vpop.permute.xlu1 %1136 }
0x11b6   : > { %v1139_v37 = vmul.f32 %v1137_v35, %v1134_v34  ;;  %v3424_v35 = vld [vmem:[%s4301_s3 + $0x18] sm:$0xff] (%p608_p5)  }
0x11b7   :  { %3218 = vmatprep.subr.bf16.mxu0 (%p608_p5), %v3424_v35  ;;  %3302 = vmatprep.subr.bf16.mxu1 (%p608_p5), %v3424_v35 }
0x11b8   : > { %v1141_v38 = vadd.f32 %v1140_v36, %v1139_v37  ;;  %v3425_v36 = vld [vmem:[%s4301_s3 + $0x10] sm:$0xff] (%p608_p5)  }
0x11ba   : > { %v3961_v39 = vpack.c.bf16 %v1141_v38, %v1141_v38 }
0x11bc   : > { %1155 = vrot.lane.b32.xlu0 %v3961_v39, %s3641_s27 }
0x122e   : > { %v1156_v40 = vpop.permute.xlu0 %1155 }
0x122f   : > { %3207 = vmatmul.mubr.msk.bf16.vlgmr.msra.gmra.mxu0 %vm398_vm3, %v1156_v40  ;;  %v4029_v40 = vld [vmem:[%s4302_s4 + $0x10] sm:$0xf] (%p608_p5) }
0x1230   :  { %3219 = vmatpush3.bf16.msra.mxu0 (%p608_p5), %v3424_v35 }
0x1231   :  { %3220 = vmatprep.subr.bf16.mxu0 (%p608_p5), %v3425_v36 }
0x1234   :  { %3221 = vmatpush3.bf16.msra.mxu0 (%p608_p5), %v3425_v36 }
0x12ef   : > { %v1194_v41 = vpop.f32.mrf.mxu0 }
0x12f0   : > { %v1195_v42 = vadd.f32 %v3727_v4, %v1194_v41  ;;  %v4034_v41 = vld [vmem:[%s4302_s4 + $0x14] sm:$0xf] (%p608_p5) }
0x12f1   : > { %v3208_v43 = vpop.f32.mrf.mxu0 }
0x12f2   : > { %1209 = vrot.lane.b32.xlu1 %v1195_v42, %s3642_s28  ;;  %v1201_v49 = vadd.f32 %v3015_v47, %v1195_v42  ;;  %v4039_v42 = vld [vmem:[%s4302_s4 + $0x18] sm:$0xf] (%p608_p5)  ;;  %v4044_v43 = vld [vmem:[%s4302_s4 + $0x1c] sm:$0xf] (%p608_p5)  ;;  %s4072_s4 = smov (%p608_p5), 0  }
0x12f3   : > { %v1197_v44 = vpop.f32.mrf.mxu0 }
0x12f4   : > { %v2828_v50 = vmul.f32 -1.442695, %v1201_v49  ;;  %v4049_v44 = vld [vmem:[%s4304_s6 + $0x1] ss:$0 sm:$0xff] (%p608_p5) }
0x12f5   : > { %v3209_v45 = vpop.f32.mrf.mxu0 }
0x12f6   : > { %3412 = vpow2.f32 %v2828_v50  ;;  %v2840_v45 = vld [vmem:[%s4303_s5 + $0x1] ss:$0 sm:$0xff] (%p608_p5) }
0x1303   : > { %v3413_v51 = vpop.eup %3412 }
0x1304   : > { %v1205_v52 = vadd.f32 1.0, %v3413_v51 }
0x1306   : > { %3414 = vrcp.f32 %v1205_v52 }
0x1313   : > { %v3415_v53 = vpop.eup %3414 }
0x1314   : > { %v1219_v60 = vsub.f32 1.0, %v3415_v53  ;;  %v1225_v62 = vmul.f32 %v3415_v53, %v1141_v38 }
0x1364   : > { %v1210_v54 = vpop.permute.xlu1 %1209 }
0x1365   : > { %v1212_v55 = vmul.f32 %v3415_v53, %v1210_v54 }
0x1367   : > { %1214 = vrot.lane.b32.xlu0 %v1212_v55, %s3642_s28 }
0x13d9   : > { %v1215_v57 = vpop.permute.xlu0 %1214 }
0x13da   : > { %v1217_v58 = vadd.f32 %v3015_v47, %v1215_v57 }
0x13dc   : > { %3416 = vtanh.f32 %v1217_v58 }
0x13e9   : > { %v3417_v59 = vpop.eup %3416 }
0x13ea   : > { %1221 = vrot.lane.b32.xlu1 %v3417_v59, %s3641_s27 }
0x145c   : > { %v1222_v61 = vpop.permute.xlu1 %1221 }
0x145d   : > { %v1224_v63 = vmul.f32 %v1222_v61, %v1219_v60 }
0x145f   : > { %v1226_v5 = vadd.f32 %v1225_v62, %v1224_v63 }
0x1461   : > { %v1228_v8 = vpack.c.bf16 %v1226_v5, %v1226_v5 }
0x1463   : > { %1240 = vrot.lane.b32.xlu0 %v1228_v8, %s3641_s27 }
0x14d5   : > { %v1241_v10 = vpop.permute.xlu0 %1240 }
0x14d6   : > { %3215 = vmatmul.mubr.msk.bf16.vlgmr.msra.gmra.mxu1 %vm398_vm3, %v1241_v10 }
0x14d7   :  { %3304 = vmatpush3.bf16.msra.mxu1 (%p608_p5), %v3424_v35  ;;  %v4070_v35 = vmov (%p608_p5), 0.0  }
0x14d8   :  { %3303 = vmatprep.subr.bf16.mxu1 (%p608_p5), %v3425_v36 }
0x14db   :  { %3305 = vmatpush3.bf16.msra.mxu1 (%p608_p5), %v3425_v36 }
0x1596   : > { %v1279_v11 = vpop.f32.mrf.mxu1 }
0x1597   : > { %v1280_v12 = vadd.f32 %v3727_v4, %v1279_v11 }
0x1598   : > { %v3216_v13 = vpop.f32.mrf.mxu1 }
0x1599   : > { %1294 = vrot.lane.b32.xlu1 %v1280_v12, %s3642_s28  ;;  %v1286_v18 = vadd.f32 %v3016_v16, %v1280_v12 }
0x159a   : > { %v1282_v14 = vpop.f32.mrf.mxu1 }
0x159b   : > { %v2832_v19 = vmul.f32 -1.442695, %v1286_v18 }
0x159c   : > { %v3217_v15 = vpop.f32.mrf.mxu1 }
0x159d   : > { %3418 = vpow2.f32 %v2832_v19 }
0x15aa   : > { %v3419_v20 = vpop.eup %3418 }
0x15ab   : > { %v1290_v21 = vadd.f32 1.0, %v3419_v20 }
0x15ad   : > { %3420 = vrcp.f32 %v1290_v21 }
0x15ba   : > { %v3421_v22 = vpop.eup %3420 }
0x160b   : > { %v1295_v23 = vpop.permute.xlu1 %1294 }
0x160c   : > { %v1297_v25 = vmul.f32 %v3421_v22, %v1295_v23 }
0x160e   : > { %1299 = vrot.lane.b32.xlu0 %v1297_v25, %s3642_s28  ;;  %s898_s28 = scalar_lea.vmem [#allocation2], %s2814_s19 }
0x1612   : > { %722 = vrot.lane.b32.xlu0 %v3886_v33, %s3641_s27  ;;  %v1304_v33 = vsub.f32 1.0, %v3421_v22 }
0x1616   : > { %892 = vrot.lane.b32.xlu0 %v3917_v24, %s3641_s27 }
0x161a   : > { %1062 = vrot.lane.b32.xlu0 %v3947_v17, %s3641_s27  ;;  %v1310_v17 = vmul.f32 %v3421_v22, %v1226_v5 }
0x161e   : > { %1232 = vrot.lane.b32.xlu0 %v1228_v8, %s3641_s27 }
0x1680   : > { %v1300_v26 = vpop.permute.xlu0 %1299 }
0x1681   : > { %v1302_v27 = vadd.f32 %v3016_v16, %v1300_v26 }
0x1683   : > { %3422 = vtanh.f32 %v1302_v27 }
0x1684   : > { %v723_v6 = vpop.permute.xlu0 %722 }
0x1685   : > { %729 = vst.msk [vmem:[%s728_s1] sm:$0xf] %vm302_vm2, %v723_v6  ;;  %s1068_s1 = scalar_lea.vmem [#allocation2], %s2822_s24 }
0x1690   : > { %v3423_v28 = vpop.eup %3422 }
0x1691   : > { %1306 = vrot.lane.b32.xlu1 %v3423_v28, %s3641_s27 }
0x1695   : > { %807 = vrot.lane.b32.xlu1 %v3901_v56, %s3641_s27  ;;  %v893_v56 = vpop.permute.xlu0 %892 }
0x1699   : > { %977 = vrot.lane.b32.xlu1 %v3932_v48, %s3641_s27  ;;  %v1063_v7 = vpop.permute.xlu0 %1062 }
0x169d   : > { %1147 = vrot.lane.b32.xlu1 %v3961_v39, %s3641_s27  ;;  %v1233_v32 = vpop.permute.xlu0 %1232 }
0x1703   : > { %v1307_v24 = vpop.permute.xlu1 %1306 }
0x1704   : > { %v1309_v29 = vmul.f32 %v1307_v24, %v1304_v33 }
0x1706   : > { %v1311_v5 = vadd.f32 %v1310_v17, %v1309_v29  }
0x1707   : > { %v808_v48 = vpop.permute.xlu1 %807 }
0x1708   : > { %v2976_v30 = vpack.c.bf16 %v1311_v5, %v1311_v5  ;;  %814 = vst.msk [vmem:[%s813_s2] sm:$0xf] %vm302_vm2, %v808_v48 }
0x1709   : > { %899 = vst.msk [vmem:[%s898_s28] sm:$0xf] %vm302_vm2, %v893_v56 }
0x170a   : > { %1317 = vrot.lane.b32.xlu1 %v2976_v30, %s3641_s27  ;;  %s2834_s27 = sshll.u32 %s1320_s15, 2 }
0x170b   : > { %v978_v9 = vpop.permute.xlu1 %977  ;;  %s1323_s16 = scalar_lea.vmem [#allocation2], %s2834_s27 }
0x170c   : > { %984 = vst.msk [vmem:[%s983_s11] sm:$0xf] %vm302_vm2, %v978_v9 }
0x170d   : > { %1069 = vst.msk [vmem:[%s1068_s1] sm:$0xf] %vm302_vm2, %v1063_v7 }
0x170f   : > { %v1148_v31 = vpop.permute.xlu1 %1147 }
0x1710   : > { %1154 = vst.msk [vmem:[%s1153_s12] sm:$0xf] %vm302_vm2, %v1148_v31 }
0x1711   : > { %1239 = vst.msk [vmem:[%s1238_s13] sm:$0xf] %vm302_vm2, %v1233_v32 }
0x1779   :  { %610 = sbr.rel (!%p608_p5) target bundleno = 462 (0x1ce), region = 97 }
0x177c   : > { %v1318_v34 = vpop.permute.xlu1 %1317 }
0x177d   : > { %1324 = vst.msk [vmem:[%s1323_s16] sm:$0xf] %vm302_vm2, %v1318_v34 }
0x1784   :  { %v3426_v37 = vld [vmem:[#allocation2] sm:$0xff]   ;;  %v3428_v39 = vld [vmem:[#allocation2 + $0x8] sm:$0xff]   ;;  %v3430_v1 = vld [vmem:[#allocation2 + $0x10] sm:$0xff]  }
0x1785   :  { %v3427_v38 = vld [vmem:[#allocation2 + $0x20] sm:$0xff]   ;;  %3222 = vmatprep.mubr.msk.bf16.mxu0 %vm398_vm3, %v3426_v37  ;;  %v3429_v0 = vld [vmem:[#allocation2 + $0x28] sm:$0xff]   ;;  %v3431_v2 = vld [vmem:[#allocation2 + $0x30] sm:$0xff]  }
0x1786   :  { %3230 = vmatprep.mubr.msk.bf16.mxu1 %vm398_vm3, %v3427_v38  ;;  %3223 = vmatmul.mubr.msk.bf16.vlgmr.msra.gmra.mxu0 %vm398_vm3, %v3428_v39  ;;  %v3432_v3 = vld [vmem:[#allocation2 + $0x18] sm:$0xff]  }
0x1787   :  { %3231 = vmatmul.mubr.msk.bf16.vlgmr.msra.gmra.mxu1 %vm398_vm3, %v3429_v0  ;;  %3226 = vmatprep.mubr.msk.bf16.mxu0 %vm398_vm3, %v3430_v1  ;;  %v3433_v4 = vld [vmem:[#allocation2 + $0x38] sm:$0xff]  }
0x1788   :  { %3234 = vmatprep.mubr.msk.bf16.mxu1 %vm398_vm3, %v3431_v2 }
0x178e   :  { %3227 = vmatmul.mubr.msk.bf16.gmra.mxu0 %vm398_vm3, %v3432_v3 }
0x178f   :  { %3235 = vmatmul.mubr.msk.bf16.gmra.mxu1 %vm398_vm3, %v3433_v4 }
0x1846   :  { %v3224_v46 = vpop.f32.mrf.mxu0 }
0x1847   :  { %v3232_v47 = vpop.f32.mrf.mxu1  ;;  %v1473_v49 = vadd.f32 %v3224_v46, %v2840_v45 }
0x1848   :  { %v1505_v50 = vadd.f32 %v3232_v47, %v2840_v45  ;;  %v1464_v51 = vpop.f32.mrf.mxu0 }
0x1849   :  { %v1496_v52 = vpop.f32.mrf.mxu1  ;;  %v2979_v53 = vpack.c.bf16 %v1473_v49, %v1473_v49  ;;  %v1465_v55 = vadd.f32 %v2840_v45, %v1464_v51 }
0x184a   :  { %v2987_v54 = vpack.c.bf16 %v1505_v50, %v1505_v50  ;;  %v1497_v57 = vadd.f32 %v2840_v45, %v1496_v52  ;;  %v3225_v58 = vpop.f32.mrf.mxu0 }
0x184b   :  { %v3233_v59 = vpop.f32.mrf.mxu1  ;;  %1593 = vst.msk [vmem:[#allocation3 + $0x8] sm:$0xf] %vm584_vm4, %v2979_v53  ;;  %v2977_v60 = vpack.c.bf16 %v1465_v55, %v1465_v55  ;;  %v1476_v62 = vadd.f32 %v3225_v58, %v2840_v45 }
0x184c   :  { %1601 = vst.msk [vmem:[#allocation3 + $0x28] sm:$0xf] %vm584_vm4, %v2987_v54  ;;  %v2985_v61 = vpack.c.bf16 %v1497_v57, %v1497_v57  ;;  %v1508_v63 = vadd.f32 %v3233_v59, %v2840_v45  ;;  %v1467_v5 = vpop.f32.mrf.mxu0 }
0x184d   :  { %v1499_v8 = vpop.f32.mrf.mxu1  ;;  %1591 = vst.msk [vmem:[#allocation3] sm:$0xf] %vm584_vm4, %v2977_v60  ;;  %v2980_v10 = vpack.c.bf16 %v1476_v62, %v1476_v62  ;;  %v1468_v12 = vadd.f32 %v2840_v45, %v1467_v5 }
0x184e   :  { %1599 = vst.msk [vmem:[#allocation3 + $0x20] sm:$0xf] %vm584_vm4, %v2985_v61  ;;  %v2988_v11 = vpack.c.bf16 %v1508_v63, %v1508_v63  ;;  %v1500_v13 = vadd.f32 %v2840_v45, %v1499_v8  ;;  %v3228_v14 = vpop.f32.mrf.mxu0 }
0x184f   :  { %v3236_v15 = vpop.f32.mrf.mxu1  ;;  %1594 = vst.msk [vmem:[#allocation3 + $0xc] sm:$0xf] %vm584_vm4, %v2980_v10  ;;  %v2978_v16 = vpack.c.bf16 %v1468_v12, %v1468_v12  ;;  %v1489_v19 = vadd.f32 %v3228_v14, %v2840_v45 }
0x1850   :  { %1602 = vst.msk [vmem:[#allocation3 + $0x2c] sm:$0xf] %vm584_vm4, %v2988_v11  ;;  %v2986_v18 = vpack.c.bf16 %v1500_v13, %v1500_v13  ;;  %v1521_v20 = vadd.f32 %v3236_v15, %v2840_v45  ;;  %v1480_v21 = vpop.f32.mrf.mxu0 }
0x1851   :  { %v1512_v22 = vpop.f32.mrf.mxu1  ;;  %1592 = vst.msk [vmem:[#allocation3 + $0x4] sm:$0xf] %vm584_vm4, %v2978_v16  ;;  %v2983_v23 = vpack.c.bf16 %v1489_v19, %v1489_v19  ;;  %v1481_v26 = vadd.f32 %v2840_v45, %v1480_v21 }
0x1852   :  { %1600 = vst.msk [vmem:[#allocation3 + $0x24] sm:$0xf] %vm584_vm4, %v2986_v18  ;;  %v2991_v25 = vpack.c.bf16 %v1521_v20, %v1521_v20  ;;  %v1513_v27 = vadd.f32 %v2840_v45, %v1512_v22  ;;  %v3229_v6 = vpop.f32.mrf.mxu0 }
0x1853   :  { %v3237_v28 = vpop.f32.mrf.mxu1  ;;  %1597 = vst.msk [vmem:[#allocation3 + $0x18] sm:$0xf] %vm584_vm4, %v2983_v23  ;;  %v2981_v33 = vpack.c.bf16 %v1481_v26, %v1481_v26  ;;  %v1492_v56 = vadd.f32 %v3229_v6, %v2840_v45 }
0x1854   :  { %1605 = vst.msk [vmem:[#allocation3 + $0x38] sm:$0xf] %vm584_vm4, %v2991_v25  ;;  %v2989_v24 = vpack.c.bf16 %v1513_v27, %v1513_v27  ;;  %v1524_v17 = vadd.f32 %v3237_v28, %v2840_v45  ;;  %v1483_v29 = vpop.f32.mrf.mxu0 }
0x1855   :  { %v1515_v48 = vpop.f32.mrf.mxu1  ;;  %1595 = vst.msk [vmem:[#allocation3 + $0x10] sm:$0xf] %vm584_vm4, %v2981_v33  ;;  %v2984_v30 = vpack.c.bf16 %v1492_v56, %v1492_v56  ;;  %v1484_v9 = vadd.f32 %v2840_v45, %v1483_v29 }
0x1856   :  { %1603 = vst.msk [vmem:[#allocation3 + $0x30] sm:$0xf] %vm584_vm4, %v2989_v24  ;;  %v2992_v7 = vpack.c.bf16 %v1524_v17, %v1524_v17  ;;  %v1516_v31 = vadd.f32 %v2840_v45, %v1515_v48 }
0x1857   :  { %1598 = vst.msk [vmem:[#allocation3 + $0x1c] sm:$0xf] %vm584_vm4, %v2984_v30  ;;  %v2982_v32 = vpack.c.bf16 %v1484_v9, %v1484_v9 }
0x1858   :  { %1606 = vst.msk [vmem:[#allocation3 + $0x3c] sm:$0xf] %vm584_vm4, %v2992_v7  ;;  %v2990_v34 = vpack.c.bf16 %v1516_v31, %v1516_v31 }
0x1859   :  { %1596 = vst.msk [vmem:[#allocation3 + $0x14] sm:$0xf] %vm584_vm4, %v2982_v32 }
0x185a   :  { %1604 = vst.msk [vmem:[#allocation3 + $0x34] sm:$0xf] %vm584_vm4, %v2990_v34 }
0x185b LB: > { %v4080_v36 = vcombine.low %v4039_v42, %v4044_v43  ;;  %v3643_v37 = vmov 0.0   ;;  %v1634_v38 = vpack.c.bf16 %v3630_v35, %v3630_v35  ;;  %v4087_v39 = vcombine.low %v4029_v40, %v4034_v41  ;;  %s3645_s5 = smov 96   ;;  %s3646_s6 = smov 64   ;;  %s3634_s4 = sphi %s4072_s4, %s1619_s4   ;;  %v3630_v35 = vphi %v4070_v35, %v2319_v35  }
0x185c   : > { %3238 = vmatprep.subr.bf16.mxu0 %v3643_v37  ;;  %3246 = vmatprep.subr.bf16.mxu1 %v3643_v37  ;;  %vm3644_vm6 = vmmov 0   ;;  %s4111_s30 = sshll.u32 %s3634_s4, 6  ;;  %s1619_s4 = sadd.s32 1, %s3634_s4  }
0x185d   : > { %3239 = vmatpush3.bf16.msra.mxu0 %v4080_v36  ;;  %3242 = vmatprep.mubr.msk.bf16.mxu0 %vm3644_vm6, %v3643_v37  ;;  %s1622_s10 = sshra.s32 %s4111_s30, 3  ;;  %s1810_s13 = sadd.s32 8, %s4111_s30 }
0x185e   : > { %3240 = vmatprep.subr.bf16.mxu0 %v3643_v37  ;;  %3247 = vmatpush3.bf16.msra.mxu1 %v4080_v36  ;;  %s4114_s11 = sshll.u32 %s1622_s10, 2  ;;  %s1895_s14 = sadd.s32 16, %s4111_s30 }
0x185f   : > { %1642 = vrot.lane.b32.xlu0 %v1634_v38, %s3645_s5  ;;  %3248 = vmatprep.subr.bf16.mxu1 %v3643_v37  ;;  %s4117_s1 = scalar_lea.vmem [#allocation3], %s4114_s11  ;;  %s1736_s12 = scalar_lea.vmem [#allocation2], %s4114_s11 }
0x1860   : > { %3250 = vmatprep.mubr.msk.bf16.mxu1 %vm3644_vm6, %v3643_v37  ;;  %s1818_s15 = sshra.s32 %s1810_s13, 3  ;;  %s1903_s27 = sshra.s32 %s1895_s14, 3 }
0x1861   : > { %3241 = vmatpush3.bf16.msra.mxu0 %v4087_v39  ;;  %v3018_v46 = vld [vmem:[%s4117_s1] sm:$0xff]   ;;  %v3036_v34 = vld [vmem:[%s4117_s1 + $0x8] sm:$0xff]   ;;  %s1980_s16 = sadd.s32 24, %s4111_s30  ;;  %s2065_s17 = sadd.s32 32, %s4111_s30 }
0x1862   : > { %3249 = vmatpush3.bf16.msra.mxu1 %v4087_v39  ;;  %3254 = vmatprep.subr.bf16.mxu0 %v3643_v37  ;;  %v3019_v47 = vunpack.c.l.bf16 %v3018_v46  ;;  %v3020_v16 = vunpack.c.h.bf16 %v3018_v46  ;;  %s2892_s18 = sshll.u32 %s1818_s15, 2  ;;  %s2896_s19 = sshll.u32 %s1903_s27, 2 }
0x1863   : > { %3262 = vmatprep.subr.bf16.mxu1 %v3643_v37  ;;  %s1988_s29 = sshra.s32 %s1980_s16, 3  ;;  %s2073_s3 = sshra.s32 %s2065_s17, 3 }
0x1864   : > { %s2150_s26 = sadd.s32 40, %s4111_s30  ;;  %s2235_s20 = sadd.s32 48, %s4111_s30 }
0x1865   : > { %s2900_s21 = sshll.u32 %s1988_s29, 2  ;;  %s2904_s7 = sshll.u32 %s2073_s3, 2 }
0x1866   : > { %s2158_s22 = sshra.s32 %s2150_s26, 3  ;;  %s2243_s23 = sshra.s32 %s2235_s20, 3 }
0x1867   : > { %s1821_s24 = scalar_lea.vmem [#allocation2], %s2892_s18  ;;  %s1906_s25 = scalar_lea.vmem [#allocation2], %s2896_s19 }
0x1868   : > { %s2908_s0 = sshll.u32 %s2158_s22, 2  ;;  %s2912_s2 = sshll.u32 %s2243_s23, 2 }
0x1869   : > { %s1991_s28 = scalar_lea.vmem [#allocation2], %s2900_s21  ;;  %s2161_s10 = scalar_lea.vmem [#allocation2], %s2908_s0 }
0x186a   : > { %s2246_s11 = scalar_lea.vmem [#allocation2], %s2912_s2  ;;  %p1616_p6 = scmp.ge.s32.totalorder %s1619_s4, 2  }
0x18d1   : > { %v1643_v0 = vpop.permute.xlu0 %1642 }
0x18d2   : > { %3243 = vmatmul.mubr.msk.bf16.vlgmr.msra.gmra.mxu0 %vm398_vm3, %v1643_v0 }
0x18d3   : > { %3255 = vmatpush3.bf16.msra.mxu0 %v4080_v36  ;;  %3258 = vmatprep.mubr.msk.bf16.mxu0 %vm3644_vm6, %v3643_v37 }
0x18d4   : > { %3256 = vmatprep.subr.bf16.mxu0 %v3643_v37 }
0x18d7   : > { %3257 = vmatpush3.bf16.msra.mxu0 %v4087_v39 }
0x18d8   : > { %3270 = vmatprep.subr.bf16.mxu0 %v3643_v37 }
0x1992   : > { %v1693_v1 = vpop.f32.mrf.mxu0 }
0x1993   : > { %v1694_v2 = vadd.f32 %v4049_v44, %v1693_v1 }
0x1994   : > { %v3244_v3 = vpop.f32.mrf.mxu0 }
0x1995   : > { %1708 = vrot.lane.b32.xlu0 %v1694_v2, %s3646_s6  ;;  %v1700_v49 = vadd.f32 %v3019_v47, %v1694_v2 }
0x1996   : > { %v1696_v4 = vpop.f32.mrf.mxu0 }
0x1997   : > { %v2886_v50 = vmul.f32 -1.442695, %v1700_v49 }
0x1998   : > { %v3245_v45 = vpop.f32.mrf.mxu0 }
0x1999   : > { %3434 = vpow2.f32 %v2886_v50 }
0x19a6   : > { %v3435_v51 = vpop.eup %3434 }
0x19a7   : > { %v1704_v52 = vadd.f32 1.0, %v3435_v51 }
0x19a9   : > { %3436 = vrcp.f32 %v1704_v52 }
0x19b6   : > { %v3437_v53 = vpop.eup %3436 }
0x19b7   : > { %v1718_v60 = vsub.f32 1.0, %v3437_v53  ;;  %v1724_v62 = vmul.f32 %v3630_v35, %v3437_v53  ;;  %v3023_v35 = vunpack.c.l.bf16 %v3036_v34 }
0x1a07   : > { %v1709_v54 = vpop.permute.xlu0 %1708 }
0x1a08   : > { %v1711_v55 = vmul.f32 %v3437_v53, %v1709_v54 }
0x1a0a   : > { %1713 = vrot.lane.b32.xlu1 %v1711_v55, %s3646_s6 }
0x1a7c   : > { %v1714_v57 = vpop.permute.xlu1 %1713 }
0x1a7d   : > { %v1716_v58 = vadd.f32 %v3019_v47, %v1714_v57 }
0x1a7f   : > { %3438 = vtanh.f32 %v1716_v58 }
0x1a8c   : > { %v3439_v59 = vpop.eup %3438 }
0x1a8d   : > { %1720 = vrot.lane.b32.xlu1 %v3439_v59, %s3645_s5 }
0x1aff   : > { %v1721_v61 = vpop.permute.xlu1 %1720 }
0x1b00   : > { %v1723_v63 = vmul.f32 %v1721_v61, %v1718_v60 }
0x1b02   : > { %v1725_v5 = vadd.f32 %v1724_v62, %v1723_v63  ;;  %v3024_v63 = vunpack.c.h.bf16 %v3036_v34 }
0x1b04   : > { %v4122_v8 = vpack.c.bf16 %v1725_v5, %v1725_v5 }
0x1b06   : > { %1738 = vrot.lane.b32.xlu0 %v4122_v8, %s3645_s5 }
0x1b78   : > { %v1739_v10 = vpop.permute.xlu0 %1738 }
0x1b79   : > { %3251 = vmatmul.mubr.msk.bf16.vlgmr.msra.gmra.mxu1 %vm398_vm3, %v1739_v10 }
0x1b7a   : > { %3263 = vmatpush3.bf16.msra.mxu1 %v4080_v36  ;;  %3266 = vmatprep.mubr.msk.bf16.mxu1 %vm3644_vm6, %v3643_v37 }
0x1b7b   : > { %3264 = vmatprep.subr.bf16.mxu1 %v3643_v37 }
0x1b7e   : > { %3265 = vmatpush3.bf16.msra.mxu1 %v4087_v39 }
0x1b7f   : > { %3278 = vmatprep.subr.bf16.mxu1 %v3643_v37 }
0x1c39   : > { %v1777_v11 = vpop.f32.mrf.mxu1 }
0x1c3a   : > { %v1778_v12 = vadd.f32 %v4049_v44, %v1777_v11 }
0x1c3b   : > { %v3252_v13 = vpop.f32.mrf.mxu1 }
0x1c3c   : > { %1792 = vrot.lane.b32.xlu1 %v1778_v12, %s3646_s6  ;;  %v1784_v18 = vadd.f32 %v3020_v16, %v1778_v12 }
0x1c3d   : > { %v1780_v14 = vpop.f32.mrf.mxu1 }
0x1c3e   : > { %v2890_v19 = vmul.f32 -1.442695, %v1784_v18 }
0x1c3f   : > { %v3253_v15 = vpop.f32.mrf.mxu1 }
0x1c40   : > { %3440 = vpow2.f32 %v2890_v19 }
0x1c4d   : > { %v3441_v20 = vpop.eup %3440 }
0x1c4e   : > { %v1788_v21 = vadd.f32 1.0, %v3441_v20 }
0x1c50   : > { %3442 = vrcp.f32 %v1788_v21 }
0x1c5d   : > { %v3443_v22 = vpop.eup %3442 }
0x1c5e   : > { %v1802_v28 = vsub.f32 1.0, %v3443_v22  ;;  %v1808_v24 = vmul.f32 %v3443_v22, %v1725_v5 }
0x1cae   : > { %v1793_v23 = vpop.permute.xlu1 %1792 }
0x1caf   : > { %v1795_v25 = vmul.f32 %v3443_v22, %v1793_v23 }
0x1cb1   : > { %1797 = vrot.lane.b32.xlu0 %v1795_v25, %s3646_s6 }
0x1d23   : > { %v1798_v26 = vpop.permute.xlu0 %1797 }
0x1d24   : > { %v1800_v27 = vadd.f32 %v3020_v16, %v1798_v26 }
0x1d26   : > { %3444 = vtanh.f32 %v1800_v27 }
0x1d33   : > { %v3445_v6 = vpop.eup %3444 }
0x1d34   : > { %1804 = vrot.lane.b32.xlu1 %v3445_v6, %s3645_s5 }
0x1da6   : > { %v1805_v33 = vpop.permute.xlu1 %1804 }
0x1da7   : > { %v1807_v56 = vmul.f32 %v1805_v33, %v1802_v28 }
0x1da9   : > { %v1809_v17 = vadd.f32 %v1808_v24, %v1807_v56 }
0x1dab   : > { %v4137_v29 = vpack.c.bf16 %v1809_v17, %v1809_v17 }
0x1dad   : > { %1823 = vrot.lane.b32.xlu0 %v4137_v29, %s3645_s5 }
0x1e1f   : > { %v1824_v48 = vpop.permute.xlu0 %1823 }
0x1e20   : > { %3259 = vmatmul.mubr.msk.bf16.vlgmr.msra.gmra.mxu0 %vm398_vm3, %v1824_v48 }
0x1e21   : > { %3271 = vmatpush3.bf16.msra.mxu0 %v4080_v36  ;;  %3274 = vmatprep.mubr.msk.bf16.mxu0 %vm3644_vm6, %v3643_v37 }
0x1e22   : > { %3272 = vmatprep.subr.bf16.mxu0 %v3643_v37 }
0x1e25   : > { %3273 = vmatpush3.bf16.msra.mxu0 %v4087_v39 }
0x1e26   : > { %3286 = vmatprep.subr.bf16.mxu0 %v3643_v37 }
0x1ee0   : > { %v1862_v30 = vpop.f32.mrf.mxu0 }
0x1ee1   : > { %v1863_v7 = vadd.f32 %v4049_v44, %v1862_v30 }
0x1ee2   : > { %v3260_v9 = vpop.f32.mrf.mxu0 }
0x1ee3   : > { %1877 = vrot.lane.b32.xlu1 %v1863_v7, %s3646_s6  ;;  %v1869_v38 = vadd.f32 %v3023_v35, %v1863_v7 }
0x1ee4   : > { %v1865_v31 = vpop.f32.mrf.mxu0 }
0x1ee5   : > { %v2894_v0 = vmul.f32 -1.442695, %v1869_v38 }
0x1ee6   : > { %v3261_v32 = vpop.f32.mrf.mxu0 }
0x1ee7   : > { %3446 = vpow2.f32 %v2894_v0 }
0x1ef4   : > { %v3447_v1 = vpop.eup %3446 }
0x1ef5   : > { %v1873_v2 = vadd.f32 1.0, %v3447_v1 }
0x1ef7   : > { %3448 = vrcp.f32 %v1873_v2 }
0x1f04   : > { %v3449_v3 = vpop.eup %3448 }
0x1f05   : > { %v1887_v50 = vsub.f32 1.0, %v3449_v3  ;;  %v1893_v52 = vmul.f32 %v3449_v3, %v1809_v17  ;;  %v3037_v17 = vld [vmem:[%s4117_s1 + $0x10] sm:$0xff]  }
0x1f06   : > { %v3027_v48 = vunpack.c.l.bf16 %v3037_v17 }
0x1f55   : > { %v1878_v4 = vpop.permute.xlu1 %1877 }
0x1f56   : > { %v1880_v45 = vmul.f32 %v3449_v3, %v1878_v4 }
0x1f58   : > { %1882 = vrot.lane.b32.xlu0 %v1880_v45, %s3646_s6 }
0x1fca   : > { %v1883_v46 = vpop.permute.xlu0 %1882 }
0x1fcb   : > { %v1885_v47 = vadd.f32 %v3023_v35, %v1883_v46 }
0x1fcd   : > { %3450 = vtanh.f32 %v1885_v47 }
0x1fda   : > { %v3451_v49 = vpop.eup %3450 }
0x1fdb   : > { %1889 = vrot.lane.b32.xlu1 %v3451_v49, %s3645_s5 }
0x204d   : > { %v1890_v51 = vpop.permute.xlu1 %1889 }
0x204e   : > { %v1892_v53 = vmul.f32 %v1890_v51, %v1887_v50 }
0x2050   : > { %v1894_v54 = vadd.f32 %v1893_v52, %v1892_v53 }
0x2052   : > { %v4153_v55 = vpack.c.bf16 %v1894_v54, %v1894_v54 }
0x2054   : > { %1908 = vrot.lane.b32.xlu0 %v4153_v55, %s3645_s5 }
0x20c6   : > { %v1909_v57 = vpop.permute.xlu0 %1908 }
0x20c7   : > { %3267 = vmatmul.mubr.msk.bf16.vlgmr.msra.gmra.mxu1 %vm398_vm3, %v1909_v57  ;;  %v3028_v57 = vunpack.c.h.bf16 %v3037_v17 }
0x20c8   : > { %3279 = vmatpush3.bf16.msra.mxu1 %v4080_v36  ;;  %3282 = vmatprep.mubr.msk.bf16.mxu1 %vm3644_vm6, %v3643_v37 }
0x20c9   : > { %3280 = vmatprep.subr.bf16.mxu1 %v3643_v37 }
0x20cc   : > { %3281 = vmatpush3.bf16.msra.mxu1 %v4087_v39 }
0x20cd   : > { %3294 = vmatprep.subr.bf16.mxu1 %v3643_v37 }
0x2187   : > { %v1947_v58 = vpop.f32.mrf.mxu1 }
0x2188   : > { %v1948_v59 = vadd.f32 %v4049_v44, %v1947_v58 }
0x2189   : > { %v3268_v60 = vpop.f32.mrf.mxu1 }
0x218a   : > { %1962 = vrot.lane.b32.xlu1 %v1948_v59, %s3646_s6  ;;  %v1954_v5 = vadd.f32 %v3024_v63, %v1948_v59 }
0x218b   : > { %v1950_v61 = vpop.f32.mrf.mxu1 }
0x218c   : > { %v2898_v10 = vmul.f32 -1.442695, %v1954_v5 }
0x218d   : > { %v3269_v62 = vpop.f32.mrf.mxu1 }
0x218e   : > { %3452 = vpow2.f32 %v2898_v10 }
0x219b   : > { %v3453_v11 = vpop.eup %3452 }
0x219c   : > { %v1958_v12 = vadd.f32 1.0, %v3453_v11 }
0x219e   : > { %3454 = vrcp.f32 %v1958_v12 }
0x21ab   : > { %v3455_v13 = vpop.eup %3454 }
0x21ac   : > { %v1972_v20 = vsub.f32 1.0, %v3455_v13  ;;  %v1978_v22 = vmul.f32 %v3455_v13, %v1894_v54 }
0x21fc   : > { %v1963_v14 = vpop.permute.xlu1 %1962 }
0x21fd   : > { %v1965_v15 = vmul.f32 %v3455_v13, %v1963_v14 }
0x21ff   : > { %1967 = vrot.lane.b32.xlu0 %v1965_v15, %s3646_s6 }
0x2271   : > { %v1968_v16 = vpop.permute.xlu0 %1967 }
0x2272   : > { %v1970_v18 = vadd.f32 %v3024_v63, %v1968_v16 }
0x2274   : > { %3456 = vtanh.f32 %v1970_v18 }
0x2281   : > { %v3457_v19 = vpop.eup %3456 }
0x2282   : > { %1974 = vrot.lane.b32.xlu1 %v3457_v19, %s3645_s5 }
0x22f4   : > { %v1975_v21 = vpop.permute.xlu1 %1974 }
0x22f5   : > { %v1977_v23 = vmul.f32 %v1975_v21, %v1972_v20 }
0x22f7   : > { %v1979_v25 = vadd.f32 %v1978_v22, %v1977_v23  ;;  %v3038_v23 = vld [vmem:[%s4117_s1 + $0x18] sm:$0xff]   ;;  %s2320_s1 = sadd.s32 56, %s4111_s30 }
0x22f9   : > { %v4168_v26 = vpack.c.bf16 %v1979_v25, %v1979_v25 }
0x22fb   : > { %1993 = vrot.lane.b32.xlu0 %v4168_v26, %s3645_s5 }
0x236d   : > { %v1994_v27 = vpop.permute.xlu0 %1993 }
0x236e   : > { %3275 = vmatmul.mubr.msk.bf16.vlgmr.msra.gmra.mxu0 %vm398_vm3, %v1994_v27 }
0x236f   : > { %3287 = vmatpush3.bf16.msra.mxu0 %v4080_v36  ;;  %3290 = vmatprep.mubr.msk.bf16.mxu0 %vm3644_vm6, %v3643_v37 }
0x2370   : > { %3288 = vmatprep.subr.bf16.mxu0 %v3643_v37 }
0x2373   : > { %3289 = vmatpush3.bf16.msra.mxu0 %v4087_v39 }
0x242e   : > { %v2032_v6 = vpop.f32.mrf.mxu0 }
0x242f   : > { %v2033_v28 = vadd.f32 %v4049_v44, %v2032_v6 }
0x2430   : > { %v3276_v33 = vpop.f32.mrf.mxu0 }
0x2431   : > { %2047 = vrot.lane.b32.xlu1 %v2033_v28, %s3646_s6  ;;  %v2039_v30 = vadd.f32 %v3027_v48, %v2033_v28 }
0x2432   : > { %v2035_v24 = vpop.f32.mrf.mxu0 }
0x2433   : > { %v2902_v7 = vmul.f32 -1.442695, %v2039_v30 }
0x2434   : > { %v3277_v56 = vpop.f32.mrf.mxu0 }
0x2435   : > { %3458 = vpow2.f32 %v2902_v7 }
0x2442   : > { %v3459_v9 = vpop.eup %3458 }
0x2443   : > { %v2043_v31 = vadd.f32 1.0, %v3459_v9 }
0x2445   : > { %3460 = vrcp.f32 %v2043_v31 }
0x2452   : > { %v3461_v32 = vpop.eup %3460 }
0x2453   : > { %v2057_v2 = vsub.f32 1.0, %v3461_v32  ;;  %v2063_v4 = vmul.f32 %v3461_v32, %v1979_v25  ;;  %v3031_v25 = vunpack.c.l.bf16 %v3038_v23 }
0x24a3   : > { %v2048_v34 = vpop.permute.xlu1 %2047 }
0x24a4   : > { %v2050_v35 = vmul.f32 %v3461_v32, %v2048_v34 }
0x24a6   : > { %2052 = vrot.lane.b32.xlu0 %v2050_v35, %s3646_s6 }
0x2518   : > { %v2053_v38 = vpop.permute.xlu0 %2052 }
0x2519   : > { %v2055_v0 = vadd.f32 %v3027_v48, %v2053_v38 }
0x251b   : > { %3462 = vtanh.f32 %v2055_v0 }
0x2528   : > { %v3463_v1 = vpop.eup %3462 }
0x2529   : > { %2059 = vrot.lane.b32.xlu1 %v3463_v1, %s3645_s5 }
0x259b   : > { %v2060_v3 = vpop.permute.xlu1 %2059 }
0x259c   : > { %v2062_v45 = vmul.f32 %v2060_v3, %v2057_v2 }
0x259e   : > { %v2064_v46 = vadd.f32 %v2063_v4, %v2062_v45 }
0x25a0   : > { %v4183_v47 = vpack.c.bf16 %v2064_v46, %v2064_v46 }
0x25a2   : > { %2078 = vrot.lane.b32.xlu0 %v4183_v47, %s3645_s5 }
0x2614   : > { %v2079_v49 = vpop.permute.xlu0 %2078 }
0x2615   : > { %3283 = vmatmul.mubr.msk.bf16.vlgmr.msra.gmra.mxu1 %vm398_vm3, %v2079_v49 }
0x2616   : > { %3295 = vmatpush3.bf16.msra.mxu1 %v4080_v36  ;;  %3298 = vmatprep.mubr.msk.bf16.mxu1 %vm3644_vm6, %v3643_v37 }
0x2617   : > { %3296 = vmatprep.subr.bf16.mxu1 %v3643_v37 }
0x261a   : > { %3297 = vmatpush3.bf16.msra.mxu1 %v4087_v39 }
0x26d5   : > { %v2117_v50 = vpop.f32.mrf.mxu1 }
0x26d6   : > { %v2118_v51 = vadd.f32 %v4049_v44, %v2117_v50 }
0x26d7   : > { %v3284_v52 = vpop.f32.mrf.mxu1 }
0x26d8   : > { %2132 = vrot.lane.b32.xlu1 %v2118_v51, %s3646_s6  ;;  %v2124_v58 = vadd.f32 %v3028_v57, %v2118_v51 }
0x26d9   : > { %v2120_v53 = vpop.f32.mrf.mxu1 }
0x26da   : > { %v2906_v59 = vmul.f32 -1.442695, %v2124_v58 }
0x26db   : > { %v3285_v54 = vpop.f32.mrf.mxu1 }
0x26dc   : > { %3464 = vpow2.f32 %v2906_v59 }
0x26e9   : > { %v3465_v36 = vpop.eup %3464 }
0x26ea   : > { %v2128_v60 = vadd.f32 1.0, %v3465_v36 }
0x26ec   : > { %3466 = vrcp.f32 %v2128_v60 }
0x26f9   : > { %v3467_v61 = vpop.eup %3466 }
0x26fa   : > { %v2142_v10 = vsub.f32 1.0, %v3467_v61  ;;  %v2148_v12 = vmul.f32 %v3467_v61, %v2064_v46  ;;  %v3032_v46 = vunpack.c.h.bf16 %v3038_v23  ;;  %v2337_v23 = vld [vmem:[%s4306_s8] sm:$0x3] (%p1616_p6)  ;;  %s3648_s8 = smov (%p1616_p6), [#allocation7]  }
0x26fb   :  { %s2666_s14 = sshll.u32 (%p1616_p6), %s3648_s8, 4  ;;  %s2667_s14 = int_to_ptr.vmem [resolvable:$true] %s2666_s14 }
0x26fc   :  { %s3580_s15 = scalar_lea.vmem (%p1616_p6), %s2667_s14, 4096  ;;  %p3585_p8 = scmp.lt.s32.totalorder (%p1616_p6), %s2667_s14, %s2667_s14 }
0x26fd   :  { %p3581_p7 = scmp.ne.s32.totalorder (%p1616_p6), %s2667_s14, %s3580_s15  ;;  %p3586_p9 = scmp.lt.s32.totalorder (%p1616_p6), %s3580_s15, %s3580_s15 }
0x26ff   :  { %p3587_p10 = por (%p1616_p6), %p3586_p9, %p3585_p8 }
0x2701   :  { %p3588_p11 = pnand (%p1616_p6), %p3587_p10, %p3581_p7 }
0x274a   : > { %v2133_v62 = vpop.permute.xlu1 %2132 }
0x274b   : > { %v2135_v37 = vmul.f32 %v3467_v61, %v2133_v62 }
0x274d   : > { %2137 = vrot.lane.b32.xlu0 %v2135_v37, %s3646_s6 }
0x27bf   : > { %v2138_v39 = vpop.permute.xlu0 %2137 }
0x27c0   : > { %v2140_v63 = vadd.f32 %v3028_v57, %v2138_v39 }
0x27c2   : > { %3468 = vtanh.f32 %v2140_v63 }
0x27cf   : > { %v3469_v5 = vpop.eup %3468 }
0x27d0   : > { %2144 = vrot.lane.b32.xlu1 %v3469_v5, %s3645_s5 }
0x2842   : > { %v2145_v11 = vpop.permute.xlu1 %2144 }
0x2843   : > { %v2147_v13 = vmul.f32 %v2145_v11, %v2142_v10  ;;  %v3482_v11 = vld [vmem:[#allocation4 + $0x14] ss:$8 sps:$4 sm:$0xff] (%p1616_p6)  }
0x2844   :  { %2461 = vmatprep.subr.bf16.mxu0 (%p1616_p6), %v3482_v11  ;;  %3306 = vmatprep.subr.bf16.mxu1 (%p1616_p6), %v3482_v11 }
0x2845   : > { %v2149_v14 = vadd.f32 %v2148_v12, %v2147_v13  ;;  %v3484_v12 = vld [vmem:[#allocation4 + $0x10] ss:$8 sps:$4 sm:$0xff] (%p1616_p6)   ;;  %v3647_v13 = vmov (%p1616_p6), 0  }
0x2847   : > { %v4197_v15 = vpack.c.bf16 %v2149_v14, %v2149_v14 }
0x2849   : > { %2163 = vrot.lane.b32.xlu0 %v4197_v15, %s3645_s5 }
0x28bb   : > { %v2164_v16 = vpop.permute.xlu0 %2163 }
0x28bc   : > { %3291 = vmatmul.mubr.msk.bf16.vlgmr.msra.gmra.mxu0 %vm398_vm3, %v2164_v16 }
0x28bd   :  { %2481 = vmatprep.mubr.bf16.mxu0 (%p1616_p6), %v3647_v13  ;;  %2462 = vmatpush1.bf16.msra.mxu0 (%p1616_p6), %v3484_v12 }
0x297c   : > { %v2202_v18 = vpop.f32.mrf.mxu0 }
0x297d   : > { %v2203_v19 = vadd.f32 %v4049_v44, %v2202_v18 }
0x297e   : > { %v3292_v20 = vpop.f32.mrf.mxu0 }
0x297f   : > { %2217 = vrot.lane.b32.xlu1 %v2203_v19, %s3646_s6  ;;  %v2209_v27 = vadd.f32 %v3031_v25, %v2203_v19  ;;  %v2355_v20 = vlaneseq (%p1616_p6) }
0x2980   : > { %v2205_v21 = vpop.f32.mrf.mxu0 }
0x2981   : > { %v2910_v6 = vmul.f32 -1.442695, %v2209_v27  ;;  %v2356_v21 = vshrl.u32 (%p1616_p6), %v2355_v20, 7 }
0x2982   : > { %v3293_v22 = vpop.f32.mrf.mxu0 }
0x2983   : > { %3470 = vpow2.f32 %v2910_v6  ;;  %v2357_v22 = vsub.s32 (%p1616_p6), 0, %v2356_v21 }
0x2985   :  { %v4259_v27 = vrot.slane (%p1616_p6), %v2337_v23, %v2357_v22 }
0x2990   : > { %v3471_v28 = vpop.eup %3470 }
0x2991   : > { %v2213_v33 = vadd.f32 1.0, %v3471_v28 }
0x2993   : > { %3472 = vrcp.f32 %v2213_v33 }
0x29a0   : > { %v3473_v24 = vpop.eup %3472 }
0x29a1   : > { %v2227_v9 = vsub.f32 1.0, %v3473_v24  ;;  %v2233_v32 = vmul.f32 %v3473_v24, %v2149_v14  ;;  %v3485_v14 = vld [vmem:[#allocation4 + $0x4] ss:$8 sps:$4 sm:$0xff] (%p1616_p6)  }
0x29a2   :  { %2463 = vmatprep.subr.bf16.mxu0 (%p1616_p6), %v3485_v14 }
0x29f1   : > { %v2218_v56 = vpop.permute.xlu1 %2217 }
0x29f2   : > { %v2220_v17 = vmul.f32 %v3473_v24, %v2218_v56 }
0x29f4   : > { %2222 = vrot.lane.b32.xlu0 %v2220_v17, %s3646_s6 }
0x2a66   : > { %v2223_v48 = vpop.permute.xlu0 %2222 }
0x2a67   : > { %v2225_v30 = vadd.f32 %v3031_v25, %v2223_v48  ;;  %v2361_v25 = vsub.s32 (%p1616_p6), 1, %v2356_v21 }
0x2a69   : > { %3474 = vtanh.f32 %v2225_v30  ;;  %v4261_v6 = vrot.slane (%p1616_p6), %v2337_v23, %v2361_v25 }
0x2a76   : > { %v3475_v7 = vpop.eup %3474 }
0x2a77   : > { %2229 = vrot.lane.b32.xlu1 %v3475_v7, %s3645_s5 }
0x2ae9   : > { %v2230_v31 = vpop.permute.xlu1 %2229 }
0x2aea   : > { %v2232_v34 = vmul.f32 %v2230_v31, %v2227_v9 }
0x2aec   : > { %v2234_v35 = vadd.f32 %v2233_v32, %v2232_v34 }
0x2aee   : > { %v2236_v38 = vpack.c.bf16 %v2234_v35, %v2234_v35 }
0x2af0   : > { %2248 = vrot.lane.b32.xlu0 %v2236_v38, %s3645_s5 }
0x2b62   : > { %v2249_v0 = vpop.permute.xlu0 %2248 }
0x2b63   : > { %3299 = vmatmul.mubr.msk.bf16.vlgmr.msra.gmra.mxu1 %vm398_vm3, %v2249_v0 }
0x2b64   :  { %2521 = vmatprep.mubr.bf16.mxu1 (%p1616_p6), %v3647_v13  ;;  %3308 = vmatpush1.bf16.msra.mxu1 (%p1616_p6), %v3484_v12 }
0x2b65   :  { %3307 = vmatprep.subr.bf16.mxu1 (%p1616_p6), %v3485_v14 }
0x2c23   : > { %v2287_v1 = vpop.f32.mrf.mxu1 }
0x2c24   : > { %v2288_v2 = vadd.f32 %v4049_v44, %v2287_v1 }
0x2c25   : > { %v3300_v3 = vpop.f32.mrf.mxu1 }
0x2c26   : > { %2302 = vrot.lane.b32.xlu1 %v2288_v2, %s3646_s6  ;;  %v2294_v49 = vadd.f32 %v3032_v46, %v2288_v2 }
0x2c27   : > { %v2290_v4 = vpop.f32.mrf.mxu1 }
0x2c28   : > { %v2914_v50 = vmul.f32 -1.442695, %v2294_v49 }
0x2c29   : > { %v3301_v45 = vpop.f32.mrf.mxu1 }
0x2c2a   : > { %3476 = vpow2.f32 %v2914_v50 }
0x2c37   : > { %v3477_v51 = vpop.eup %3476 }
0x2c38   : > { %v2298_v52 = vadd.f32 1.0, %v3477_v51 }
0x2c3a   : > { %3478 = vrcp.f32 %v2298_v52 }
0x2c47   : > { %v3479_v53 = vpop.eup %3478 }
0x2c98   : > { %v2303_v54 = vpop.permute.xlu1 %2302 }
0x2c99   : > { %v2305_v57 = vmul.f32 %v3479_v53, %v2303_v54 }
0x2c9b   : > { %2307 = vrot.lane.b32.xlu0 %v2305_v57, %s3646_s6  ;;  %s2076_s6 = scalar_lea.vmem [#allocation2], %s2904_s7 }
0x2c9f   : > { %1730 = vrot.lane.b32.xlu0 %v4122_v8, %s3645_s5  ;;  %v2312_v8 = vsub.f32 1.0, %v3479_v53 }
0x2ca3   : > { %1900 = vrot.lane.b32.xlu0 %v4153_v55, %s3645_s5 }
0x2ca7   : > { %2070 = vrot.lane.b32.xlu0 %v4183_v47, %s3645_s5  ;;  %v2318_v47 = vmul.f32 %v3479_v53, %v2234_v35 }
0x2cab   : > { %2240 = vrot.lane.b32.xlu0 %v2236_v38, %s3645_s5 }
0x2d0d   : > { %v2308_v58 = vpop.permute.xlu0 %2307 }
0x2d0e   : > { %v2310_v59 = vadd.f32 %v3032_v46, %v2308_v58 }
0x2d10   : > { %3480 = vtanh.f32 %v2310_v59 }
0x2d11   : > { %v1731_v36 = vpop.permute.xlu0 %1730 }
0x2d12   : > { %1737 = vst.msk [vmem:[%s1736_s12] sm:$0xf] %vm302_vm2, %v1731_v36  ;;  %s2328_s12 = sshra.s32 %s2320_s1, 3 }
0x2d1d   : > { %v3481_v60 = vpop.eup %3480 }
0x2d1e   : > { %2314 = vrot.lane.b32.xlu1 %v3481_v60, %s3645_s5 }
0x2d22   : > { %1815 = vrot.lane.b32.xlu1 %v4137_v29, %s3645_s5  ;;  %v1901_v29 = vpop.permute.xlu0 %1900 }
0x2d26   : > { %1985 = vrot.lane.b32.xlu1 %v4168_v26, %s3645_s5  ;;  %v2071_v37 = vpop.permute.xlu0 %2070 }
0x2d2a   : > { %2155 = vrot.lane.b32.xlu1 %v4197_v15, %s3645_s5  ;;  %v2241_v5 = vpop.permute.xlu0 %2240  ;;  %v3487_v15 = vld [vmem:[#allocation4] ss:$8 sps:$4 sm:$0xff] (%p1616_p6)  }
0x2d2b   :  { %2464 = vmatpush1.bf16.msra.mxu0 (%p1616_p6), %v3487_v15  ;;  %3309 = vmatpush1.bf16.msra.mxu1 (%p1616_p6), %v3487_v15 }
0x2d90   : > { %v2315_v55 = vpop.permute.xlu1 %2314 }
0x2d91   : > { %v2317_v61 = vmul.f32 %v2315_v55, %v2312_v8 }
0x2d93   : > { %v2319_v35 = vadd.f32 %v2318_v47, %v2317_v61  }
0x2d94   : > { %v1816_v26 = vpop.permute.xlu1 %1815 }
0x2d95   : > { %v3000_v62 = vpack.c.bf16 %v2319_v35, %v2319_v35  ;;  %1822 = vst.msk [vmem:[%s1821_s24] sm:$0xf] %vm302_vm2, %v1816_v26 }
0x2d96   : > { %1907 = vst.msk [vmem:[%s1906_s25] sm:$0xf] %vm302_vm2, %v1901_v29 }
0x2d97   : > { %2325 = vrot.lane.b32.xlu1 %v3000_v62, %s3645_s5  ;;  %s2916_s5 = sshll.u32 %s2328_s12, 2 }
0x2d98   : > { %v1986_v39 = vpop.permute.xlu1 %1985  ;;  %s2331_s13 = scalar_lea.vmem [#allocation2], %s2916_s5 }
0x2d99   : > { %1992 = vst.msk [vmem:[%s1991_s28] sm:$0xf] %vm302_vm2, %v1986_v39 }
0x2d9a   : > { %2077 = vst.msk [vmem:[%s2076_s6] sm:$0xf] %vm302_vm2, %v2071_v37 }
0x2d9c   : > { %v2156_v63 = vpop.permute.xlu1 %2155 }
0x2d9d   : > { %2162 = vst.msk [vmem:[%s2161_s10] sm:$0xf] %vm302_vm2, %v2156_v63 }
0x2d9e   : > { %2247 = vst.msk [vmem:[%s2246_s11] sm:$0xf] %vm302_vm2, %v2241_v5 }
0x2e06   :  { %1618 = sbr.rel (!%p1616_p6) target bundleno = 6235 (0x185b), region = 108 }
0x2e09   : > { %v2326_v10 = vpop.permute.xlu1 %2325 }
0x2e0a   : > { %2332 = vst.msk [vmem:[%s2331_s13] sm:$0xf] %vm302_vm2, %v2326_v10 }
0x2e11   :  { %v3488_v16 = vld [vmem:[#allocation2] sm:$0xff]   ;;  %v3490_v40 = vld [vmem:[#allocation2 + $0x8] sm:$0xff]   ;;  %v3492_v42 = vld [vmem:[#allocation2 + $0x10] sm:$0xff]  }
0x2e12   :  { %v3489_v18 = vld [vmem:[#allocation2 + $0x20] sm:$0xff]   ;;  %2929 = vmatmul.mubr.msk.bf16.vlgmr.msra.gmra.mxu0 %vm398_vm3, %v3488_v16  ;;  %v3491_v41 = vld [vmem:[#allocation2 + $0x28] sm:$0xff]   ;;  %v3493_v43 = vld [vmem:[#allocation2 + $0x30] sm:$0xff]  }
0x2e13   :  { %2933 = vmatmul.mubr.msk.bf16.vlgmr.msra.gmra.mxu1 %vm398_vm3, %v3489_v18  ;;  %2491 = vmatprep.mubr.bf16.mxu0 %v3647_v13  ;;  %v3494_v44 = vld [vmem:[#allocation2 + $0x18] sm:$0xff]  }
0x2e14   :  { %2531 = vmatprep.mubr.bf16.mxu1 %v3647_v13  ;;  %v3495_v19 = vld [vmem:[#allocation2 + $0x38] sm:$0xff]  }
0x2e1a   :  { %2930 = vmatmul.mubr.msk.bf16.gmra.mxu0 %vm398_vm3, %v3490_v40 }
0x2e1b   :  { %2934 = vmatmul.mubr.msk.bf16.gmra.mxu1 %vm398_vm3, %v3491_v41  ;;  %2501 = vmatprep.mubr.bf16.mxu0 %v3647_v13 }
0x2e1c   :  { %2541 = vmatprep.mubr.bf16.mxu1 %v3647_v13 }
0x2e22   :  { %2931 = vmatmul.mubr.msk.bf16.gmra.mxu0 %vm398_vm3, %v3492_v42 }
0x2e23   :  { %2935 = vmatmul.mubr.msk.bf16.gmra.mxu1 %vm398_vm3, %v3493_v43  ;;  %2511 = vmatprep.mubr.bf16.mxu0 %v3647_v13 }
0x2e24   :  { %2551 = vmatprep.mubr.bf16.mxu1 %v3647_v13 }
0x2e2a   :  { %2932 = vmatmul.mubr.msk.bf16.gmra.mxu0 %vm398_vm3, %v3494_v44 }
0x2e2b   :  { %2936 = vmatmul.mubr.msk.bf16.gmra.mxu1 %vm398_vm3, %v3495_v19 }
0x2ed2   :  { %v2483_v28 = vpop.f32.mrf.mxu0 }
0x2ed3   :  { %v2523_v33 = vpop.f32.mrf.mxu1  ;;  %v2484_v24 = vadd.f32 %v2483_v28, %v4259_v27 }
0x2ed4   :  { %v2524_v56 = vadd.f32 %v2523_v33, %v4259_v27  ;;  %v2485_v17 = vpop.f32.mrf.mxu0 }
0x2ed5   :  { %v2525_v48 = vpop.f32.mrf.mxu1  ;;  %v2562_v30 = vmul.f32 1.442695, %v2484_v24  ;;  %v2486_v9 = vadd.f32 %v2485_v17, %v4261_v6 }
0x2ed6   :  { %v2594_v7 = vmul.f32 1.442695, %v2524_v56  ;;  %v2526_v31 = vadd.f32 %v2525_v48, %v4261_v6  ;;  %v2487_v32 = vpop.f32.mrf.mxu0 }
0x2ed7   :  { %v2527_v34 = vpop.f32.mrf.mxu1  ;;  %3496 = vpow2.f32 %v2562_v30  ;;  %v2564_v35 = vmul.f32 1.442695, %v2486_v9  ;;  %v2488_v0 = vadd.f32 %v2487_v32, %v4259_v27 }
0x2ed8   :  { %v2596_v38 = vmul.f32 1.442695, %v2526_v31  ;;  %3498 = vpow2.f32 %v2594_v7  ;;  %v2528_v1 = vadd.f32 %v2527_v34, %v4259_v27  ;;  %v2489_v2 = vpop.f32.mrf.mxu0 }
0x2ed9   :  { %v2529_v3 = vpop.f32.mrf.mxu1  ;;  %3500 = vpow2.f32 %v2564_v35  ;;  %v2566_v4 = vmul.f32 1.442695, %v2488_v0  ;;  %v2490_v45 = vadd.f32 %v2489_v2, %v4261_v6 }
0x2eda   :  { %v2530_v46 = vadd.f32 %v2529_v3, %v4261_v6  ;;  %3502 = vpow2.f32 %v2596_v38  ;;  %v2598_v49 = vmul.f32 1.442695, %v2528_v1  ;;  %v2493_v50 = vpop.f32.mrf.mxu0 }
0x2edb   :  { %v2533_v51 = vpop.f32.mrf.mxu1  ;;  %3504 = vpow2.f32 %v2566_v4  ;;  %v2568_v52 = vmul.f32 1.442695, %v2490_v45  ;;  %v2494_v54 = vadd.f32 %v2493_v50, %v4259_v27 }
0x2edc   :  { %v2600_v53 = vmul.f32 1.442695, %v2530_v46  ;;  %3506 = vpow2.f32 %v2598_v49  ;;  %v2534_v57 = vadd.f32 %v2533_v51, %v4259_v27  ;;  %v2495_v58 = vpop.f32.mrf.mxu0 }
0x2edd   :  { %v2535_v59 = vpop.f32.mrf.mxu1  ;;  %3508 = vpow2.f32 %v2568_v52  ;;  %v2570_v36 = vmul.f32 1.442695, %v2494_v54  ;;  %v2496_v60 = vadd.f32 %v2495_v58, %v4261_v6 }
0x2ede   :  { %v2536_v8 = vadd.f32 %v2535_v59, %v4261_v6  ;;  %3510 = vpow2.f32 %v2600_v53  ;;  %v2602_v55 = vmul.f32 1.442695, %v2534_v57  ;;  %v2497_v29 = vpop.f32.mrf.mxu0 }
0x2edf   :  { %v2537_v47 = vpop.f32.mrf.mxu1  ;;  %3512 = vpow2.f32 %v2570_v36  ;;  %v2572_v61 = vmul.f32 1.442695, %v2496_v60  ;;  %v2498_v62 = vadd.f32 %v2497_v29, %v4259_v27 }
0x2ee0   :  { %v2604_v26 = vmul.f32 1.442695, %v2536_v8  ;;  %3514 = vpow2.f32 %v2602_v55  ;;  %v2538_v37 = vadd.f32 %v2537_v47, %v4259_v27  ;;  %v2499_v39 = vpop.f32.mrf.mxu0 }
0x2ee1   :  { %v2539_v63 = vpop.f32.mrf.mxu1  ;;  %3516 = vpow2.f32 %v2572_v61  ;;  %v2574_v5 = vmul.f32 1.442695, %v2498_v62  ;;  %v2500_v10 = vadd.f32 %v2499_v39, %v4261_v6 }
0x2ee2   :  { %v2540_v11 = vadd.f32 %v2539_v63, %v4261_v6  ;;  %3518 = vpow2.f32 %v2604_v26  ;;  %v2606_v12 = vmul.f32 1.442695, %v2538_v37  ;;  %v2503_v13 = vpop.f32.mrf.mxu0 }
0x2ee3   :  { %v2543_v14 = vpop.f32.mrf.mxu1  ;;  %3520 = vpow2.f32 %v2574_v5  ;;  %v2576_v15 = vmul.f32 1.442695, %v2500_v10  ;;  %v2504_v18 = vadd.f32 %v2503_v13, %v4259_v27 }
0x2ee4   :  { %v2608_v16 = vmul.f32 1.442695, %v2540_v11  ;;  %v3497_v40 = vpop.eup %3496  ;;  %3522 = vpow2.f32 %v2606_v12  ;;  %v2544_v41 = vadd.f32 %v2543_v14, %v4259_v27  ;;  %v2505_v42 = vpop.f32.mrf.mxu0 }
0x2ee5   :  { %v2545_v43 = vpop.f32.mrf.mxu1  ;;  %v3499_v44 = vpop.eup %3498  ;;  %2629 = vst [vmem:[#allocation7] sm:$0xff] %v3497_v40  ;;  %3524 = vpow2.f32 %v2576_v15  ;;  %v2578_v19 = vmul.f32 1.442695, %v2504_v18  ;;  %v2506_v20 = vadd.f32 %v2505_v42, %v4261_v6 }
0x2ee6   :  { %v2546_v21 = vadd.f32 %v2545_v43, %v4261_v6  ;;  %v3501_v22 = vpop.eup %3500  ;;  %2645 = vst [vmem:[#allocation7 + $0x80] sm:$0xff] %v3499_v44  ;;  %3526 = vpow2.f32 %v2608_v16  ;;  %v2610_v23 = vmul.f32 1.442695, %v2544_v41  ;;  %v2507_v25 = vpop.f32.mrf.mxu0 }
0x2ee7   :  { %v2547_v28 = vpop.f32.mrf.mxu1  ;;  %v3503_v33 = vpop.eup %3502  ;;  %2630 = vst [vmem:[#allocation7 + $0x8] sm:$0xff] %v3501_v22  ;;  %3528 = vpow2.f32 %v2578_v19  ;;  %v2580_v24 = vmul.f32 1.442695, %v2506_v20  ;;  %v2508_v17 = vadd.f32 %v2507_v25, %v4259_v27 }
0x2ee8   :  { %v2612_v56 = vmul.f32 1.442695, %v2546_v21  ;;  %v3505_v48 = vpop.eup %3504  ;;  %2646 = vst [vmem:[#allocation7 + $0x88] sm:$0xff] %v3503_v33  ;;  %3530 = vpow2.f32 %v2610_v23  ;;  %v2548_v30 = vadd.f32 %v2547_v28, %v4259_v27  ;;  %v2509_v7 = vpop.f32.mrf.mxu0 }
0x2ee9   :  { %v2549_v9 = vpop.f32.mrf.mxu1  ;;  %v3507_v31 = vpop.eup %3506  ;;  %2631 = vst [vmem:[#allocation7 + $0x10] sm:$0xff] %v3505_v48  ;;  %3532 = vpow2.f32 %v2580_v24  ;;  %v2582_v32 = vmul.f32 1.442695, %v2508_v17  ;;  %v2510_v34 = vadd.f32 %v2509_v7, %v4261_v6 }
0x2eea   :  { %v2550_v35 = vadd.f32 %v2549_v9, %v4261_v6  ;;  %v3509_v38 = vpop.eup %3508  ;;  %2647 = vst [vmem:[#allocation7 + $0x90] sm:$0xff] %v3507_v31  ;;  %3534 = vpow2.f32 %v2612_v56  ;;  %v2614_v0 = vmul.f32 1.442695, %v2548_v30  ;;  %v2513_v1 = vpop.f32.mrf.mxu0 }
0x2eeb   :  { %v2553_v2 = vpop.f32.mrf.mxu1  ;;  %v3511_v3 = vpop.eup %3510  ;;  %2632 = vst [vmem:[#allocation7 + $0x18] sm:$0xff] %v3509_v38  ;;  %3536 = vpow2.f32 %v2582_v32  ;;  %v2584_v4 = vmul.f32 1.442695, %v2510_v34  ;;  %v2514_v46 = vadd.f32 %v2513_v1, %v4259_v27 }
0x2eec   :  { %v2616_v45 = vmul.f32 1.442695, %v2550_v35  ;;  %v3513_v49 = vpop.eup %3512  ;;  %2648 = vst [vmem:[#allocation7 + $0x98] sm:$0xff] %v3511_v3  ;;  %3538 = vpow2.f32 %v2614_v0  ;;  %v2554_v50 = vadd.f32 %v2553_v2, %v4259_v27  ;;  %v2515_v51 = vpop.f32.mrf.mxu0 }
0x2eed   :  { %v2555_v52 = vpop.f32.mrf.mxu1  ;;  %v3515_v53 = vpop.eup %3514  ;;  %2633 = vst [vmem:[#allocation7 + $0x20] sm:$0xff] %v3513_v49  ;;  %3540 = vpow2.f32 %v2584_v4  ;;  %v2586_v54 = vmul.f32 1.442695, %v2514_v46  ;;  %v2516_v57 = vadd.f32 %v2515_v51, %v4261_v6 }
0x2eee   :  { %v2556_v58 = vadd.f32 %v2555_v52, %v4261_v6  ;;  %v3517_v59 = vpop.eup %3516  ;;  %2649 = vst [vmem:[#allocation7 + $0xa0] sm:$0xff] %v3515_v53  ;;  %3542 = vpow2.f32 %v2616_v45  ;;  %v2618_v36 = vmul.f32 1.442695, %v2554_v50  ;;  %v2517_v60 = vpop.f32.mrf.mxu0 }
0x2eef   :  { %v2557_v8 = vpop.f32.mrf.mxu1  ;;  %v3519_v55 = vpop.eup %3518  ;;  %2634 = vst [vmem:[#allocation7 + $0x28] sm:$0xff] %v3517_v59  ;;  %3544 = vpow2.f32 %v2586_v54  ;;  %v2588_v29 = vmul.f32 1.442695, %v2516_v57  ;;  %v2518_v61 = vadd.f32 %v2517_v60, %v4259_v27 }
0x2ef0   :  { %v2620_v47 = vmul.f32 1.442695, %v2556_v58  ;;  %v3521_v26 = vpop.eup %3520  ;;  %2650 = vst [vmem:[#allocation7 + $0xa8] sm:$0xff] %v3519_v55  ;;  %3546 = vpow2.f32 %v2618_v36  ;;  %v2558_v62 = vadd.f32 %v2557_v8, %v4259_v27  ;;  %v2519_v37 = vpop.f32.mrf.mxu0 }
0x2ef1   :  { %v2559_v39 = vpop.f32.mrf.mxu1  ;;  %v3523_v63 = vpop.eup %3522  ;;  %2635 = vst [vmem:[#allocation7 + $0x30] sm:$0xff] %v3521_v26  ;;  %3548 = vpow2.f32 %v2588_v29  ;;  %v2590_v5 = vmul.f32 1.442695, %v2518_v61  ;;  %v2520_v10 = vadd.f32 %v2519_v37, %v4261_v6 }
0x2ef2   :  { %v2560_v11 = vadd.f32 %v2559_v39, %v4261_v6  ;;  %v3525_v12 = vpop.eup %3524  ;;  %2651 = vst [vmem:[#allocation7 + $0xb0] sm:$0xff] %v3523_v63  ;;  %3550 = vpow2.f32 %v2620_v47  ;;  %v2622_v13 = vmul.f32 1.442695, %v2558_v62 }
0x2ef3   :  { %v3527_v14 = vpop.eup %3526  ;;  %2636 = vst [vmem:[#allocation7 + $0x38] sm:$0xff] %v3525_v12  ;;  %3552 = vpow2.f32 %v2590_v5  ;;  %v2592_v15 = vmul.f32 1.442695, %v2520_v10 }
0x2ef4   :  { %v2624_v16 = vmul.f32 1.442695, %v2560_v11  ;;  %v3529_v27 = vpop.eup %3528  ;;  %2652 = vst [vmem:[#allocation7 + $0xb8] sm:$0xff] %v3527_v14  ;;  %3554 = vpow2.f32 %v2622_v13 }
0x2ef5   :  { %v3531_v18 = vpop.eup %3530  ;;  %2637 = vst [vmem:[#allocation7 + $0x40] sm:$0xff] %v3529_v27  ;;  %3556 = vpow2.f32 %v2592_v15 }
0x2ef6   :  { %v3533_v40 = vpop.eup %3532  ;;  %2653 = vst [vmem:[#allocation7 + $0xc0] sm:$0xff] %v3531_v18  ;;  %3558 = vpow2.f32 %v2624_v16 }
0x2ef7   :  { %v3535_v41 = vpop.eup %3534  ;;  %2638 = vst [vmem:[#allocation7 + $0x48] sm:$0xff] %v3533_v40 }
0x2ef8   :  { %v3537_v6 = vpop.eup %3536  ;;  %2654 = vst [vmem:[#allocation7 + $0xc8] sm:$0xff] %v3535_v41 }
0x2ef9   :  { %v3539_v42 = vpop.eup %3538  ;;  %2639 = vst [vmem:[#allocation7 + $0x50] sm:$0xff] %v3537_v6 }
0x2efa   :  { %v3541_v43 = vpop.eup %3540  ;;  %2655 = vst [vmem:[#allocation7 + $0xd0] sm:$0xff] %v3539_v42 }
0x2efb   :  { %v3543_v44 = vpop.eup %3542  ;;  %2640 = vst [vmem:[#allocation7 + $0x58] sm:$0xff] %v3541_v43 }
0x2efc   :  { %v3545_v19 = vpop.eup %3544  ;;  %2656 = vst [vmem:[#allocation7 + $0xd8] sm:$0xff] %v3543_v44 }
0x2efd   :  { %v3547_v20 = vpop.eup %3546  ;;  %2641 = vst [vmem:[#allocation7 + $0x60] sm:$0xff] %v3545_v19 }
0x2efe   :  { %v3549_v21 = vpop.eup %3548  ;;  %2657 = vst [vmem:[#allocation7 + $0xe0] sm:$0xff] %v3547_v20 }
0x2eff   :  { %v3551_v22 = vpop.eup %3550  ;;  %2642 = vst [vmem:[#allocation7 + $0x68] sm:$0xff] %v3549_v21 }
0x2f00   :  { %v3553_v23 = vpop.eup %3552  ;;  %2658 = vst [vmem:[#allocation7 + $0xe8] sm:$0xff] %v3551_v22 }
0x2f01   :  { %v3555_v25 = vpop.eup %3554  ;;  %2643 = vst [vmem:[#allocation7 + $0x70] sm:$0xff] %v3553_v23 }
0x2f02   :  { %v3557_v28 = vpop.eup %3556  ;;  %2659 = vst [vmem:[#allocation7 + $0xf0] sm:$0xff] %v3555_v25 }
0x2f03   :  { %v3559_v33 = vpop.eup %3558  ;;  %2644 = vst [vmem:[#allocation7 + $0x78] sm:$0xff] %v3557_v28 }
0x2f04   :  { %2660 = vst [vmem:[#allocation7 + $0xf8] sm:$0xff] %v3559_v33 }
0x2f05   :  { %3591 = shalt.err (!%p3588_p11)
}
0x2f06   :  { %s3649_s27 = smov 256   ;;  %s3650_s16 = smov 16  }
0x2f07   :  { %2672 = dma.vmem_to_hbm [thread:$0]  %s2667_s14, 4096, %s4307_s9, [#allocation6], %s3649_s27, %s3649_s27, %s3650_s16  }
0x2f08   :  { %3618 = dma.done.wait [#allocation6], 4096  }
0x2f09   :  { %3619 = vsyncadd [#allocation6], 4294963200 }
0x2f0a   :  { %2676 = vsyncpa [#allocation5], 1 }
0x2f0b   :  { %2677 = vsyncpa [#allocation6], 1 }

</bundles_post_ra>
